<compile_context>
chip_gen: v7x
topology: tpu7x:2x2x1
jax: 0.10.0
libtpu: 0.0.40
codegen_flags: <defaults>
</compile_context>

<pallas_src>
import functools

import numpy as np
import jax
import jax.numpy as jnp
from jax.experimental import pallas as pl
from jax.experimental.pallas import tpu as pltpu


# ----------------------------------------------------------------------------
# Kernel: one grid step = B_TILE images.  All activations are (CP, L) f32 with
# channels (padded to CP) on sublanes and (image, pixel) on lanes, L = B_TILE*H*W.
# Constant slabs:
#   w_ref   (63, CP, CP): slot*9 + tap  -> per-tap (Cout, Cin) weight
#           slots: 0=c1.w1 1=c1.w2 2=c2.w1 3=c2.w2 4=c3.x 5=c3.x1 6=c3.x2
#   wid_ref (2, CP, CP):  1x1 identity weights (c1, c2)
#   b_ref   (7, CP, 1):   biases: c1.b1 c1.b2 c1.bid c2.b1 c2.b2 c2.bid b3
#   masks   (9, L) f32:   tap validity (zeros roll wrap-around / cross-image /
#                         out-of-image taps)
# ----------------------------------------------------------------------------
def _tap_offsets(W, dd):
    return [(ky - 1) * dd * W + (kx - 1) * dd
            for ky in range(3) for kx in range(3)]


def _dense_block_kernel(*refs, W, L, d, cp, cout):
    if d == 1:
        x_ref, md_ref, w_ref, wid_ref, b_ref, o_ref = refs
        m1_ref = md_ref
    else:
        x_ref, md_ref, m1_ref, w_ref, wid_ref, b_ref, o_ref = refs

    def lrelu(v, s):
        return jnp.maximum(v, s * v)            # == LeakyReLU for 0 < s < 1

    def rolled(img, off):
        sh = (-off) % L
        return img if sh == 0 else pltpu.roll(img, shift=sh, axis=1)

    def mm(wmat, act):
        return jnp.dot(wmat, act, preferred_element_type=jnp.float32)

    def conv3x3(img, slot, masks, offs, extra_slot=None):
        # sum_t W[slot*9+t] @ (roll(img, tap_t) * mask_t).  If extra_slot is
        # given, also accumulate conv3's group that consumes `img`, reusing the
        # same rolled+masked taps (valid only when this conv's dilation == 1).
        acc = None
        acc_e = None
        for t in range(9):
            off = offs[t]
            if off == 0:                        # center tap: mask is all-ones
                it = img
            else:
                it = rolled(img, off) * masks[t:t + 1, :]
            term = mm(w_ref[slot * 9 + t], it)
            acc = term if acc is None else acc + term
            if extra_slot is not None:
                term_e = mm(w_ref[extra_slot * 9 + t], it)
                acc_e = term_e if acc_e is None else acc_e + term_e
        return acc if extra_slot is None else (acc, acc_e)

    x0 = x_ref[...]                             # (CP, L), channels zero-padded
    m_d = md_ref[...]                           # (9, L)
    offs_d = _tap_offsets(W, d)

    # --- UNetConvBlock 1 (+ fused conv3 "x" group when d == 1) --------------
    if d == 1:
        h, c3_x = conv3x3(x0, 0, m_d, offs_d, extra_slot=4)
    else:
        h = conv3x3(x0, 0, m_d, offs_d)
    h = lrelu(h + b_ref[0], 0.1)
    h = lrelu(conv3x3(h, 1, m_d, offs_d) + b_ref[1], 0.1)
    x1 = lrelu(h + mm(wid_ref[0], x0) + b_ref[2], 0.2)

    # --- UNetConvBlock 2 (+ fused conv3 "x1" group when d == 1) -------------
    if d == 1:
        h, c3_x1 = conv3x3(x1, 2, m_d, offs_d, extra_slot=5)
    else:
        h = conv3x3(x1, 2, m_d, offs_d)
    h = lrelu(h + b_ref[3], 0.1)
    h = lrelu(conv3x3(h, 3, m_d, offs_d) + b_ref[4], 0.1)
    x2 = lrelu(h + mm(wid_ref[1], x1) + b_ref[5], 0.2)

    # --- conv3 on cat(x, x1, x2): split weights, concat never materialized --
    if d == 1:
        m_c, offs_c = m_d, offs_d
    else:
        m_c, offs_c = m1_ref[...], _tap_offsets(W, 1)
        c3_x = conv3x3(x0, 4, m_c, offs_c)
        c3_x1 = conv3x3(x1, 5, m_c, offs_c)
    c3_x2 = conv3x3(x2, 6, m_c, offs_c)

    y3 = lrelu(c3_x + c3_x1 + c3_x2 + b_ref[6], 0.2)
    o_ref[...] = y3[:cout, :].astype(o_ref.dtype)


# ----------------------------------------------------------------------------
# Host-side helpers
# ----------------------------------------------------------------------------
def _shift_masks(H, W, dd):
    """(9, H*W) f32 validity masks for the 9 taps of a 3x3 conv, dilation dd."""
    yy = np.arange(H)[:, None]
    xx = np.arange(W)[None, :]
    ms = []
    for ky in range(3):
        for kx in range(3):
            oy, ox = (ky - 1) * dd, (kx - 1) * dd
            m = ((yy + oy >= 0) & (yy + oy < H)
                 & (xx + ox >= 0) & (xx + ox < W))
            ms.append(m.reshape(-1))
    return np.stack(ms, 0).astype(np.float32)


def _pick_batch_tile(n, hw, max_lanes=4096):
    """Largest divisor of n that widens lanes while keeping >= 2 grid steps."""
    best = 1
    for bt in range(1, n + 1):
        if n % bt:
            continue
        if bt * hw > max_lanes:
            break
        if n == 1 or n // bt >= 2:
            best = bt
    return best


def _pack_params(params, cin, gc, cout, cp):
    """Pack the 16 weight/bias tensors into 3 zero-padded slabs."""
    def tap_w(w_hwio, co, ci):              # HWIO (3,3,ci,co) -> (9, cp, cp)
        w = jnp.transpose(w_hwio, (0, 1, 3, 2)).reshape(9, co, ci)
        return jnp.pad(w, ((0, 0), (0, cp - co), (0, cp - ci)))

    def idw(w_ic, co, ci):                  # (ci, co) -> (cp, cp), transposed
        return jnp.pad(jnp.transpose(w_ic), ((0, cp - co), (0, cp - ci)))

    def bias(b, c):                         # (c,) -> (cp, 1)
        return jnp.pad(b, (0, cp - c)).reshape(cp, 1)

    p1, p2, w3 = params["conv1"], params["conv2"], params["w3"]
    w_slab = jnp.concatenate([
        tap_w(p1["w1"], gc, cin),
        tap_w(p1["w2"], gc, gc),
        tap_w(p2["w1"], gc, gc),
        tap_w(p2["w2"], gc, gc),
        tap_w(w3[:, :, :cin, :], cout, cin),          # conv3 group for x
        tap_w(w3[:, :, cin:cin + gc, :], cout, gc),   # conv3 group for x1
        tap_w(w3[:, :, cin + gc:, :], cout, gc),      # conv3 group for x2
    ], axis=0)                                         # (63, cp, cp)
    wid_slab = jnp.stack([idw(p1["wid"], gc, cin), idw(p2["wid"], gc, gc)], 0)
    b_slab = jnp.stack([
        bias(p1["b1"], gc), bias(p1["b2"], gc), bias(p1["bid"], gc),
        bias(p2["b1"], gc), bias(p2["b2"], gc), bias(p2["bid"], gc),
        bias(params["b3"], cout)], 0)                  # (7, cp, 1)
    return w_slab, wid_slab, b_slab


def _const_spec(arr):
    zero = (0,) * arr.ndim
    return pl.BlockSpec(arr.shape, lambda *_: zero)


def dense_block_forward(x_nchw, params, *, d=1, batch_tile=None):
    """x_nchw: (N, Cin, H, W) f32 -> (N, Cout, H, W) f32 (NCHW, like torch)."""
    N, Cin, H, W = x_nchw.shape
    HW = H * W
    gc = int(params["conv1"]["b1"].shape[0])
    Cout = int(params["b3"].shape[0])
    CP = max(8, -(-max(Cin, gc, Cout) // 8) * 8)      # pad channel dims to 8k

    if batch_tile is None:
        batch_tile = _pick_batch_tile(N, HW)
    assert N % batch_tile == 0, "batch_tile must divide N"
    G = N // batch_tile
    L = batch_tile * HW

    # (N, Cin, H, W) -> (CP, N*HW): channels on sublanes, (image, pixel) lanes.
    x = jnp.transpose(x_nchw.reshape(N, Cin, HW), (1, 0, 2)).reshape(Cin, N * HW)
    x = jnp.pad(x, ((0, CP - Cin), (0, 0)))

    w_slab, wid_slab, b_slab = _pack_params(params, Cin, gc, Cout, CP)

    consts = [jnp.asarray(np.tile(_shift_masks(H, W, d), (1, batch_tile)))]
    if d != 1:
        consts.append(
            jnp.asarray(np.tile(_shift_masks(H, W, 1), (1, batch_tile))))
    consts += [w_slab, wid_slab, b_slab]
    const_specs = [_const_spec(c) for c in consts]

    kern = functools.partial(_dense_block_kernel,
                             W=W, L=L, d=d, cp=CP, cout=Cout)
    out2d = pl.pallas_call(
        kern,
        out_shape=jax.ShapeDtypeStruct((Cout, N * HW), x_nchw.dtype),
        grid_spec=pltpu.PrefetchScalarGridSpec(
            num_scalar_prefetch=0,
            grid=(G,),
            in_specs=[pl.BlockSpec((CP, L), lambda n: (0, n))] + const_specs,
            out_specs=pl.BlockSpec((Cout, L), lambda n: (0, n)),
        ),
        compiler_params=pltpu.CompilerParams(
            dimension_semantics=("parallel",)),
    )(x, *consts)

    # (Cout, N*HW) -> (N, Cout, H, W)
    return jnp.transpose(out2d.reshape(Cout, N, HW),
                         (1, 0, 2)).reshape(N, Cout, H, W)


# ----------------------------------------------------------------------------
# Deterministic parameter init (xavier_normal * 0.1, zero bias), per __init__
# ----------------------------------------------------------------------------
def _xavier_conv(key, kh, kw, cin, cout, scale=0.1):
    fan_in = cin * kh * kw
    fan_out = cout * kh * kw
    std = (2.0 / (fan_in + fan_out)) ** 0.5
    return scale * std * jax.random.normal(key, (kh, kw, cin, cout), jnp.float32)


def init_dense_block_params(key, channel_in, channel_out, gc=8):
    keys = jax.random.split(key, 7)

    def block(k0, k1, k2, cin, cout):
        return {
            "w1": _xavier_conv(k0, 3, 3, cin, cout),
            "b1": jnp.zeros((cout,), jnp.float32),
            "w2": _xavier_conv(k1, 3, 3, cout, cout),
            "b2": jnp.zeros((cout,), jnp.float32),
            "wid": _xavier_conv(k2, 1, 1, cin, cout).reshape(cin, cout),
            "bid": jnp.zeros((cout,), jnp.float32),
        }

    return {
        "conv1": block(keys[0], keys[1], keys[2], channel_in, gc),
        "conv2": block(keys[3], keys[4], keys[5], gc, gc),
        "w3": _xavier_conv(keys[6], 3, 3, channel_in + 2 * gc, channel_out),
        "b3": jnp.zeros((channel_out,), jnp.float32),
    }


# ----------------------------------------------------------------------------
# Pure-JAX reference (NHWC + lax conv) for correctness check
# ----------------------------------------------------------------------------
def _ref_conv(x, w, b, *, dil, pad):
    y = jax.lax.conv_general_dilated(
        x, w, window_strides=(1, 1), padding=[(pad, pad), (pad, pad)],
        rhs_dilation=(dil, dil), dimension_numbers=("NHWC", "HWIO", "NHWC"))
    return y + b


def _lrelu(x, s):
    return jnp.where(x >= 0, x, s * x)


def _ref_block(x, p, d):
    y1 = _lrelu(_ref_conv(x, p["w1"], p["b1"], dil=d, pad=d), 0.1)
    y2 = _lrelu(_ref_conv(y1, p["w2"], p["b2"], dil=d, pad=d), 0.1)
    cin, cout = p["wid"].shape
    idn = _ref_conv(x, p["wid"].reshape(1, 1, cin, cout), p["bid"],
                    dil=1, pad=0)
    return _lrelu(y2 + idn, 0.2)


def _ref_forward(x_nchw, params, d=1):
    x = jnp.transpose(x_nchw, (0, 2, 3, 1))
    x1 = _ref_block(x, params["conv1"], d)
    x2 = _ref_block(x1, params["conv2"], d)
    xc = jnp.concatenate([x, x1, x2], axis=-1)
    x3 = _lrelu(_ref_conv(xc, params["w3"], params["b3"], dil=1, pad=1), 0.2)
    return jnp.transpose(x3, (0, 3, 1, 2))


if __name__ == "__main__":
    key = jax.random.PRNGKey(0)
    k_x, k_p = jax.random.split(key)

    N, C_in, H, W = 4, 4, 16, 16
    C_out, gc, d = 4, 8, 1

    x = jax.random.normal(k_x, (N, C_in, H, W), jnp.float32)   # NCHW like torch
    params = init_dense_block_params(k_p, C_in, C_out, gc=gc)

    fwd = jax.jit(functools.partial(dense_block_forward, d=d))
    out = jax.block_until_ready(fwd(x, params))

    ref = _ref_forward(x, params, d=d)
    assert out.shape == (N, C_out, H, W)
    max_err = float(jnp.max(jnp.abs(out - ref)))
    assert jnp.allclose(out, ref, atol=1e-4, rtol=1e-4), (
        f"mismatch vs reference (max abs err {max_err})")

    print("KERNEL_OK")
</pallas_src>

<mosaic_0001>
module attributes {stable_mosaic.version = 11 : i64} {
  func.func @_dense_block_kernel(%arg0: i32, %arg1: memref<8x512xf32, #tpu.memory_space<vmem>>, %arg2: memref<9x512xf32, #tpu.memory_space<vmem>>, %arg3: memref<63x8x8xf32, #tpu.memory_space<vmem>>, %arg4: memref<2x8x8xf32, #tpu.memory_space<vmem>>, %arg5: memref<7x8x1xf32, #tpu.memory_space<vmem>>, %arg6: memref<4x512xf32, #tpu.memory_space<vmem>>) attributes {dimension_semantics = [#tpu.dimension_semantics<parallel>], iteration_bounds = array<i64: 2>, scalar_prefetch = 0 : i64, scratch_operands = 0 : i64, tpu.core_type = #tpu.core_type<tc>, window_params = [{transform_indices = @transform_0, window_bounds = array<i64: 8, 512>}, {pipeline_mode = #tpu.pipeline_mode<synchronous>, transform_indices = @transform_1, window_bounds = array<i64: 9, 512>}, {pipeline_mode = #tpu.pipeline_mode<synchronous>, transform_indices = @transform_2, window_bounds = array<i64: 63, 8, 8>}, {pipeline_mode = #tpu.pipeline_mode<synchronous>, transform_indices = @transform_3, window_bounds = array<i64: 2, 8, 8>}, {pipeline_mode = #tpu.pipeline_mode<synchronous>, transform_indices = @transform_4, window_bounds = array<i64: 7, 8, 1>}, {transform_indices = @transform_5, window_bounds = array<i64: 4, 512>}]} {
    %c0 = arith.constant 0 : index
    %c0_0 = arith.constant 0 : index
    %0 = vector.load %arg1[%c0, %c0_0] : memref<8x512xf32, #tpu.memory_space<vmem>>, vector<8x512xf32>
    %c0_1 = arith.constant 0 : index
    %c0_2 = arith.constant 0 : index
    %1 = vector.load %arg2[%c0_1, %c0_2] : memref<9x512xf32, #tpu.memory_space<vmem>>, vector<9x512xf32>
    %c17_i32 = arith.constant 17 : i32
    %2 = tpu.dynamic_rotate %0 by %c17_i32 dim 1 : vector<8x512xf32>, i32 -> vector<8x512xf32>
    %3 = vector.extract_strided_slice %1 {offsets = [0, 0], sizes = [1, 512], strides = [1, 1]} : vector<9x512xf32> to vector<1x512xf32>
    %4 = vector.broadcast %3 : vector<1x512xf32> to vector<8x512xf32>
    %5 = arith.mulf %2, %4 : vector<8x512xf32>
    %c0_3 = arith.constant 0 : index
    %c0_4 = arith.constant 0 : index
    %c0_5 = arith.constant 0 : index
    %6 = vector.load %arg3[%c0_3, %c0_4, %c0_5] : memref<63x8x8xf32, #tpu.memory_space<vmem>>, vector<1x8x8xf32>
    %7 = vector.shape_cast %6 : vector<1x8x8xf32> to vector<8x8xf32>
    %cst = arith.constant dense<0.000000e+00> : vector<8x512xf32>
    %8 = tpu.matmul %7, %5, %cst {dimension_numbers = #tpu.dot_dimension_numbers<[1], [0], [0], [1], [0, 0, 1, 1], [], []>} : vector<8x8xf32>, vector<8x512xf32>, vector<8x512xf32> -> vector<8x512xf32>
    %c36 = arith.constant 36 : index
    %c0_6 = arith.constant 0 : index
    %c0_7 = arith.constant 0 : index
    %9 = vector.load %arg3[%c36, %c0_6, %c0_7] : memref<63x8x8xf32, #tpu.memory_space<vmem>>, vector<1x8x8xf32>
    %10 = vector.shape_cast %9 : vector<1x8x8xf32> to vector<8x8xf32>
    %cst_8 = arith.constant dense<0.000000e+00> : vector<8x512xf32>
    %11 = tpu.matmul %10, %5, %cst_8 {dimension_numbers = #tpu.dot_dimension_numbers<[1], [0], [0], [1], [0, 0, 1, 1], [], []>} : vector<8x8xf32>, vector<8x512xf32>, vector<8x512xf32> -> vector<8x512xf32>
    %c16_i32 = arith.constant 16 : i32
    %12 = tpu.dynamic_rotate %0 by %c16_i32 dim 1 : vector<8x512xf32>, i32 -> vector<8x512xf32>
    %13 = vector.extract_strided_slice %1 {offsets = [1, 0], sizes = [1, 512], strides = [1, 1]} : vector<9x512xf32> to vector<1x512xf32>
    %14 = vector.broadcast %13 : vector<1x512xf32> to vector<8x512xf32>
    %15 = arith.mulf %12, %14 : vector<8x512xf32>
    %c1 = arith.constant 1 : index
    %c0_9 = arith.constant 0 : index
    %c0_10 = arith.constant 0 : index
    %16 = vector.load %arg3[%c1, %c0_9, %c0_10] : memref<63x8x8xf32, #tpu.memory_space<vmem>>, vector<1x8x8xf32>
    %17 = vector.shape_cast %16 : vector<1x8x8xf32> to vector<8x8xf32>
    %cst_11 = arith.constant dense<0.000000e+00> : vector<8x512xf32>
    %18 = tpu.matmul %17, %15, %cst_11 {dimension_numbers = #tpu.dot_dimension_numbers<[1], [0], [0], [1], [0, 0, 1, 1], [], []>} : vector<8x8xf32>, vector<8x512xf32>, vector<8x512xf32> -> vector<8x512xf32>
    %19 = arith.addf %8, %18 : vector<8x512xf32>
    %c37 = arith.constant 37 : index
    %c0_12 = arith.constant 0 : index
    %c0_13 = arith.constant 0 : index
    %20 = vector.load %arg3[%c37, %c0_12, %c0_13] : memref<63x8x8xf32, #tpu.memory_space<vmem>>, vector<1x8x8xf32>
    %21 = vector.shape_cast %20 : vector<1x8x8xf32> to vector<8x8xf32>
    %cst_14 = arith.constant dense<0.000000e+00> : vector<8x512xf32>
    %22 = tpu.matmul %21, %15, %cst_14 {dimension_numbers = #tpu.dot_dimension_numbers<[1], [0], [0], [1], [0, 0, 1, 1], [], []>} : vector<8x8xf32>, vector<8x512xf32>, vector<8x512xf32> -> vector<8x512xf32>
    %23 = arith.addf %11, %22 : vector<8x512xf32>
    %c15_i32 = arith.constant 15 : i32
    %24 = tpu.dynamic_rotate %0 by %c15_i32 dim 1 : vector<8x512xf32>, i32 -> vector<8x512xf32>
    %25 = vector.extract_strided_slice %1 {offsets = [2, 0], sizes = [1, 512], strides = [1, 1]} : vector<9x512xf32> to vector<1x512xf32>
    %26 = vector.broadcast %25 : vector<1x512xf32> to vector<8x512xf32>
    %27 = arith.mulf %24, %26 : vector<8x512xf32>
    %c2 = arith.constant 2 : index
    %c0_15 = arith.constant 0 : index
    %c0_16 = arith.constant 0 : index
    %28 = vector.load %arg3[%c2, %c0_15, %c0_16] : memref<63x8x8xf32, #tpu.memory_space<vmem>>, vector<1x8x8xf32>
    %29 = vector.shape_cast %28 : vector<1x8x8xf32> to vector<8x8xf32>
    %cst_17 = arith.constant dense<0.000000e+00> : vector<8x512xf32>
    %30 = tpu.matmul %29, %27, %cst_17 {dimension_numbers = #tpu.dot_dimension_numbers<[1], [0], [0], [1], [0, 0, 1, 1], [], []>} : vector<8x8xf32>, vector<8x512xf32>, vector<8x512xf32> -> vector<8x512xf32>
    %31 = arith.addf %19, %30 : vector<8x512xf32>
    %c38 = arith.constant 38 : index
    %c0_18 = arith.constant 0 : index
    %c0_19 = arith.constant 0 : index
    %32 = vector.load %arg3[%c38, %c0_18, %c0_19] : memref<63x8x8xf32, #tpu.memory_space<vmem>>, vector<1x8x8xf32>
    %33 = vector.shape_cast %32 : vector<1x8x8xf32> to vector<8x8xf32>
    %cst_20 = arith.constant dense<0.000000e+00> : vector<8x512xf32>
    %34 = tpu.matmul %33, %27, %cst_20 {dimension_numbers = #tpu.dot_dimension_numbers<[1], [0], [0], [1], [0, 0, 1, 1], [], []>} : vector<8x8xf32>, vector<8x512xf32>, vector<8x512xf32> -> vector<8x512xf32>
    %35 = arith.addf %23, %34 : vector<8x512xf32>
    %c1_i32 = arith.constant 1 : i32
    %36 = tpu.dynamic_rotate %0 by %c1_i32 dim 1 : vector<8x512xf32>, i32 -> vector<8x512xf32>
    %37 = vector.extract_strided_slice %1 {offsets = [3, 0], sizes = [1, 512], strides = [1, 1]} : vector<9x512xf32> to vector<1x512xf32>
    %38 = vector.broadcast %37 : vector<1x512xf32> to vector<8x512xf32>
    %39 = arith.mulf %36, %38 : vector<8x512xf32>
    %c3 = arith.constant 3 : index
    %c0_21 = arith.constant 0 : index
    %c0_22 = arith.constant 0 : index
    %40 = vector.load %arg3[%c3, %c0_21, %c0_22] : memref<63x8x8xf32, #tpu.memory_space<vmem>>, vector<1x8x8xf32>
    %41 = vector.shape_cast %40 : vector<1x8x8xf32> to vector<8x8xf32>
    %cst_23 = arith.constant dense<0.000000e+00> : vector<8x512xf32>
    %42 = tpu.matmul %41, %39, %cst_23 {dimension_numbers = #tpu.dot_dimension_numbers<[1], [0], [0], [1], [0, 0, 1, 1], [], []>} : vector<8x8xf32>, vector<8x512xf32>, vector<8x512xf32> -> vector<8x512xf32>
    %43 = arith.addf %31, %42 : vector<8x512xf32>
    %c39 = arith.constant 39 : index
    %c0_24 = arith.constant 0 : index
    %c0_25 = arith.constant 0 : index
    %44 = vector.load %arg3[%c39, %c0_24, %c0_25] : memref<63x8x8xf32, #tpu.memory_space<vmem>>, vector<1x8x8xf32>
    %45 = vector.shape_cast %44 : vector<1x8x8xf32> to vector<8x8xf32>
    %cst_26 = arith.constant dense<0.000000e+00> : vector<8x512xf32>
    %46 = tpu.matmul %45, %39, %cst_26 {dimension_numbers = #tpu.dot_dimension_numbers<[1], [0], [0], [1], [0, 0, 1, 1], [], []>} : vector<8x8xf32>, vector<8x512xf32>, vector<8x512xf32> -> vector<8x512xf32>
    %47 = arith.addf %35, %46 : vector<8x512xf32>
    %c4 = arith.constant 4 : index
    %c0_27 = arith.constant 0 : index
    %c0_28 = arith.constant 0 : index
    %48 = vector.load %arg3[%c4, %c0_27, %c0_28] : memref<63x8x8xf32, #tpu.memory_space<vmem>>, vector<1x8x8xf32>
    %49 = vector.shape_cast %48 : vector<1x8x8xf32> to vector<8x8xf32>
    %cst_29 = arith.constant dense<0.000000e+00> : vector<8x512xf32>
    %50 = tpu.matmul %49, %0, %cst_29 {dimension_numbers = #tpu.dot_dimension_numbers<[1], [0], [0], [1], [0, 0, 1, 1], [], []>} : vector<8x8xf32>, vector<8x512xf32>, vector<8x512xf32> -> vector<8x512xf32>
    %51 = arith.addf %43, %50 : vector<8x512xf32>
    %c40 = arith.constant 40 : index
    %c0_30 = arith.constant 0 : index
    %c0_31 = arith.constant 0 : index
    %52 = vector.load %arg3[%c40, %c0_30, %c0_31] : memref<63x8x8xf32, #tpu.memory_space<vmem>>, vector<1x8x8xf32>
    %53 = vector.shape_cast %52 : vector<1x8x8xf32> to vector<8x8xf32>
    %cst_32 = arith.constant dense<0.000000e+00> : vector<8x512xf32>
    %54 = tpu.matmul %53, %0, %cst_32 {dimension_numbers = #tpu.dot_dimension_numbers<[1], [0], [0], [1], [0, 0, 1, 1], [], []>} : vector<8x8xf32>, vector<8x512xf32>, vector<8x512xf32> -> vector<8x512xf32>
    %55 = arith.addf %47, %54 : vector<8x512xf32>
    %c511_i32 = arith.constant 511 : i32
    %56 = tpu.dynamic_rotate %0 by %c511_i32 dim 1 : vector<8x512xf32>, i32 -> vector<8x512xf32>
    %57 = vector.extract_strided_slice %1 {offsets = [5, 0], sizes = [1, 512], strides = [1, 1]} : vector<9x512xf32> to vector<1x512xf32>
    %58 = vector.broadcast %57 : vector<1x512xf32> to vector<8x512xf32>
    %59 = arith.mulf %56, %58 : vector<8x512xf32>
    %c5 = arith.constant 5 : index
    %c0_33 = arith.constant 0 : index
    %c0_34 = arith.constant 0 : index
    %60 = vector.load %arg3[%c5, %c0_33, %c0_34] : memref<63x8x8xf32, #tpu.memory_space<vmem>>, vector<1x8x8xf32>
    %61 = vector.shape_cast %60 : vector<1x8x8xf32> to vector<8x8xf32>
    %cst_35 = arith.constant dense<0.000000e+00> : vector<8x512xf32>
    %62 = tpu.matmul %61, %59, %cst_35 {dimension_numbers = #tpu.dot_dimension_numbers<[1], [0], [0], [1], [0, 0, 1, 1], [], []>} : vector<8x8xf32>, vector<8x512xf32>, vector<8x512xf32> -> vector<8x512xf32>
    %63 = arith.addf %51, %62 : vector<8x512xf32>
    %c41 = arith.constant 41 : index
    %c0_36 = arith.constant 0 : index
    %c0_37 = arith.constant 0 : index
    %64 = vector.load %arg3[%c41, %c0_36, %c0_37] : memref<63x8x8xf32, #tpu.memory_space<vmem>>, vector<1x8x8xf32>
    %65 = vector.shape_cast %64 : vector<1x8x8xf32> to vector<8x8xf32>
    %cst_38 = arith.constant dense<0.000000e+00> : vector<8x512xf32>
    %66 = tpu.matmul %65, %59, %cst_38 {dimension_numbers = #tpu.dot_dimension_numbers<[1], [0], [0], [1], [0, 0, 1, 1], [], []>} : vector<8x8xf32>, vector<8x512xf32>, vector<8x512xf32> -> vector<8x512xf32>
    %67 = arith.addf %55, %66 : vector<8x512xf32>
    %c497_i32 = arith.constant 497 : i32
    %68 = tpu.dynamic_rotate %0 by %c497_i32 dim 1 : vector<8x512xf32>, i32 -> vector<8x512xf32>
    %69 = vector.extract_strided_slice %1 {offsets = [6, 0], sizes = [1, 512], strides = [1, 1]} : vector<9x512xf32> to vector<1x512xf32>
    %70 = vector.broadcast %69 : vector<1x512xf32> to vector<8x512xf32>
    %71 = arith.mulf %68, %70 : vector<8x512xf32>
    %c6 = arith.constant 6 : index
    %c0_39 = arith.constant 0 : index
    %c0_40 = arith.constant 0 : index
    %72 = vector.load %arg3[%c6, %c0_39, %c0_40] : memref<63x8x8xf32, #tpu.memory_space<vmem>>, vector<1x8x8xf32>
    %73 = vector.shape_cast %72 : vector<1x8x8xf32> to vector<8x8xf32>
    %cst_41 = arith.constant dense<0.000000e+00> : vector<8x512xf32>
    %74 = tpu.matmul %73, %71, %cst_41 {dimension_numbers = #tpu.dot_dimension_numbers<[1], [0], [0], [1], [0, 0, 1, 1], [], []>} : vector<8x8xf32>, vector<8x512xf32>, vector<8x512xf32> -> vector<8x512xf32>
    %75 = arith.addf %63, %74 : vector<8x512xf32>
    %c42 = arith.constant 42 : index
    %c0_42 = arith.constant 0 : index
    %c0_43 = arith.constant 0 : index
    %76 = vector.load %arg3[%c42, %c0_42, %c0_43] : memref<63x8x8xf32, #tpu.memory_space<vmem>>, vector<1x8x8xf32>
    %77 = vector.shape_cast %76 : vector<1x8x8xf32> to vector<8x8xf32>
    %cst_44 = arith.constant dense<0.000000e+00> : vector<8x512xf32>
    %78 = tpu.matmul %77, %71, %cst_44 {dimension_numbers = #tpu.dot_dimension_numbers<[1], [0], [0], [1], [0, 0, 1, 1], [], []>} : vector<8x8xf32>, vector<8x512xf32>, vector<8x512xf32> -> vector<8x512xf32>
    %79 = arith.addf %67, %78 : vector<8x512xf32>
    %c496_i32 = arith.constant 496 : i32
    %80 = tpu.dynamic_rotate %0 by %c496_i32 dim 1 : vector<8x512xf32>, i32 -> vector<8x512xf32>
    %81 = vector.extract_strided_slice %1 {offsets = [7, 0], sizes = [1, 512], strides = [1, 1]} : vector<9x512xf32> to vector<1x512xf32>
    %82 = vector.broadcast %81 : vector<1x512xf32> to vector<8x512xf32>
    %83 = arith.mulf %80, %82 : vector<8x512xf32>
    %c7 = arith.constant 7 : index
    %c0_45 = arith.constant 0 : index
    %c0_46 = arith.constant 0 : index
    %84 = vector.load %arg3[%c7, %c0_45, %c0_46] : memref<63x8x8xf32, #tpu.memory_space<vmem>>, vector<1x8x8xf32>
    %85 = vector.shape_cast %84 : vector<1x8x8xf32> to vector<8x8xf32>
    %cst_47 = arith.constant dense<0.000000e+00> : vector<8x512xf32>
    %86 = tpu.matmul %85, %83, %cst_47 {dimension_numbers = #tpu.dot_dimension_numbers<[1], [0], [0], [1], [0, 0, 1, 1], [], []>} : vector<8x8xf32>, vector<8x512xf32>, vector<8x512xf32> -> vector<8x512xf32>
    %87 = arith.addf %75, %86 : vector<8x512xf32>
    %c43 = arith.constant 43 : index
    %c0_48 = arith.constant 0 : index
    %c0_49 = arith.constant 0 : index
    %88 = vector.load %arg3[%c43, %c0_48, %c0_49] : memref<63x8x8xf32, #tpu.memory_space<vmem>>, vector<1x8x8xf32>
    %89 = vector.shape_cast %88 : vector<1x8x8xf32> to vector<8x8xf32>
    %cst_50 = arith.constant dense<0.000000e+00> : vector<8x512xf32>
    %90 = tpu.matmul %89, %83, %cst_50 {dimension_numbers = #tpu.dot_dimension_numbers<[1], [0], [0], [1], [0, 0, 1, 1], [], []>} : vector<8x8xf32>, vector<8x512xf32>, vector<8x512xf32> -> vector<8x512xf32>
    %91 = arith.addf %79, %90 : vector<8x512xf32>
    %c495_i32 = arith.constant 495 : i32
    %92 = tpu.dynamic_rotate %0 by %c495_i32 dim 1 : vector<8x512xf32>, i32 -> vector<8x512xf32>
    %93 = vector.extract_strided_slice %1 {offsets = [8, 0], sizes = [1, 512], strides = [1, 1]} : vector<9x512xf32> to vector<1x512xf32>
    %94 = vector.broadcast %93 : vector<1x512xf32> to vector<8x512xf32>
    %95 = arith.mulf %92, %94 : vector<8x512xf32>
    %c8 = arith.constant 8 : index
    %c0_51 = arith.constant 0 : index
    %c0_52 = arith.constant 0 : index
    %96 = vector.load %arg3[%c8, %c0_51, %c0_52] : memref<63x8x8xf32, #tpu.memory_space<vmem>>, vector<1x8x8xf32>
    %97 = vector.shape_cast %96 : vector<1x8x8xf32> to vector<8x8xf32>
    %cst_53 = arith.constant dense<0.000000e+00> : vector<8x512xf32>
    %98 = tpu.matmul %97, %95, %cst_53 {dimension_numbers = #tpu.dot_dimension_numbers<[1], [0], [0], [1], [0, 0, 1, 1], [], []>} : vector<8x8xf32>, vector<8x512xf32>, vector<8x512xf32> -> vector<8x512xf32>
    %99 = arith.addf %87, %98 : vector<8x512xf32>
    %c44 = arith.constant 44 : index
    %c0_54 = arith.constant 0 : index
    %c0_55 = arith.constant 0 : index
    %100 = vector.load %arg3[%c44, %c0_54, %c0_55] : memref<63x8x8xf32, #tpu.memory_space<vmem>>, vector<1x8x8xf32>
    %101 = vector.shape_cast %100 : vector<1x8x8xf32> to vector<8x8xf32>
    %cst_56 = arith.constant dense<0.000000e+00> : vector<8x512xf32>
    %102 = tpu.matmul %101, %95, %cst_56 {dimension_numbers = #tpu.dot_dimension_numbers<[1], [0], [0], [1], [0, 0, 1, 1], [], []>} : vector<8x8xf32>, vector<8x512xf32>, vector<8x512xf32> -> vector<8x512xf32>
    %103 = arith.addf %91, %102 : vector<8x512xf32>
    %c0_57 = arith.constant 0 : index
    %c0_58 = arith.constant 0 : index
    %c0_59 = arith.constant 0 : index
    %104 = vector.load %arg5[%c0_57, %c0_58, %c0_59] : memref<7x8x1xf32, #tpu.memory_space<vmem>>, vector<1x8x1xf32>
    %105 = vector.shape_cast %104 : vector<1x8x1xf32> to vector<8x1xf32>
    %106 = vector.broadcast %105 : vector<8x1xf32> to vector<8x512xf32>
    %107 = arith.addf %99, %106 : vector<8x512xf32>
    %cst_60 = arith.constant 1.000000e-01 : f32
    %108 = vector.broadcast %cst_60 : f32 to vector<8x512xf32>
    %109 = arith.mulf %108, %107 : vector<8x512xf32>
    %110 = arith.maximumf %107, %109 : vector<8x512xf32>
    %c17_i32_61 = arith.constant 17 : i32
    %111 = tpu.dynamic_rotate %110 by %c17_i32_61 dim 1 : vector<8x512xf32>, i32 -> vector<8x512xf32>
    %112 = vector.extract_strided_slice %1 {offsets = [0, 0], sizes = [1, 512], strides = [1, 1]} : vector<9x512xf32> to vector<1x512xf32>
    %113 = vector.broadcast %112 : vector<1x512xf32> to vector<8x512xf32>
    %114 = arith.mulf %111, %113 : vector<8x512xf32>
    %c9 = arith.constant 9 : index
    %c0_62 = arith.constant 0 : index
    %c0_63 = arith.constant 0 : index
    %115 = vector.load %arg3[%c9, %c0_62, %c0_63] : memref<63x8x8xf32, #tpu.memory_space<vmem>>, vector<1x8x8xf32>
    %116 = vector.shape_cast %115 : vector<1x8x8xf32> to vector<8x8xf32>
    %cst_64 = arith.constant dense<0.000000e+00> : vector<8x512xf32>
    %117 = tpu.matmul %116, %114, %cst_64 {dimension_numbers = #tpu.dot_dimension_numbers<[1], [0], [0], [1], [0, 0, 1, 1], [], []>} : vector<8x8xf32>, vector<8x512xf32>, vector<8x512xf32> -> vector<8x512xf32>
    %c16_i32_65 = arith.constant 16 : i32
    %118 = tpu.dynamic_rotate %110 by %c16_i32_65 dim 1 : vector<8x512xf32>, i32 -> vector<8x512xf32>
    %119 = vector.extract_strided_slice %1 {offsets = [1, 0], sizes = [1, 512], strides = [1, 1]} : vector<9x512xf32> to vector<1x512xf32>
    %120 = vector.broadcast %119 : vector<1x512xf32> to vector<8x512xf32>
    %121 = arith.mulf %118, %120 : vector<8x512xf32>
    %c10 = arith.constant 10 : index
    %c0_66 = arith.constant 0 : index
    %c0_67 = arith.constant 0 : index
    %122 = vector.load %arg3[%c10, %c0_66, %c0_67] : memref<63x8x8xf32, #tpu.memory_space<vmem>>, vector<1x8x8xf32>
    %123 = vector.shape_cast %122 : vector<1x8x8xf32> to vector<8x8xf32>
    %cst_68 = arith.constant dense<0.000000e+00> : vector<8x512xf32>
    %124 = tpu.matmul %123, %121, %cst_68 {dimension_numbers = #tpu.dot_dimension_numbers<[1], [0], [0], [1], [0, 0, 1, 1], [], []>} : vector<8x8xf32>, vector<8x512xf32>, vector<8x512xf32> -> vector<8x512xf32>
    %125 = arith.addf %117, %124 : vector<8x512xf32>
    %c15_i32_69 = arith.constant 15 : i32
    %126 = tpu.dynamic_rotate %110 by %c15_i32_69 dim 1 : vector<8x512xf32>, i32 -> vector<8x512xf32>
    %127 = vector.extract_strided_slice %1 {offsets = [2, 0], sizes = [1, 512], strides = [1, 1]} : vector<9x512xf32> to vector<1x512xf32>
    %128 = vector.broadcast %127 : vector<1x512xf32> to vector<8x512xf32>
    %129 = arith.mulf %126, %128 : vector<8x512xf32>
    %c11 = arith.constant 11 : index
    %c0_70 = arith.constant 0 : index
    %c0_71 = arith.constant 0 : index
    %130 = vector.load %arg3[%c11, %c0_70, %c0_71] : memref<63x8x8xf32, #tpu.memory_space<vmem>>, vector<1x8x8xf32>
    %131 = vector.shape_cast %130 : vector<1x8x8xf32> to vector<8x8xf32>
    %cst_72 = arith.constant dense<0.000000e+00> : vector<8x512xf32>
    %132 = tpu.matmul %131, %129, %cst_72 {dimension_numbers = #tpu.dot_dimension_numbers<[1], [0], [0], [1], [0, 0, 1, 1], [], []>} : vector<8x8xf32>, vector<8x512xf32>, vector<8x512xf32> -> vector<8x512xf32>
    %133 = arith.addf %125, %132 : vector<8x512xf32>
    %c1_i32_73 = arith.constant 1 : i32
    %134 = tpu.dynamic_rotate %110 by %c1_i32_73 dim 1 : vector<8x512xf32>, i32 -> vector<8x512xf32>
    %135 = vector.extract_strided_slice %1 {offsets = [3, 0], sizes = [1, 512], strides = [1, 1]} : vector<9x512xf32> to vector<1x512xf32>
    %136 = vector.broadcast %135 : vector<1x512xf32> to vector<8x512xf32>
    %137 = arith.mulf %134, %136 : vector<8x512xf32>
    %c12 = arith.constant 12 : index
    %c0_74 = arith.constant 0 : index
    %c0_75 = arith.constant 0 : index
    %138 = vector.load %arg3[%c12, %c0_74, %c0_75] : memref<63x8x8xf32, #tpu.memory_space<vmem>>, vector<1x8x8xf32>
    %139 = vector.shape_cast %138 : vector<1x8x8xf32> to vector<8x8xf32>
    %cst_76 = arith.constant dense<0.000000e+00> : vector<8x512xf32>
    %140 = tpu.matmul %139, %137, %cst_76 {dimension_numbers = #tpu.dot_dimension_numbers<[1], [0], [0], [1], [0, 0, 1, 1], [], []>} : vector<8x8xf32>, vector<8x512xf32>, vector<8x512xf32> -> vector<8x512xf32>
    %141 = arith.addf %133, %140 : vector<8x512xf32>
    %c13 = arith.constant 13 : index
    %c0_77 = arith.constant 0 : index
    %c0_78 = arith.constant 0 : index
    %142 = vector.load %arg3[%c13, %c0_77, %c0_78] : memref<63x8x8xf32, #tpu.memory_space<vmem>>, vector<1x8x8xf32>
    %143 = vector.shape_cast %142 : vector<1x8x8xf32> to vector<8x8xf32>
    %cst_79 = arith.constant dense<0.000000e+00> : vector<8x512xf32>
    %144 = tpu.matmul %143, %110, %cst_79 {dimension_numbers = #tpu.dot_dimension_numbers<[1], [0], [0], [1], [0, 0, 1, 1], [], []>} : vector<8x8xf32>, vector<8x512xf32>, vector<8x512xf32> -> vector<8x512xf32>
    %145 = arith.addf %141, %144 : vector<8x512xf32>
    %c511_i32_80 = arith.constant 511 : i32
    %146 = tpu.dynamic_rotate %110 by %c511_i32_80 dim 1 : vector<8x512xf32>, i32 -> vector<8x512xf32>
    %147 = vector.extract_strided_slice %1 {offsets = [5, 0], sizes = [1, 512], strides = [1, 1]} : vector<9x512xf32> to vector<1x512xf32>
    %148 = vector.broadcast %147 : vector<1x512xf32> to vector<8x512xf32>
    %149 = arith.mulf %146, %148 : vector<8x512xf32>
    %c14 = arith.constant 14 : index
    %c0_81 = arith.constant 0 : index
    %c0_82 = arith.constant 0 : index
    %150 = vector.load %arg3[%c14, %c0_81, %c0_82] : memref<63x8x8xf32, #tpu.memory_space<vmem>>, vector<1x8x8xf32>
    %151 = vector.shape_cast %150 : vector<1x8x8xf32> to vector<8x8xf32>
    %cst_83 = arith.constant dense<0.000000e+00> : vector<8x512xf32>
    %152 = tpu.matmul %151, %149, %cst_83 {dimension_numbers = #tpu.dot_dimension_numbers<[1], [0], [0], [1], [0, 0, 1, 1], [], []>} : vector<8x8xf32>, vector<8x512xf32>, vector<8x512xf32> -> vector<8x512xf32>
    %153 = arith.addf %145, %152 : vector<8x512xf32>
    %c497_i32_84 = arith.constant 497 : i32
    %154 = tpu.dynamic_rotate %110 by %c497_i32_84 dim 1 : vector<8x512xf32>, i32 -> vector<8x512xf32>
    %155 = vector.extract_strided_slice %1 {offsets = [6, 0], sizes = [1, 512], strides = [1, 1]} : vector<9x512xf32> to vector<1x512xf32>
    %156 = vector.broadcast %155 : vector<1x512xf32> to vector<8x512xf32>
    %157 = arith.mulf %154, %156 : vector<8x512xf32>
    %c15 = arith.constant 15 : index
    %c0_85 = arith.constant 0 : index
    %c0_86 = arith.constant 0 : index
    %158 = vector.load %arg3[%c15, %c0_85, %c0_86] : memref<63x8x8xf32, #tpu.memory_space<vmem>>, vector<1x8x8xf32>
    %159 = vector.shape_cast %158 : vector<1x8x8xf32> to vector<8x8xf32>
    %cst_87 = arith.constant dense<0.000000e+00> : vector<8x512xf32>
    %160 = tpu.matmul %159, %157, %cst_87 {dimension_numbers = #tpu.dot_dimension_numbers<[1], [0], [0], [1], [0, 0, 1, 1], [], []>} : vector<8x8xf32>, vector<8x512xf32>, vector<8x512xf32> -> vector<8x512xf32>
    %161 = arith.addf %153, %160 : vector<8x512xf32>
    %c496_i32_88 = arith.constant 496 : i32
    %162 = tpu.dynamic_rotate %110 by %c496_i32_88 dim 1 : vector<8x512xf32>, i32 -> vector<8x512xf32>
    %163 = vector.extract_strided_slice %1 {offsets = [7, 0], sizes = [1, 512], strides = [1, 1]} : vector<9x512xf32> to vector<1x512xf32>
    %164 = vector.broadcast %163 : vector<1x512xf32> to vector<8x512xf32>
    %165 = arith.mulf %162, %164 : vector<8x512xf32>
    %c16 = arith.constant 16 : index
    %c0_89 = arith.constant 0 : index
    %c0_90 = arith.constant 0 : index
    %166 = vector.load %arg3[%c16, %c0_89, %c0_90] : memref<63x8x8xf32, #tpu.memory_space<vmem>>, vector<1x8x8xf32>
    %167 = vector.shape_cast %166 : vector<1x8x8xf32> to vector<8x8xf32>
    %cst_91 = arith.constant dense<0.000000e+00> : vector<8x512xf32>
    %168 = tpu.matmul %167, %165, %cst_91 {dimension_numbers = #tpu.dot_dimension_numbers<[1], [0], [0], [1], [0, 0, 1, 1], [], []>} : vector<8x8xf32>, vector<8x512xf32>, vector<8x512xf32> -> vector<8x512xf32>
    %169 = arith.addf %161, %168 : vector<8x512xf32>
    %c495_i32_92 = arith.constant 495 : i32
    %170 = tpu.dynamic_rotate %110 by %c495_i32_92 dim 1 : vector<8x512xf32>, i32 -> vector<8x512xf32>
    %171 = vector.extract_strided_slice %1 {offsets = [8, 0], sizes = [1, 512], strides = [1, 1]} : vector<9x512xf32> to vector<1x512xf32>
    %172 = vector.broadcast %171 : vector<1x512xf32> to vector<8x512xf32>
    %173 = arith.mulf %170, %172 : vector<8x512xf32>
    %c17 = arith.constant 17 : index
    %c0_93 = arith.constant 0 : index
    %c0_94 = arith.constant 0 : index
    %174 = vector.load %arg3[%c17, %c0_93, %c0_94] : memref<63x8x8xf32, #tpu.memory_space<vmem>>, vector<1x8x8xf32>
    %175 = vector.shape_cast %174 : vector<1x8x8xf32> to vector<8x8xf32>
    %cst_95 = arith.constant dense<0.000000e+00> : vector<8x512xf32>
    %176 = tpu.matmul %175, %173, %cst_95 {dimension_numbers = #tpu.dot_dimension_numbers<[1], [0], [0], [1], [0, 0, 1, 1], [], []>} : vector<8x8xf32>, vector<8x512xf32>, vector<8x512xf32> -> vector<8x512xf32>
    %177 = arith.addf %169, %176 : vector<8x512xf32>
    %c1_96 = arith.constant 1 : index
    %c0_97 = arith.constant 0 : index
    %c0_98 = arith.constant 0 : index
    %178 = vector.load %arg5[%c1_96, %c0_97, %c0_98] : memref<7x8x1xf32, #tpu.memory_space<vmem>>, vector<1x8x1xf32>
    %179 = vector.shape_cast %178 : vector<1x8x1xf32> to vector<8x1xf32>
    %180 = vector.broadcast %179 : vector<8x1xf32> to vector<8x512xf32>
    %181 = arith.addf %177, %180 : vector<8x512xf32>
    %cst_99 = arith.constant 1.000000e-01 : f32
    %182 = vector.broadcast %cst_99 : f32 to vector<8x512xf32>
    %183 = arith.mulf %182, %181 : vector<8x512xf32>
    %184 = arith.maximumf %181, %183 : vector<8x512xf32>
    %c0_100 = arith.constant 0 : index
    %c0_101 = arith.constant 0 : index
    %c0_102 = arith.constant 0 : index
    %185 = vector.load %arg4[%c0_100, %c0_101, %c0_102] : memref<2x8x8xf32, #tpu.memory_space<vmem>>, vector<1x8x8xf32>
    %186 = vector.shape_cast %185 : vector<1x8x8xf32> to vector<8x8xf32>
    %cst_103 = arith.constant dense<0.000000e+00> : vector<8x512xf32>
    %187 = tpu.matmul %186, %0, %cst_103 {dimension_numbers = #tpu.dot_dimension_numbers<[1], [0], [0], [1], [0, 0, 1, 1], [], []>} : vector<8x8xf32>, vector<8x512xf32>, vector<8x512xf32> -> vector<8x512xf32>
    %188 = arith.addf %184, %187 : vector<8x512xf32>
    %c2_104 = arith.constant 2 : index
    %c0_105 = arith.constant 0 : index
    %c0_106 = arith.constant 0 : index
    %189 = vector.load %arg5[%c2_104, %c0_105, %c0_106] : memref<7x8x1xf32, #tpu.memory_space<vmem>>, vector<1x8x1xf32>
    %190 = vector.shape_cast %189 : vector<1x8x1xf32> to vector<8x1xf32>
    %191 = vector.broadcast %190 : vector<8x1xf32> to vector<8x512xf32>
    %192 = arith.addf %188, %191 : vector<8x512xf32>
    %cst_107 = arith.constant 2.000000e-01 : f32
    %193 = vector.broadcast %cst_107 : f32 to vector<8x512xf32>
    %194 = arith.mulf %193, %192 : vector<8x512xf32>
    %195 = arith.maximumf %192, %194 : vector<8x512xf32>
    %c17_i32_108 = arith.constant 17 : i32
    %196 = tpu.dynamic_rotate %195 by %c17_i32_108 dim 1 : vector<8x512xf32>, i32 -> vector<8x512xf32>
    %197 = vector.extract_strided_slice %1 {offsets = [0, 0], sizes = [1, 512], strides = [1, 1]} : vector<9x512xf32> to vector<1x512xf32>
    %198 = vector.broadcast %197 : vector<1x512xf32> to vector<8x512xf32>
    %199 = arith.mulf %196, %198 : vector<8x512xf32>
    %c18 = arith.constant 18 : index
    %c0_109 = arith.constant 0 : index
    %c0_110 = arith.constant 0 : index
    %200 = vector.load %arg3[%c18, %c0_109, %c0_110] : memref<63x8x8xf32, #tpu.memory_space<vmem>>, vector<1x8x8xf32>
    %201 = vector.shape_cast %200 : vector<1x8x8xf32> to vector<8x8xf32>
    %cst_111 = arith.constant dense<0.000000e+00> : vector<8x512xf32>
    %202 = tpu.matmul %201, %199, %cst_111 {dimension_numbers = #tpu.dot_dimension_numbers<[1], [0], [0], [1], [0, 0, 1, 1], [], []>} : vector<8x8xf32>, vector<8x512xf32>, vector<8x512xf32> -> vector<8x512xf32>
    %c45 = arith.constant 45 : index
    %c0_112 = arith.constant 0 : index
    %c0_113 = arith.constant 0 : index
    %203 = vector.load %arg3[%c45, %c0_112, %c0_113] : memref<63x8x8xf32, #tpu.memory_space<vmem>>, vector<1x8x8xf32>
    %204 = vector.shape_cast %203 : vector<1x8x8xf32> to vector<8x8xf32>
    %cst_114 = arith.constant dense<0.000000e+00> : vector<8x512xf32>
    %205 = tpu.matmul %204, %199, %cst_114 {dimension_numbers = #tpu.dot_dimension_numbers<[1], [0], [0], [1], [0, 0, 1, 1], [], []>} : vector<8x8xf32>, vector<8x512xf32>, vector<8x512xf32> -> vector<8x512xf32>
    %c16_i32_115 = arith.constant 16 : i32
    %206 = tpu.dynamic_rotate %195 by %c16_i32_115 dim 1 : vector<8x512xf32>, i32 -> vector<8x512xf32>
    %207 = vector.extract_strided_slice %1 {offsets = [1, 0], sizes = [1, 512], strides = [1, 1]} : vector<9x512xf32> to vector<1x512xf32>
    %208 = vector.broadcast %207 : vector<1x512xf32> to vector<8x512xf32>
    %209 = arith.mulf %206, %208 : vector<8x512xf32>
    %c19 = arith.constant 19 : index
    %c0_116 = arith.constant 0 : index
    %c0_117 = arith.constant 0 : index
    %210 = vector.load %arg3[%c19, %c0_116, %c0_117] : memref<63x8x8xf32, #tpu.memory_space<vmem>>, vector<1x8x8xf32>
    %211 = vector.shape_cast %210 : vector<1x8x8xf32> to vector<8x8xf32>
    %cst_118 = arith.constant dense<0.000000e+00> : vector<8x512xf32>
    %212 = tpu.matmul %211, %209, %cst_118 {dimension_numbers = #tpu.dot_dimension_numbers<[1], [0], [0], [1], [0, 0, 1, 1], [], []>} : vector<8x8xf32>, vector<8x512xf32>, vector<8x512xf32> -> vector<8x512xf32>
    %213 = arith.addf %202, %212 : vector<8x512xf32>
    %c46 = arith.constant 46 : index
    %c0_119 = arith.constant 0 : index
    %c0_120 = arith.constant 0 : index
    %214 = vector.load %arg3[%c46, %c0_119, %c0_120] : memref<63x8x8xf32, #tpu.memory_space<vmem>>, vector<1x8x8xf32>
    %215 = vector.shape_cast %214 : vector<1x8x8xf32> to vector<8x8xf32>
    %cst_121 = arith.constant dense<0.000000e+00> : vector<8x512xf32>
    %216 = tpu.matmul %215, %209, %cst_121 {dimension_numbers = #tpu.dot_dimension_numbers<[1], [0], [0], [1], [0, 0, 1, 1], [], []>} : vector<8x8xf32>, vector<8x512xf32>, vector<8x512xf32> -> vector<8x512xf32>
    %217 = arith.addf %205, %216 : vector<8x512xf32>
    %c15_i32_122 = arith.constant 15 : i32
    %218 = tpu.dynamic_rotate %195 by %c15_i32_122 dim 1 : vector<8x512xf32>, i32 -> vector<8x512xf32>
    %219 = vector.extract_strided_slice %1 {offsets = [2, 0], sizes = [1, 512], strides = [1, 1]} : vector<9x512xf32> to vector<1x512xf32>
    %220 = vector.broadcast %219 : vector<1x512xf32> to vector<8x512xf32>
    %221 = arith.mulf %218, %220 : vector<8x512xf32>
    %c20 = arith.constant 20 : index
    %c0_123 = arith.constant 0 : index
    %c0_124 = arith.constant 0 : index
    %222 = vector.load %arg3[%c20, %c0_123, %c0_124] : memref<63x8x8xf32, #tpu.memory_space<vmem>>, vector<1x8x8xf32>
    %223 = vector.shape_cast %222 : vector<1x8x8xf32> to vector<8x8xf32>
    %cst_125 = arith.constant dense<0.000000e+00> : vector<8x512xf32>
    %224 = tpu.matmul %223, %221, %cst_125 {dimension_numbers = #tpu.dot_dimension_numbers<[1], [0], [0], [1], [0, 0, 1, 1], [], []>} : vector<8x8xf32>, vector<8x512xf32>, vector<8x512xf32> -> vector<8x512xf32>
    %225 = arith.addf %213, %224 : vector<8x512xf32>
    %c47 = arith.constant 47 : index
    %c0_126 = arith.constant 0 : index
    %c0_127 = arith.constant 0 : index
    %226 = vector.load %arg3[%c47, %c0_126, %c0_127] : memref<63x8x8xf32, #tpu.memory_space<vmem>>, vector<1x8x8xf32>
    %227 = vector.shape_cast %226 : vector<1x8x8xf32> to vector<8x8xf32>
    %cst_128 = arith.constant dense<0.000000e+00> : vector<8x512xf32>
    %228 = tpu.matmul %227, %221, %cst_128 {dimension_numbers = #tpu.dot_dimension_numbers<[1], [0], [0], [1], [0, 0, 1, 1], [], []>} : vector<8x8xf32>, vector<8x512xf32>, vector<8x512xf32> -> vector<8x512xf32>
    %229 = arith.addf %217, %228 : vector<8x512xf32>
    %c1_i32_129 = arith.constant 1 : i32
    %230 = tpu.dynamic_rotate %195 by %c1_i32_129 dim 1 : vector<8x512xf32>, i32 -> vector<8x512xf32>
    %231 = vector.extract_strided_slice %1 {offsets = [3, 0], sizes = [1, 512], strides = [1, 1]} : vector<9x512xf32> to vector<1x512xf32>
    %232 = vector.broadcast %231 : vector<1x512xf32> to vector<8x512xf32>
    %233 = arith.mulf %230, %232 : vector<8x512xf32>
    %c21 = arith.constant 21 : index
    %c0_130 = arith.constant 0 : index
    %c0_131 = arith.constant 0 : index
    %234 = vector.load %arg3[%c21, %c0_130, %c0_131] : memref<63x8x8xf32, #tpu.memory_space<vmem>>, vector<1x8x8xf32>
    %235 = vector.shape_cast %234 : vector<1x8x8xf32> to vector<8x8xf32>
    %cst_132 = arith.constant dense<0.000000e+00> : vector<8x512xf32>
    %236 = tpu.matmul %235, %233, %cst_132 {dimension_numbers = #tpu.dot_dimension_numbers<[1], [0], [0], [1], [0, 0, 1, 1], [], []>} : vector<8x8xf32>, vector<8x512xf32>, vector<8x512xf32> -> vector<8x512xf32>
    %237 = arith.addf %225, %236 : vector<8x512xf32>
    %c48 = arith.constant 48 : index
    %c0_133 = arith.constant 0 : index
    %c0_134 = arith.constant 0 : index
    %238 = vector.load %arg3[%c48, %c0_133, %c0_134] : memref<63x8x8xf32, #tpu.memory_space<vmem>>, vector<1x8x8xf32>
    %239 = vector.shape_cast %238 : vector<1x8x8xf32> to vector<8x8xf32>
    %cst_135 = arith.constant dense<0.000000e+00> : vector<8x512xf32>
    %240 = tpu.matmul %239, %233, %cst_135 {dimension_numbers = #tpu.dot_dimension_numbers<[1], [0], [0], [1], [0, 0, 1, 1], [], []>} : vector<8x8xf32>, vector<8x512xf32>, vector<8x512xf32> -> vector<8x512xf32>
    %241 = arith.addf %229, %240 : vector<8x512xf32>
    %c22 = arith.constant 22 : index
    %c0_136 = arith.constant 0 : index
    %c0_137 = arith.constant 0 : index
    %242 = vector.load %arg3[%c22, %c0_136, %c0_137] : memref<63x8x8xf32, #tpu.memory_space<vmem>>, vector<1x8x8xf32>
    %243 = vector.shape_cast %242 : vector<1x8x8xf32> to vector<8x8xf32>
    %cst_138 = arith.constant dense<0.000000e+00> : vector<8x512xf32>
    %244 = tpu.matmul %243, %195, %cst_138 {dimension_numbers = #tpu.dot_dimension_numbers<[1], [0], [0], [1], [0, 0, 1, 1], [], []>} : vector<8x8xf32>, vector<8x512xf32>, vector<8x512xf32> -> vector<8x512xf32>
    %245 = arith.addf %237, %244 : vector<8x512xf32>
    %c49 = arith.constant 49 : index
    %c0_139 = arith.constant 0 : index
    %c0_140 = arith.constant 0 : index
    %246 = vector.load %arg3[%c49, %c0_139, %c0_140] : memref<63x8x8xf32, #tpu.memory_space<vmem>>, vector<1x8x8xf32>
    %247 = vector.shape_cast %246 : vector<1x8x8xf32> to vector<8x8xf32>
    %cst_141 = arith.constant dense<0.000000e+00> : vector<8x512xf32>
    %248 = tpu.matmul %247, %195, %cst_141 {dimension_numbers = #tpu.dot_dimension_numbers<[1], [0], [0], [1], [0, 0, 1, 1], [], []>} : vector<8x8xf32>, vector<8x512xf32>, vector<8x512xf32> -> vector<8x512xf32>
    %249 = arith.addf %241, %248 : vector<8x512xf32>
    %c511_i32_142 = arith.constant 511 : i32
    %250 = tpu.dynamic_rotate %195 by %c511_i32_142 dim 1 : vector<8x512xf32>, i32 -> vector<8x512xf32>
    %251 = vector.extract_strided_slice %1 {offsets = [5, 0], sizes = [1, 512], strides = [1, 1]} : vector<9x512xf32> to vector<1x512xf32>
    %252 = vector.broadcast %251 : vector<1x512xf32> to vector<8x512xf32>
    %253 = arith.mulf %250, %252 : vector<8x512xf32>
    %c23 = arith.constant 23 : index
    %c0_143 = arith.constant 0 : index
    %c0_144 = arith.constant 0 : index
    %254 = vector.load %arg3[%c23, %c0_143, %c0_144] : memref<63x8x8xf32, #tpu.memory_space<vmem>>, vector<1x8x8xf32>
    %255 = vector.shape_cast %254 : vector<1x8x8xf32> to vector<8x8xf32>
    %cst_145 = arith.constant dense<0.000000e+00> : vector<8x512xf32>
    %256 = tpu.matmul %255, %253, %cst_145 {dimension_numbers = #tpu.dot_dimension_numbers<[1], [0], [0], [1], [0, 0, 1, 1], [], []>} : vector<8x8xf32>, vector<8x512xf32>, vector<8x512xf32> -> vector<8x512xf32>
    %257 = arith.addf %245, %256 : vector<8x512xf32>
    %c50 = arith.constant 50 : index
    %c0_146 = arith.constant 0 : index
    %c0_147 = arith.constant 0 : index
    %258 = vector.load %arg3[%c50, %c0_146, %c0_147] : memref<63x8x8xf32, #tpu.memory_space<vmem>>, vector<1x8x8xf32>
    %259 = vector.shape_cast %258 : vector<1x8x8xf32> to vector<8x8xf32>
    %cst_148 = arith.constant dense<0.000000e+00> : vector<8x512xf32>
    %260 = tpu.matmul %259, %253, %cst_148 {dimension_numbers = #tpu.dot_dimension_numbers<[1], [0], [0], [1], [0, 0, 1, 1], [], []>} : vector<8x8xf32>, vector<8x512xf32>, vector<8x512xf32> -> vector<8x512xf32>
    %261 = arith.addf %249, %260 : vector<8x512xf32>
    %c497_i32_149 = arith.constant 497 : i32
    %262 = tpu.dynamic_rotate %195 by %c497_i32_149 dim 1 : vector<8x512xf32>, i32 -> vector<8x512xf32>
    %263 = vector.extract_strided_slice %1 {offsets = [6, 0], sizes = [1, 512], strides = [1, 1]} : vector<9x512xf32> to vector<1x512xf32>
    %264 = vector.broadcast %263 : vector<1x512xf32> to vector<8x512xf32>
    %265 = arith.mulf %262, %264 : vector<8x512xf32>
    %c24 = arith.constant 24 : index
    %c0_150 = arith.constant 0 : index
    %c0_151 = arith.constant 0 : index
    %266 = vector.load %arg3[%c24, %c0_150, %c0_151] : memref<63x8x8xf32, #tpu.memory_space<vmem>>, vector<1x8x8xf32>
    %267 = vector.shape_cast %266 : vector<1x8x8xf32> to vector<8x8xf32>
    %cst_152 = arith.constant dense<0.000000e+00> : vector<8x512xf32>
    %268 = tpu.matmul %267, %265, %cst_152 {dimension_numbers = #tpu.dot_dimension_numbers<[1], [0], [0], [1], [0, 0, 1, 1], [], []>} : vector<8x8xf32>, vector<8x512xf32>, vector<8x512xf32> -> vector<8x512xf32>
    %269 = arith.addf %257, %268 : vector<8x512xf32>
    %c51 = arith.constant 51 : index
    %c0_153 = arith.constant 0 : index
    %c0_154 = arith.constant 0 : index
    %270 = vector.load %arg3[%c51, %c0_153, %c0_154] : memref<63x8x8xf32, #tpu.memory_space<vmem>>, vector<1x8x8xf32>
    %271 = vector.shape_cast %270 : vector<1x8x8xf32> to vector<8x8xf32>
    %cst_155 = arith.constant dense<0.000000e+00> : vector<8x512xf32>
    %272 = tpu.matmul %271, %265, %cst_155 {dimension_numbers = #tpu.dot_dimension_numbers<[1], [0], [0], [1], [0, 0, 1, 1], [], []>} : vector<8x8xf32>, vector<8x512xf32>, vector<8x512xf32> -> vector<8x512xf32>
    %273 = arith.addf %261, %272 : vector<8x512xf32>
    %c496_i32_156 = arith.constant 496 : i32
    %274 = tpu.dynamic_rotate %195 by %c496_i32_156 dim 1 : vector<8x512xf32>, i32 -> vector<8x512xf32>
    %275 = vector.extract_strided_slice %1 {offsets = [7, 0], sizes = [1, 512], strides = [1, 1]} : vector<9x512xf32> to vector<1x512xf32>
    %276 = vector.broadcast %275 : vector<1x512xf32> to vector<8x512xf32>
    %277 = arith.mulf %274, %276 : vector<8x512xf32>
    %c25 = arith.constant 25 : index
    %c0_157 = arith.constant 0 : index
    %c0_158 = arith.constant 0 : index
    %278 = vector.load %arg3[%c25, %c0_157, %c0_158] : memref<63x8x8xf32, #tpu.memory_space<vmem>>, vector<1x8x8xf32>
    %279 = vector.shape_cast %278 : vector<1x8x8xf32> to vector<8x8xf32>
    %cst_159 = arith.constant dense<0.000000e+00> : vector<8x512xf32>
    %280 = tpu.matmul %279, %277, %cst_159 {dimension_numbers = #tpu.dot_dimension_numbers<[1], [0], [0], [1], [0, 0, 1, 1], [], []>} : vector<8x8xf32>, vector<8x512xf32>, vector<8x512xf32> -> vector<8x512xf32>
    %281 = arith.addf %269, %280 : vector<8x512xf32>
    %c52 = arith.constant 52 : index
    %c0_160 = arith.constant 0 : index
    %c0_161 = arith.constant 0 : index
    %282 = vector.load %arg3[%c52, %c0_160, %c0_161] : memref<63x8x8xf32, #tpu.memory_space<vmem>>, vector<1x8x8xf32>
    %283 = vector.shape_cast %282 : vector<1x8x8xf32> to vector<8x8xf32>
    %cst_162 = arith.constant dense<0.000000e+00> : vector<8x512xf32>
    %284 = tpu.matmul %283, %277, %cst_162 {dimension_numbers = #tpu.dot_dimension_numbers<[1], [0], [0], [1], [0, 0, 1, 1], [], []>} : vector<8x8xf32>, vector<8x512xf32>, vector<8x512xf32> -> vector<8x512xf32>
    %285 = arith.addf %273, %284 : vector<8x512xf32>
    %c495_i32_163 = arith.constant 495 : i32
    %286 = tpu.dynamic_rotate %195 by %c495_i32_163 dim 1 : vector<8x512xf32>, i32 -> vector<8x512xf32>
    %287 = vector.extract_strided_slice %1 {offsets = [8, 0], sizes = [1, 512], strides = [1, 1]} : vector<9x512xf32> to vector<1x512xf32>
    %288 = vector.broadcast %287 : vector<1x512xf32> to vector<8x512xf32>
    %289 = arith.mulf %286, %288 : vector<8x512xf32>
    %c26 = arith.constant 26 : index
    %c0_164 = arith.constant 0 : index
    %c0_165 = arith.constant 0 : index
    %290 = vector.load %arg3[%c26, %c0_164, %c0_165] : memref<63x8x8xf32, #tpu.memory_space<vmem>>, vector<1x8x8xf32>
    %291 = vector.shape_cast %290 : vector<1x8x8xf32> to vector<8x8xf32>
    %cst_166 = arith.constant dense<0.000000e+00> : vector<8x512xf32>
    %292 = tpu.matmul %291, %289, %cst_166 {dimension_numbers = #tpu.dot_dimension_numbers<[1], [0], [0], [1], [0, 0, 1, 1], [], []>} : vector<8x8xf32>, vector<8x512xf32>, vector<8x512xf32> -> vector<8x512xf32>
    %293 = arith.addf %281, %292 : vector<8x512xf32>
    %c53 = arith.constant 53 : index
    %c0_167 = arith.constant 0 : index
    %c0_168 = arith.constant 0 : index
    %294 = vector.load %arg3[%c53, %c0_167, %c0_168] : memref<63x8x8xf32, #tpu.memory_space<vmem>>, vector<1x8x8xf32>
    %295 = vector.shape_cast %294 : vector<1x8x8xf32> to vector<8x8xf32>
    %cst_169 = arith.constant dense<0.000000e+00> : vector<8x512xf32>
    %296 = tpu.matmul %295, %289, %cst_169 {dimension_numbers = #tpu.dot_dimension_numbers<[1], [0], [0], [1], [0, 0, 1, 1], [], []>} : vector<8x8xf32>, vector<8x512xf32>, vector<8x512xf32> -> vector<8x512xf32>
    %297 = arith.addf %285, %296 : vector<8x512xf32>
    %c3_170 = arith.constant 3 : index
    %c0_171 = arith.constant 0 : index
    %c0_172 = arith.constant 0 : index
    %298 = vector.load %arg5[%c3_170, %c0_171, %c0_172] : memref<7x8x1xf32, #tpu.memory_space<vmem>>, vector<1x8x1xf32>
    %299 = vector.shape_cast %298 : vector<1x8x1xf32> to vector<8x1xf32>
    %300 = vector.broadcast %299 : vector<8x1xf32> to vector<8x512xf32>
    %301 = arith.addf %293, %300 : vector<8x512xf32>
    %cst_173 = arith.constant 1.000000e-01 : f32
    %302 = vector.broadcast %cst_173 : f32 to vector<8x512xf32>
    %303 = arith.mulf %302, %301 : vector<8x512xf32>
    %304 = arith.maximumf %301, %303 : vector<8x512xf32>
    %c17_i32_174 = arith.constant 17 : i32
    %305 = tpu.dynamic_rotate %304 by %c17_i32_174 dim 1 : vector<8x512xf32>, i32 -> vector<8x512xf32>
    %306 = vector.extract_strided_slice %1 {offsets = [0, 0], sizes = [1, 512], strides = [1, 1]} : vector<9x512xf32> to vector<1x512xf32>
    %307 = vector.broadcast %306 : vector<1x512xf32> to vector<8x512xf32>
    %308 = arith.mulf %305, %307 : vector<8x512xf32>
    %c27 = arith.constant 27 : index
    %c0_175 = arith.constant 0 : index
    %c0_176 = arith.constant 0 : index
    %309 = vector.load %arg3[%c27, %c0_175, %c0_176] : memref<63x8x8xf32, #tpu.memory_space<vmem>>, vector<1x8x8xf32>
    %310 = vector.shape_cast %309 : vector<1x8x8xf32> to vector<8x8xf32>
    %cst_177 = arith.constant dense<0.000000e+00> : vector<8x512xf32>
    %311 = tpu.matmul %310, %308, %cst_177 {dimension_numbers = #tpu.dot_dimension_numbers<[1], [0], [0], [1], [0, 0, 1, 1], [], []>} : vector<8x8xf32>, vector<8x512xf32>, vector<8x512xf32> -> vector<8x512xf32>
    %c16_i32_178 = arith.constant 16 : i32
    %312 = tpu.dynamic_rotate %304 by %c16_i32_178 dim 1 : vector<8x512xf32>, i32 -> vector<8x512xf32>
    %313 = vector.extract_strided_slice %1 {offsets = [1, 0], sizes = [1, 512], strides = [1, 1]} : vector<9x512xf32> to vector<1x512xf32>
    %314 = vector.broadcast %313 : vector<1x512xf32> to vector<8x512xf32>
    %315 = arith.mulf %312, %314 : vector<8x512xf32>
    %c28 = arith.constant 28 : index
    %c0_179 = arith.constant 0 : index
    %c0_180 = arith.constant 0 : index
    %316 = vector.load %arg3[%c28, %c0_179, %c0_180] : memref<63x8x8xf32, #tpu.memory_space<vmem>>, vector<1x8x8xf32>
    %317 = vector.shape_cast %316 : vector<1x8x8xf32> to vector<8x8xf32>
    %cst_181 = arith.constant dense<0.000000e+00> : vector<8x512xf32>
    %318 = tpu.matmul %317, %315, %cst_181 {dimension_numbers = #tpu.dot_dimension_numbers<[1], [0], [0], [1], [0, 0, 1, 1], [], []>} : vector<8x8xf32>, vector<8x512xf32>, vector<8x512xf32> -> vector<8x512xf32>
    %319 = arith.addf %311, %318 : vector<8x512xf32>
    %c15_i32_182 = arith.constant 15 : i32
    %320 = tpu.dynamic_rotate %304 by %c15_i32_182 dim 1 : vector<8x512xf32>, i32 -> vector<8x512xf32>
    %321 = vector.extract_strided_slice %1 {offsets = [2, 0], sizes = [1, 512], strides = [1, 1]} : vector<9x512xf32> to vector<1x512xf32>
    %322 = vector.broadcast %321 : vector<1x512xf32> to vector<8x512xf32>
    %323 = arith.mulf %320, %322 : vector<8x512xf32>
    %c29 = arith.constant 29 : index
    %c0_183 = arith.constant 0 : index
    %c0_184 = arith.constant 0 : index
    %324 = vector.load %arg3[%c29, %c0_183, %c0_184] : memref<63x8x8xf32, #tpu.memory_space<vmem>>, vector<1x8x8xf32>
    %325 = vector.shape_cast %324 : vector<1x8x8xf32> to vector<8x8xf32>
    %cst_185 = arith.constant dense<0.000000e+00> : vector<8x512xf32>
    %326 = tpu.matmul %325, %323, %cst_185 {dimension_numbers = #tpu.dot_dimension_numbers<[1], [0], [0], [1], [0, 0, 1, 1], [], []>} : vector<8x8xf32>, vector<8x512xf32>, vector<8x512xf32> -> vector<8x512xf32>
    %327 = arith.addf %319, %326 : vector<8x512xf32>
    %c1_i32_186 = arith.constant 1 : i32
    %328 = tpu.dynamic_rotate %304 by %c1_i32_186 dim 1 : vector<8x512xf32>, i32 -> vector<8x512xf32>
    %329 = vector.extract_strided_slice %1 {offsets = [3, 0], sizes = [1, 512], strides = [1, 1]} : vector<9x512xf32> to vector<1x512xf32>
    %330 = vector.broadcast %329 : vector<1x512xf32> to vector<8x512xf32>
    %331 = arith.mulf %328, %330 : vector<8x512xf32>
    %c30 = arith.constant 30 : index
    %c0_187 = arith.constant 0 : index
    %c0_188 = arith.constant 0 : index
    %332 = vector.load %arg3[%c30, %c0_187, %c0_188] : memref<63x8x8xf32, #tpu.memory_space<vmem>>, vector<1x8x8xf32>
    %333 = vector.shape_cast %332 : vector<1x8x8xf32> to vector<8x8xf32>
    %cst_189 = arith.constant dense<0.000000e+00> : vector<8x512xf32>
    %334 = tpu.matmul %333, %331, %cst_189 {dimension_numbers = #tpu.dot_dimension_numbers<[1], [0], [0], [1], [0, 0, 1, 1], [], []>} : vector<8x8xf32>, vector<8x512xf32>, vector<8x512xf32> -> vector<8x512xf32>
    %335 = arith.addf %327, %334 : vector<8x512xf32>
    %c31 = arith.constant 31 : index
    %c0_190 = arith.constant 0 : index
    %c0_191 = arith.constant 0 : index
    %336 = vector.load %arg3[%c31, %c0_190, %c0_191] : memref<63x8x8xf32, #tpu.memory_space<vmem>>, vector<1x8x8xf32>
    %337 = vector.shape_cast %336 : vector<1x8x8xf32> to vector<8x8xf32>
    %cst_192 = arith.constant dense<0.000000e+00> : vector<8x512xf32>
    %338 = tpu.matmul %337, %304, %cst_192 {dimension_numbers = #tpu.dot_dimension_numbers<[1], [0], [0], [1], [0, 0, 1, 1], [], []>} : vector<8x8xf32>, vector<8x512xf32>, vector<8x512xf32> -> vector<8x512xf32>
    %339 = arith.addf %335, %338 : vector<8x512xf32>
    %c511_i32_193 = arith.constant 511 : i32
    %340 = tpu.dynamic_rotate %304 by %c511_i32_193 dim 1 : vector<8x512xf32>, i32 -> vector<8x512xf32>
    %341 = vector.extract_strided_slice %1 {offsets = [5, 0], sizes = [1, 512], strides = [1, 1]} : vector<9x512xf32> to vector<1x512xf32>
    %342 = vector.broadcast %341 : vector<1x512xf32> to vector<8x512xf32>
    %343 = arith.mulf %340, %342 : vector<8x512xf32>
    %c32 = arith.constant 32 : index
    %c0_194 = arith.constant 0 : index
    %c0_195 = arith.constant 0 : index
    %344 = vector.load %arg3[%c32, %c0_194, %c0_195] : memref<63x8x8xf32, #tpu.memory_space<vmem>>, vector<1x8x8xf32>
    %345 = vector.shape_cast %344 : vector<1x8x8xf32> to vector<8x8xf32>
    %cst_196 = arith.constant dense<0.000000e+00> : vector<8x512xf32>
    %346 = tpu.matmul %345, %343, %cst_196 {dimension_numbers = #tpu.dot_dimension_numbers<[1], [0], [0], [1], [0, 0, 1, 1], [], []>} : vector<8x8xf32>, vector<8x512xf32>, vector<8x512xf32> -> vector<8x512xf32>
    %347 = arith.addf %339, %346 : vector<8x512xf32>
    %c497_i32_197 = arith.constant 497 : i32
    %348 = tpu.dynamic_rotate %304 by %c497_i32_197 dim 1 : vector<8x512xf32>, i32 -> vector<8x512xf32>
    %349 = vector.extract_strided_slice %1 {offsets = [6, 0], sizes = [1, 512], strides = [1, 1]} : vector<9x512xf32> to vector<1x512xf32>
    %350 = vector.broadcast %349 : vector<1x512xf32> to vector<8x512xf32>
    %351 = arith.mulf %348, %350 : vector<8x512xf32>
    %c33 = arith.constant 33 : index
    %c0_198 = arith.constant 0 : index
    %c0_199 = arith.constant 0 : index
    %352 = vector.load %arg3[%c33, %c0_198, %c0_199] : memref<63x8x8xf32, #tpu.memory_space<vmem>>, vector<1x8x8xf32>
    %353 = vector.shape_cast %352 : vector<1x8x8xf32> to vector<8x8xf32>
    %cst_200 = arith.constant dense<0.000000e+00> : vector<8x512xf32>
    %354 = tpu.matmul %353, %351, %cst_200 {dimension_numbers = #tpu.dot_dimension_numbers<[1], [0], [0], [1], [0, 0, 1, 1], [], []>} : vector<8x8xf32>, vector<8x512xf32>, vector<8x512xf32> -> vector<8x512xf32>
    %355 = arith.addf %347, %354 : vector<8x512xf32>
    %c496_i32_201 = arith.constant 496 : i32
    %356 = tpu.dynamic_rotate %304 by %c496_i32_201 dim 1 : vector<8x512xf32>, i32 -> vector<8x512xf32>
    %357 = vector.extract_strided_slice %1 {offsets = [7, 0], sizes = [1, 512], strides = [1, 1]} : vector<9x512xf32> to vector<1x512xf32>
    %358 = vector.broadcast %357 : vector<1x512xf32> to vector<8x512xf32>
    %359 = arith.mulf %356, %358 : vector<8x512xf32>
    %c34 = arith.constant 34 : index
    %c0_202 = arith.constant 0 : index
    %c0_203 = arith.constant 0 : index
    %360 = vector.load %arg3[%c34, %c0_202, %c0_203] : memref<63x8x8xf32, #tpu.memory_space<vmem>>, vector<1x8x8xf32>
    %361 = vector.shape_cast %360 : vector<1x8x8xf32> to vector<8x8xf32>
    %cst_204 = arith.constant dense<0.000000e+00> : vector<8x512xf32>
    %362 = tpu.matmul %361, %359, %cst_204 {dimension_numbers = #tpu.dot_dimension_numbers<[1], [0], [0], [1], [0, 0, 1, 1], [], []>} : vector<8x8xf32>, vector<8x512xf32>, vector<8x512xf32> -> vector<8x512xf32>
    %363 = arith.addf %355, %362 : vector<8x512xf32>
    %c495_i32_205 = arith.constant 495 : i32
    %364 = tpu.dynamic_rotate %304 by %c495_i32_205 dim 1 : vector<8x512xf32>, i32 -> vector<8x512xf32>
    %365 = vector.extract_strided_slice %1 {offsets = [8, 0], sizes = [1, 512], strides = [1, 1]} : vector<9x512xf32> to vector<1x512xf32>
    %366 = vector.broadcast %365 : vector<1x512xf32> to vector<8x512xf32>
    %367 = arith.mulf %364, %366 : vector<8x512xf32>
    %c35 = arith.constant 35 : index
    %c0_206 = arith.constant 0 : index
    %c0_207 = arith.constant 0 : index
    %368 = vector.load %arg3[%c35, %c0_206, %c0_207] : memref<63x8x8xf32, #tpu.memory_space<vmem>>, vector<1x8x8xf32>
    %369 = vector.shape_cast %368 : vector<1x8x8xf32> to vector<8x8xf32>
    %cst_208 = arith.constant dense<0.000000e+00> : vector<8x512xf32>
    %370 = tpu.matmul %369, %367, %cst_208 {dimension_numbers = #tpu.dot_dimension_numbers<[1], [0], [0], [1], [0, 0, 1, 1], [], []>} : vector<8x8xf32>, vector<8x512xf32>, vector<8x512xf32> -> vector<8x512xf32>
    %371 = arith.addf %363, %370 : vector<8x512xf32>
    %c4_209 = arith.constant 4 : index
    %c0_210 = arith.constant 0 : index
    %c0_211 = arith.constant 0 : index
    %372 = vector.load %arg5[%c4_209, %c0_210, %c0_211] : memref<7x8x1xf32, #tpu.memory_space<vmem>>, vector<1x8x1xf32>
    %373 = vector.shape_cast %372 : vector<1x8x1xf32> to vector<8x1xf32>
    %374 = vector.broadcast %373 : vector<8x1xf32> to vector<8x512xf32>
    %375 = arith.addf %371, %374 : vector<8x512xf32>
    %cst_212 = arith.constant 1.000000e-01 : f32
    %376 = vector.broadcast %cst_212 : f32 to vector<8x512xf32>
    %377 = arith.mulf %376, %375 : vector<8x512xf32>
    %378 = arith.maximumf %375, %377 : vector<8x512xf32>
    %c1_213 = arith.constant 1 : index
    %c0_214 = arith.constant 0 : index
    %c0_215 = arith.constant 0 : index
    %379 = vector.load %arg4[%c1_213, %c0_214, %c0_215] : memref<2x8x8xf32, #tpu.memory_space<vmem>>, vector<1x8x8xf32>
    %380 = vector.shape_cast %379 : vector<1x8x8xf32> to vector<8x8xf32>
    %cst_216 = arith.constant dense<0.000000e+00> : vector<8x512xf32>
    %381 = tpu.matmul %380, %195, %cst_216 {dimension_numbers = #tpu.dot_dimension_numbers<[1], [0], [0], [1], [0, 0, 1, 1], [], []>} : vector<8x8xf32>, vector<8x512xf32>, vector<8x512xf32> -> vector<8x512xf32>
    %382 = arith.addf %378, %381 : vector<8x512xf32>
    %c5_217 = arith.constant 5 : index
    %c0_218 = arith.constant 0 : index
    %c0_219 = arith.constant 0 : index
    %383 = vector.load %arg5[%c5_217, %c0_218, %c0_219] : memref<7x8x1xf32, #tpu.memory_space<vmem>>, vector<1x8x1xf32>
    %384 = vector.shape_cast %383 : vector<1x8x1xf32> to vector<8x1xf32>
    %385 = vector.broadcast %384 : vector<8x1xf32> to vector<8x512xf32>
    %386 = arith.addf %382, %385 : vector<8x512xf32>
    %cst_220 = arith.constant 2.000000e-01 : f32
    %387 = vector.broadcast %cst_220 : f32 to vector<8x512xf32>
    %388 = arith.mulf %387, %386 : vector<8x512xf32>
    %389 = arith.maximumf %386, %388 : vector<8x512xf32>
    %c17_i32_221 = arith.constant 17 : i32
    %390 = tpu.dynamic_rotate %389 by %c17_i32_221 dim 1 : vector<8x512xf32>, i32 -> vector<8x512xf32>
    %391 = vector.extract_strided_slice %1 {offsets = [0, 0], sizes = [1, 512], strides = [1, 1]} : vector<9x512xf32> to vector<1x512xf32>
    %392 = vector.broadcast %391 : vector<1x512xf32> to vector<8x512xf32>
    %393 = arith.mulf %390, %392 : vector<8x512xf32>
    %c54 = arith.constant 54 : index
    %c0_222 = arith.constant 0 : index
    %c0_223 = arith.constant 0 : index
    %394 = vector.load %arg3[%c54, %c0_222, %c0_223] : memref<63x8x8xf32, #tpu.memory_space<vmem>>, vector<1x8x8xf32>
    %395 = vector.shape_cast %394 : vector<1x8x8xf32> to vector<8x8xf32>
    %cst_224 = arith.constant dense<0.000000e+00> : vector<8x512xf32>
    %396 = tpu.matmul %395, %393, %cst_224 {dimension_numbers = #tpu.dot_dimension_numbers<[1], [0], [0], [1], [0, 0, 1, 1], [], []>} : vector<8x8xf32>, vector<8x512xf32>, vector<8x512xf32> -> vector<8x512xf32>
    %c16_i32_225 = arith.constant 16 : i32
    %397 = tpu.dynamic_rotate %389 by %c16_i32_225 dim 1 : vector<8x512xf32>, i32 -> vector<8x512xf32>
    %398 = vector.extract_strided_slice %1 {offsets = [1, 0], sizes = [1, 512], strides = [1, 1]} : vector<9x512xf32> to vector<1x512xf32>
    %399 = vector.broadcast %398 : vector<1x512xf32> to vector<8x512xf32>
    %400 = arith.mulf %397, %399 : vector<8x512xf32>
    %c55 = arith.constant 55 : index
    %c0_226 = arith.constant 0 : index
    %c0_227 = arith.constant 0 : index
    %401 = vector.load %arg3[%c55, %c0_226, %c0_227] : memref<63x8x8xf32, #tpu.memory_space<vmem>>, vector<1x8x8xf32>
    %402 = vector.shape_cast %401 : vector<1x8x8xf32> to vector<8x8xf32>
    %cst_228 = arith.constant dense<0.000000e+00> : vector<8x512xf32>
    %403 = tpu.matmul %402, %400, %cst_228 {dimension_numbers = #tpu.dot_dimension_numbers<[1], [0], [0], [1], [0, 0, 1, 1], [], []>} : vector<8x8xf32>, vector<8x512xf32>, vector<8x512xf32> -> vector<8x512xf32>
    %404 = arith.addf %396, %403 : vector<8x512xf32>
    %c15_i32_229 = arith.constant 15 : i32
    %405 = tpu.dynamic_rotate %389 by %c15_i32_229 dim 1 : vector<8x512xf32>, i32 -> vector<8x512xf32>
    %406 = vector.extract_strided_slice %1 {offsets = [2, 0], sizes = [1, 512], strides = [1, 1]} : vector<9x512xf32> to vector<1x512xf32>
    %407 = vector.broadcast %406 : vector<1x512xf32> to vector<8x512xf32>
    %408 = arith.mulf %405, %407 : vector<8x512xf32>
    %c56 = arith.constant 56 : index
    %c0_230 = arith.constant 0 : index
    %c0_231 = arith.constant 0 : index
    %409 = vector.load %arg3[%c56, %c0_230, %c0_231] : memref<63x8x8xf32, #tpu.memory_space<vmem>>, vector<1x8x8xf32>
    %410 = vector.shape_cast %409 : vector<1x8x8xf32> to vector<8x8xf32>
    %cst_232 = arith.constant dense<0.000000e+00> : vector<8x512xf32>
    %411 = tpu.matmul %410, %408, %cst_232 {dimension_numbers = #tpu.dot_dimension_numbers<[1], [0], [0], [1], [0, 0, 1, 1], [], []>} : vector<8x8xf32>, vector<8x512xf32>, vector<8x512xf32> -> vector<8x512xf32>
    %412 = arith.addf %404, %411 : vector<8x512xf32>
    %c1_i32_233 = arith.constant 1 : i32
    %413 = tpu.dynamic_rotate %389 by %c1_i32_233 dim 1 : vector<8x512xf32>, i32 -> vector<8x512xf32>
    %414 = vector.extract_strided_slice %1 {offsets = [3, 0], sizes = [1, 512], strides = [1, 1]} : vector<9x512xf32> to vector<1x512xf32>
    %415 = vector.broadcast %414 : vector<1x512xf32> to vector<8x512xf32>
    %416 = arith.mulf %413, %415 : vector<8x512xf32>
    %c57 = arith.constant 57 : index
    %c0_234 = arith.constant 0 : index
    %c0_235 = arith.constant 0 : index
    %417 = vector.load %arg3[%c57, %c0_234, %c0_235] : memref<63x8x8xf32, #tpu.memory_space<vmem>>, vector<1x8x8xf32>
    %418 = vector.shape_cast %417 : vector<1x8x8xf32> to vector<8x8xf32>
    %cst_236 = arith.constant dense<0.000000e+00> : vector<8x512xf32>
    %419 = tpu.matmul %418, %416, %cst_236 {dimension_numbers = #tpu.dot_dimension_numbers<[1], [0], [0], [1], [0, 0, 1, 1], [], []>} : vector<8x8xf32>, vector<8x512xf32>, vector<8x512xf32> -> vector<8x512xf32>
    %420 = arith.addf %412, %419 : vector<8x512xf32>
    %c58 = arith.constant 58 : index
    %c0_237 = arith.constant 0 : index
    %c0_238 = arith.constant 0 : index
    %421 = vector.load %arg3[%c58, %c0_237, %c0_238] : memref<63x8x8xf32, #tpu.memory_space<vmem>>, vector<1x8x8xf32>
    %422 = vector.shape_cast %421 : vector<1x8x8xf32> to vector<8x8xf32>
    %cst_239 = arith.constant dense<0.000000e+00> : vector<8x512xf32>
    %423 = tpu.matmul %422, %389, %cst_239 {dimension_numbers = #tpu.dot_dimension_numbers<[1], [0], [0], [1], [0, 0, 1, 1], [], []>} : vector<8x8xf32>, vector<8x512xf32>, vector<8x512xf32> -> vector<8x512xf32>
    %424 = arith.addf %420, %423 : vector<8x512xf32>
    %c511_i32_240 = arith.constant 511 : i32
    %425 = tpu.dynamic_rotate %389 by %c511_i32_240 dim 1 : vector<8x512xf32>, i32 -> vector<8x512xf32>
    %426 = vector.extract_strided_slice %1 {offsets = [5, 0], sizes = [1, 512], strides = [1, 1]} : vector<9x512xf32> to vector<1x512xf32>
    %427 = vector.broadcast %426 : vector<1x512xf32> to vector<8x512xf32>
    %428 = arith.mulf %425, %427 : vector<8x512xf32>
    %c59 = arith.constant 59 : index
    %c0_241 = arith.constant 0 : index
    %c0_242 = arith.constant 0 : index
    %429 = vector.load %arg3[%c59, %c0_241, %c0_242] : memref<63x8x8xf32, #tpu.memory_space<vmem>>, vector<1x8x8xf32>
    %430 = vector.shape_cast %429 : vector<1x8x8xf32> to vector<8x8xf32>
    %cst_243 = arith.constant dense<0.000000e+00> : vector<8x512xf32>
    %431 = tpu.matmul %430, %428, %cst_243 {dimension_numbers = #tpu.dot_dimension_numbers<[1], [0], [0], [1], [0, 0, 1, 1], [], []>} : vector<8x8xf32>, vector<8x512xf32>, vector<8x512xf32> -> vector<8x512xf32>
    %432 = arith.addf %424, %431 : vector<8x512xf32>
    %c497_i32_244 = arith.constant 497 : i32
    %433 = tpu.dynamic_rotate %389 by %c497_i32_244 dim 1 : vector<8x512xf32>, i32 -> vector<8x512xf32>
    %434 = vector.extract_strided_slice %1 {offsets = [6, 0], sizes = [1, 512], strides = [1, 1]} : vector<9x512xf32> to vector<1x512xf32>
    %435 = vector.broadcast %434 : vector<1x512xf32> to vector<8x512xf32>
    %436 = arith.mulf %433, %435 : vector<8x512xf32>
    %c60 = arith.constant 60 : index
    %c0_245 = arith.constant 0 : index
    %c0_246 = arith.constant 0 : index
    %437 = vector.load %arg3[%c60, %c0_245, %c0_246] : memref<63x8x8xf32, #tpu.memory_space<vmem>>, vector<1x8x8xf32>
    %438 = vector.shape_cast %437 : vector<1x8x8xf32> to vector<8x8xf32>
    %cst_247 = arith.constant dense<0.000000e+00> : vector<8x512xf32>
    %439 = tpu.matmul %438, %436, %cst_247 {dimension_numbers = #tpu.dot_dimension_numbers<[1], [0], [0], [1], [0, 0, 1, 1], [], []>} : vector<8x8xf32>, vector<8x512xf32>, vector<8x512xf32> -> vector<8x512xf32>
    %440 = arith.addf %432, %439 : vector<8x512xf32>
    %c496_i32_248 = arith.constant 496 : i32
    %441 = tpu.dynamic_rotate %389 by %c496_i32_248 dim 1 : vector<8x512xf32>, i32 -> vector<8x512xf32>
    %442 = vector.extract_strided_slice %1 {offsets = [7, 0], sizes = [1, 512], strides = [1, 1]} : vector<9x512xf32> to vector<1x512xf32>
    %443 = vector.broadcast %442 : vector<1x512xf32> to vector<8x512xf32>
    %444 = arith.mulf %441, %443 : vector<8x512xf32>
    %c61 = arith.constant 61 : index
    %c0_249 = arith.constant 0 : index
    %c0_250 = arith.constant 0 : index
    %445 = vector.load %arg3[%c61, %c0_249, %c0_250] : memref<63x8x8xf32, #tpu.memory_space<vmem>>, vector<1x8x8xf32>
    %446 = vector.shape_cast %445 : vector<1x8x8xf32> to vector<8x8xf32>
    %cst_251 = arith.constant dense<0.000000e+00> : vector<8x512xf32>
    %447 = tpu.matmul %446, %444, %cst_251 {dimension_numbers = #tpu.dot_dimension_numbers<[1], [0], [0], [1], [0, 0, 1, 1], [], []>} : vector<8x8xf32>, vector<8x512xf32>, vector<8x512xf32> -> vector<8x512xf32>
    %448 = arith.addf %440, %447 : vector<8x512xf32>
    %c495_i32_252 = arith.constant 495 : i32
    %449 = tpu.dynamic_rotate %389 by %c495_i32_252 dim 1 : vector<8x512xf32>, i32 -> vector<8x512xf32>
    %450 = vector.extract_strided_slice %1 {offsets = [8, 0], sizes = [1, 512], strides = [1, 1]} : vector<9x512xf32> to vector<1x512xf32>
    %451 = vector.broadcast %450 : vector<1x512xf32> to vector<8x512xf32>
    %452 = arith.mulf %449, %451 : vector<8x512xf32>
    %c62 = arith.constant 62 : index
    %c0_253 = arith.constant 0 : index
    %c0_254 = arith.constant 0 : index
    %453 = vector.load %arg3[%c62, %c0_253, %c0_254] : memref<63x8x8xf32, #tpu.memory_space<vmem>>, vector<1x8x8xf32>
    %454 = vector.shape_cast %453 : vector<1x8x8xf32> to vector<8x8xf32>
    %cst_255 = arith.constant dense<0.000000e+00> : vector<8x512xf32>
    %455 = tpu.matmul %454, %452, %cst_255 {dimension_numbers = #tpu.dot_dimension_numbers<[1], [0], [0], [1], [0, 0, 1, 1], [], []>} : vector<8x8xf32>, vector<8x512xf32>, vector<8x512xf32> -> vector<8x512xf32>
    %456 = arith.addf %448, %455 : vector<8x512xf32>
    %457 = arith.addf %103, %297 : vector<8x512xf32>
    %458 = arith.addf %457, %456 : vector<8x512xf32>
    %c6_256 = arith.constant 6 : index
    %c0_257 = arith.constant 0 : index
    %c0_258 = arith.constant 0 : index
    %459 = vector.load %arg5[%c6_256, %c0_257, %c0_258] : memref<7x8x1xf32, #tpu.memory_space<vmem>>, vector<1x8x1xf32>
    %460 = vector.shape_cast %459 : vector<1x8x1xf32> to vector<8x1xf32>
    %461 = vector.broadcast %460 : vector<8x1xf32> to vector<8x512xf32>
    %462 = arith.addf %458, %461 : vector<8x512xf32>
    %cst_259 = arith.constant 2.000000e-01 : f32
    %463 = vector.broadcast %cst_259 : f32 to vector<8x512xf32>
    %464 = arith.mulf %463, %462 : vector<8x512xf32>
    %465 = arith.maximumf %462, %464 : vector<8x512xf32>
    %466 = vector.extract_strided_slice %465 {offsets = [0, 0], sizes = [4, 512], strides = [1, 1]} : vector<8x512xf32> to vector<4x512xf32>
    %c0_260 = arith.constant 0 : index
    %c0_261 = arith.constant 0 : index
    %467 = vector.load %arg6[%c0_260, %c0_261] : memref<4x512xf32, #tpu.memory_space<vmem>>, vector<4x512xf32>
    tpu.vector_store %arg6[%c0_260, %c0_261], %466 {strides = array<i32>} : memref<4x512xf32, #tpu.memory_space<vmem>>, vector<4x512xf32>,
    return
  }
  func.func @transform_0(%arg0: i32) -> (i32, i32) {
    %c0_i32 = arith.constant 0 : i32
    %c0_i32_0 = arith.constant 0 : i32
    return %c0_i32, %arg0 : i32, i32
  }
  func.func @transform_1(%arg0: i32) -> (i32, i32) {
    %c0_i32 = arith.constant 0 : i32
    %c0_i32_0 = arith.constant 0 : i32
    %c0_i32_1 = arith.constant 0 : i32
    return %c0_i32, %c0_i32_0 : i32, i32
  }
  func.func @transform_2(%arg0: i32) -> (i32, i32, i32) {
    %c0_i32 = arith.constant 0 : i32
    %c0_i32_0 = arith.constant 0 : i32
    %c0_i32_1 = arith.constant 0 : i32
    %c0_i32_2 = arith.constant 0 : i32
    return %c0_i32, %c0_i32_0, %c0_i32_1 : i32, i32, i32
  }
  func.func @transform_3(%arg0: i32) -> (i32, i32, i32) {
    %c0_i32 = arith.constant 0 : i32
    %c0_i32_0 = arith.constant 0 : i32
    %c0_i32_1 = arith.constant 0 : i32
    %c0_i32_2 = arith.constant 0 : i32
    return %c0_i32, %c0_i32_0, %c0_i32_1 : i32, i32, i32
  }
  func.func @transform_4(%arg0: i32) -> (i32, i32, i32) {
    %c0_i32 = arith.constant 0 : i32
    %c0_i32_0 = arith.constant 0 : i32
    %c0_i32_1 = arith.constant 0 : i32
    %c0_i32_2 = arith.constant 0 : i32
    return %c0_i32, %c0_i32_0, %c0_i32_1 : i32, i32, i32
  }
  func.func @transform_5(%arg0: i32) -> (i32, i32) {
    %c0_i32 = arith.constant 0 : i32
    %c0_i32_0 = arith.constant 0 : i32
    return %c0_i32, %arg0 : i32, i32
  }
}

</mosaic_0001>

<bundles_post_ra>
// kernel: dense_block_forward.1
= control target key start
LH: loop header
LB: loop body
LE: loop exit
PB: predicated region body
PF: predicated region fallthrough
CT: control target
= control target key end

     0   :  { %s11504_s18 = smov 0   ;;  %s13058_s0 = inlined_call_operand.vmem [shape: f32[8,1024], index: 0, kind: input, shape index: {}]   ;;  %s13059_s1 = inlined_call_operand.vmem [shape: f32[9,512], index: 1, kind: input, shape index: {}]   ;;  %s13060_s2 = inlined_call_operand.vmem [shape: f32[63,8,8], index: 2, kind: input, shape index: {}]   ;;  %s13061_s3 = inlined_call_operand.vmem [shape: f32[2,8,8], index: 3, kind: input, shape index: {}]   ;;  %s13062_s4 = inlined_call_operand.vmem [shape: f32[7,8,1], index: 4, kind: input, shape index: {}]   ;;  %s13063_s5 = inlined_call_operand.vmem [shape: f32[4,1024], index: 5, kind: output, shape index: {}]  }
   0x1 LB: > { %s10982_s19 = sadd.s32 4294967295, %s11462_s18   ;;  %p10986_p0 = scmp.ge.s32.totalorder %s11462_s18, 1  ;;  %s11462_s18 = sphi %s11504_s18, %s15_s18  }
   0x2   : > { %p188_p1 = scmp.lt.s32.totalorder %s11462_s18, 3 }
   0x4   : > { %p189_p2 = pnand %p10986_p0, %p188_p1 }
   0x5   : > { %s10987_s20 = sshll.u32 (!%p189_p2), %s10982_s19, 2  ;;  %v11464_v0 = vmov (!%p189_p2), 0.0   ;;  %s11465_s25 = smov (!%p189_p2), 16   ;;  %v3208_v5 = vld [vmem:[%s13062_s4] sm:$0xff] (!%p189_p2)  ;;  %v11473_v6 = vmov (!%p189_p2), 0   ;;  %v248_v7 = vlaneseq (!%p189_p2)  ;;  %v11608_v10 = vld [vmem:[%s13059_s1 + $0x18] sm:$0xff] (!%p189_p2) }
   0x6   : > { %192 = sbr.rel (%p189_p2) target bundleno = 2088 (0x828), region = 40  ;;  %p217_p3 = scmp.lt.s32.totalorder (!%p189_p2), %s10987_s20, 7  ;;  %381 = vmatprep.mubr.f32.mxu0 (!%p189_p2), %v11464_v0  ;;  %452 = vmatprep.mubr.f32.mxu1 (!%p189_p2), %v11464_v0  ;;  %v11614_v12 = vld [vmem:[%s13059_s1 + $0x8] sm:$0xff] (!%p189_p2)  ;;  %v11619_v13 = vld [vmem:[%s13059_s1] sm:$0xff] (!%p189_p2)  ;;  %v11624_v14 = vld [vmem:[%s13059_s1 + $0x10] sm:$0xff] (!%p189_p2)  ;;  %vm313_vm2 = vcmask (!%p189_p2), 64512  }
   0x7   : > { %s11466_s26 = smov (!%p189_p2), 17   ;;  %s11467_s27 = smov (!%p189_p2), 15   ;;  %11446 = vset.pattern.permute.xlu0 (!%p189_p2), %v11473_v6  ;;  %11447 = vset.pattern.permute.xlu1 (!%p189_p2), %v11473_v6  ;;  %v11601_v8 = vshrl.u32 (!%p189_p2), %v248_v7, 7  ;;  %v11603_v9 = vand.u32 (!%p189_p2), 127, %v248_v7  ;;  %v10992_v33 = vld [vmem:[%s13060_s2 + $0x8] sm:$0xff] (!%p189_p2)  ;;  %v275_v50 = vld [vmem:[%s13060_s2] sm:$0xff] (!%p189_p2) }
   0x8   : > { %s11468_s28 = smov (!%p189_p2), 1   ;;  %s11469_s29 = smov (!%p189_p2), 127   ;;  %v10997_v56 = vld [vmem:[%s13060_s2 + $0x128] sm:$0xff] (!%p189_p2) }
   0x9   : > { %s11470_s30 = smov (!%p189_p2), 113   ;;  %s11471_s6 = smov (!%p189_p2), 112   ;;  %v293_v11 = vsub.s32 (!%p189_p2), 1, %v11601_v8  ;;  %v257_v17 = vsub.s32 (!%p189_p2), 0, %v11601_v8  ;;  %vm286_vm0 = vcmp.lt.s32.totalorder (!%p189_p2), %v11603_v9, 16  ;;  %vm250_vm1 = vcmp.lt.s32.totalorder (!%p189_p2), %v11603_v9, 17 }
   0xa   : > { %s11472_s7 = smov (!%p189_p2), 111   ;;  %v911_v46 = vsub.s32 (!%p189_p2), 2, %v11601_v8  ;;  %vm904_vm3 = vcmp.lt.s32.totalorder (!%p189_p2), %v11603_v9, 15  ;;  %vm1239_vm4 = vcmp.lt.s32.totalorder (!%p189_p2), %v11603_v9, 1  ;;  %vm1876_vm5 = vcmp.lt.s32.totalorder (!%p189_p2), %v11603_v9, 127 }
   0xb   : > { %v11629_v18 = vrot.slane (!%p189_p2), %v11608_v10, %v293_v11  ;;  %v11632_v19 = vrot.slane (!%p189_p2), %v11614_v12, %v293_v11  ;;  %v11635_v20 = vrot.slane (!%p189_p2), %v11619_v13, %v293_v11  ;;  %v11638_v21 = vrot.slane (!%p189_p2), %v11624_v14, %v293_v11 }
   0xc   : > { %v11642_v24 = vrot.slane (!%p189_p2), %v11614_v12, %v257_v17  ;;  %v11662_v37 = vrot.slane (!%p189_p2), %v11619_v13, %v257_v17  ;;  %v11667_v38 = vrot.slane (!%p189_p2), %v11624_v14, %v257_v17  ;;  %v11671_v40 = vrot.slane (!%p189_p2), %v11608_v10, %v257_v17  ;;  %v10991_v17 = vld [vmem:[%s13060_s2 + $0x120] sm:$0xff] (!%p189_p2) }
   0xd   : > { %s13065_s20 = smov (!%p217_p3, %s10987_s20), 7  ;;  %v11690_v53 = vrot.slane %v11614_v12, %v911_v46  ;;  %v11697_v55 = vrot.slane %v11608_v10, %v911_v46  ;;  %v11711_v62 = vrot.slane %v11619_v13, %v911_v46  ;;  %vm2211_vm6 = vcmp.lt.s32.totalorder %v11603_v9, 113 }
   0xe   : > { %s10988_s21 = sshll.u32 %s13065_s20, 3  ;;  %vm2546_vm7 = vcmp.lt.s32.totalorder %v11603_v9, 112  ;;  %vm2881_vm8 = vcmp.lt.s32.totalorder %v11603_v9, 111  ;;  %v11190_v9 = vld [vmem:[%s13060_s2 + $0x1f0] sm:$0xff]  ;;  %s10990_s8 = sshll.u32 %s13065_s20, 2 }
   0xf   : > { %s11520_s24 = scalar_lea.vmem %s13058_s0, %s10988_s21 }
  0x10   : > { %v11523_v1 = vld [vmem:[%s11520_s24 + $0x10] sm:$0xff]  ;;  %v11526_v2 = vld [vmem:[%s11520_s24] sm:$0xff]  ;;  %v11533_v3 = vld [vmem:[%s11520_s24 + $0x18] sm:$0xff] }
  0x11   : > { %282 = vrot.lane.b32.xlu1 %v11523_v1, %s11465_s25  ;;  %278 = vrot.lane.b32.xlu0 %v11526_v2, %s11465_s25  ;;  %v11536_v4 = vld [vmem:[%s11520_s24 + $0x8] sm:$0xff] }
  0x15   : > { %284 = vrot.lane.b32.xlu1 %v11533_v3, %s11465_s25  ;;  %280 = vrot.lane.b32.xlu0 %v11536_v4, %s11465_s25 }
  0x19   : > { %242 = vrot.lane.b32.xlu1 %v11536_v4, %s11466_s26  ;;  %240 = vrot.lane.b32.xlu0 %v11526_v2, %s11466_s26 }
  0x1d   : > { %246 = vrot.lane.b32.xlu1 %v11533_v3, %s11466_s26  ;;  %244 = vrot.lane.b32.xlu0 %v11523_v1, %s11466_s26 }
  0x21   : > { %898 = vrot.lane.b32.xlu1 %v11536_v4, %s11467_s27  ;;  %896 = vrot.lane.b32.xlu0 %v11526_v2, %s11467_s27 }
  0x25   : > { %902 = vrot.lane.b32.xlu1 %v11533_v3, %s11467_s27  ;;  %900 = vrot.lane.b32.xlu0 %v11523_v1, %s11467_s27 }
  0x29   : > { %1233 = vrot.lane.b32.xlu1 %v11536_v4, %s11468_s28  ;;  %1231 = vrot.lane.b32.xlu0 %v11526_v2, %s11468_s28 }
  0x2d   : > { %1237 = vrot.lane.b32.xlu1 %v11533_v3, %s11468_s28  ;;  %1235 = vrot.lane.b32.xlu0 %v11523_v1, %s11468_s28 }
  0x31   : > { %1870 = vrot.lane.b32.xlu0 %v11536_v4, %s11469_s29  ;;  %1872 = vrot.lane.b32.xlu1 %v11523_v1, %s11469_s29 }
  0x35   : > { %1868 = vrot.lane.b32.xlu0 %v11526_v2, %s11469_s29  ;;  %1874 = vrot.lane.b32.xlu1 %v11533_v3, %s11469_s29 }
  0x39   : > { %2205 = vrot.lane.b32.xlu0 %v11536_v4, %s11470_s30  ;;  %2207 = vrot.lane.b32.xlu1 %v11523_v1, %s11470_s30 }
  0x3d   : > { %2203 = vrot.lane.b32.xlu0 %v11526_v2, %s11470_s30  ;;  %2209 = vrot.lane.b32.xlu1 %v11533_v3, %s11470_s30 }
  0x41   : > { %2540 = vrot.lane.b32.xlu0 %v11536_v4, %s11471_s6  ;;  %2542 = vrot.lane.b32.xlu1 %v11523_v1, %s11471_s6 }
  0x45   : > { %2538 = vrot.lane.b32.xlu0 %v11526_v2, %s11471_s6  ;;  %2544 = vrot.lane.b32.xlu1 %v11533_v3, %s11471_s6 }
  0x49   : > { %2875 = vrot.lane.b32.xlu0 %v11536_v4, %s11472_s7  ;;  %2877 = vrot.lane.b32.xlu1 %v11523_v1, %s11472_s7 }
  0x4d   : > { %2873 = vrot.lane.b32.xlu0 %v11526_v2, %s11472_s7  ;;  %2879 = vrot.lane.b32.xlu1 %v11533_v3, %s11472_s7 }
  0x51   : > { %3211 = vperm.xlu0 %11446, %v3208_v5   ;;  %v11716_v5 = vrot.slane %v11624_v14, %v911_v46 }
  0x83   : > { %v283_v15 = vpop.permute.xlu1 %282  ;;  %v279_v16 = vpop.permute.xlu0 %278 }
  0x87   : > { %v285_v22 = vpop.permute.xlu1 %284  ;;  %v281_v23 = vpop.permute.xlu0 %280 }
  0x88   : > { %v287_v25 = vsel %vm286_vm0, %v283_v15, %v285_v22  ;;  %v289_v26 = vsel %vm286_vm0, %v279_v16, %v281_v23  ;;  %v290_v27 = vsel %vm286_vm0, %v285_v22, %v279_v16  ;;  %v288_v28 = vsel %vm286_vm0, %v281_v23, %v283_v15 }
  0x89   : > { %v310_v29 = vmul.f32 %v11629_v18, %v287_v25  ;;  %v308_v30 = vmul.f32 %v11632_v19, %v289_v26  ;;  %v307_v31 = vmul.f32 %v11635_v20, %v290_v27  ;;  %v309_v32 = vmul.f32 %v11638_v21, %v288_v28 }
  0x8a   : > { %v1246_v15 = vsub.s32 3, %v11601_v8 }
  0x8b   : > { %388 = vmatprep.subr.mxu1 %v310_v29  ;;  %v243_v34 = vpop.permute.xlu1 %242  ;;  %317 = vmatprep.subr.mxu0 %v308_v30  ;;  %v241_v35 = vpop.permute.xlu0 %240 }
  0x8c   : > { %v253_v36 = vsel %vm250_vm1, %v241_v35, %v243_v34  ;;  %318 = vmatpush1.msra.mxu0 %v307_v31  ;;  %389 = vmatpush1.msra.mxu1 %v309_v32  ;;  %v11730_v26 = vrot.slane %v11614_v12, %v1246_v15  ;;  %v11736_v28 = vrot.slane %v11608_v10, %v1246_v15 }
  0x8d   : > { %10993 = vmatmul.mubr.msk.f32.vlgmr.msra.gmra.mrb[0].mxu0 %vm313_vm2, %v10992_v33  ;;  %10994 = vmatmul.mubr.msk.f32.vlgmr.msra.gmra.mrb[0].mxu1 %vm313_vm2, %v10992_v33  ;;  %v272_v39 = vmul.f32 %v11642_v24, %v253_v36  ;;  %v11750_v33 = vrot.slane %v11624_v14, %v1246_v15 }
  0x8e   : > { %526 = vmatprep.mubr.f32.mxu0 %v11464_v0  ;;  %597 = vmatprep.mubr.f32.mxu1 %v11464_v0 }
  0x8f   : > { %v247_v41 = vpop.permute.xlu1 %246  ;;  %v245_v42 = vpop.permute.xlu0 %244  ;;  %462 = vmatprep.subr.mxu0 %v272_v39 }
  0x90   : > { %v254_v43 = vsel %vm250_vm1, %v247_v41, %v241_v35  ;;  %v251_v44 = vsel %vm250_vm1, %v245_v42, %v247_v41  ;;  %v252_v45 = vsel %vm250_vm1, %v243_v34, %v245_v42 }
  0x91   : > { %v271_v47 = vmul.f32 %v11662_v37, %v254_v43  ;;  %v273_v48 = vmul.f32 %v11667_v38, %v252_v45  ;;  %v274_v49 = vmul.f32 %v11671_v40, %v251_v44  ;;  %v11005_v43 = vld [vmem:[%s13060_s2 + $0x130] sm:$0xff] }
  0x93   : > { %463 = vmatpush1.msra.mxu0 %v271_v47  ;;  %533 = vmatprep.subr.mxu1 %v274_v49  ;;  %v899_v51 = vpop.permute.xlu1 %898  ;;  %v897_v52 = vpop.permute.xlu0 %896 }
  0x94   : > { %534 = vmatpush1.msra.mxu1 %v273_v48  ;;  %609 = vmatprep.subr.mxu0 %v308_v30  ;;  %v907_v54 = vsel %vm904_vm3, %v897_v52, %v899_v51 }
  0x95   : > { %10995 = vmatmul.mubr.msk.f32.vlgmr.msra.gmra.mrb[0].mxu0 %vm313_vm2, %v275_v50  ;;  %10996 = vmatmul.mubr.msk.f32.vlgmr.msra.gmra.mrb[0].mxu1 %vm313_vm2, %v275_v50  ;;  %v926_v60 = vmul.f32 %v11690_v53, %v907_v54  ;;  %v1883_v50 = vsub.s32 5, %v11601_v8 }
  0x96   : > { %610 = vmatpush1.msra.mxu0 %v307_v31  ;;  %680 = vmatprep.subr.mxu1 %v310_v29  ;;  %v11740_v29 = vrot.slane %v11619_v13, %v1246_v15  ;;  %v11002_v31 = vld [vmem:[%s13060_s2 + $0x10] sm:$0xff]  ;;  %v2218_v15 = vsub.s32 6, %v11601_v8 }
  0x97   : > { %681 = vmatpush1.msra.mxu1 %v309_v32  ;;  %754 = vmatprep.subr.mxu0 %v272_v39  ;;  %v903_v57 = vpop.permute.xlu1 %902  ;;  %v901_v58 = vpop.permute.xlu0 %900  ;;  %v11789_v54 = vrot.slane %v11614_v12, %v1883_v50 }
  0x98   : > { %825 = vmatprep.subr.mxu1 %v274_v49  ;;  %673 = vmatprep.mubr.f32.mxu0 %v11464_v0  ;;  %v905_v59 = vsel %vm904_vm3, %v901_v58, %v903_v57  ;;  %v908_v63 = vsel %vm904_vm3, %v903_v57, %v897_v52  ;;  %v906_v11 = vsel %vm904_vm3, %v899_v51, %v901_v58  ;;  %v11011_v51 = vld [vmem:[%s13060_s2 + $0x138] sm:$0xff] }
  0x99   : > { %744 = vmatprep.mubr.f32.mxu1 %v11464_v0  ;;  %10998 = vmatmul.mubr.msk.f32.vlgmr.msra.gmra.mrb[2].mxu0 %vm313_vm2, %v10997_v56  ;;  %v928_v61 = vmul.f32 %v11697_v55, %v905_v59  ;;  %v925_v16 = vmul.f32 %v11711_v62, %v908_v63  ;;  %v927_v22 = vmul.f32 %v11716_v5, %v906_v11 }
  0x9a   : > { %10999 = vmatmul.mubr.msk.f32.vlgmr.msra.gmra.mrb[2].mxu1 %vm313_vm2, %v10997_v56  ;;  %755 = vmatpush1.msra.mxu0 %v271_v47  ;;  %v11008_v47 = vld [vmem:[%s13060_s2 + $0x18] sm:$0xff]  ;;  %v11796_v58 = vrot.slane %v11608_v10, %v1883_v50  ;;  %v11801_v59 = vrot.slane %v11619_v13, %v1883_v50 }
  0x9b   : > { %826 = vmatpush1.msra.mxu1 %v273_v48  ;;  %v1234_v6 = vpop.permute.xlu1 %1233  ;;  %818 = vmatprep.mubr.f32.mxu0 %v11464_v0  ;;  %v1232_v7 = vpop.permute.xlu0 %1231 }
  0x9c   : > { %889 = vmatprep.mubr.f32.mxu1 %v11464_v0  ;;  %934 = vmatprep.subr.mxu0 %v926_v60  ;;  %v1242_v27 = vsel %vm1239_vm4, %v1232_v7, %v1234_v6 }
  0x9d   : > { %1005 = vmatprep.subr.mxu1 %v928_v61  ;;  %v1261_v39 = vmul.f32 %v11730_v26, %v1242_v27  ;;  %v11846_v27 = vrot.slane %v11608_v10, %v2218_v15 }
  0x9f   : > { %v1238_v23 = vpop.permute.xlu1 %1237  ;;  %v1236_v25 = vpop.permute.xlu0 %1235 }
  0xa0   : > { %v1240_v30 = vsel %vm1239_vm4, %v1236_v25, %v1238_v23  ;;  %v1243_v32 = vsel %vm1239_vm4, %v1238_v23, %v1232_v7  ;;  %v1241_v36 = vsel %vm1239_vm4, %v1234_v6, %v1236_v25  ;;  %v11813_v6 = vrot.slane %v11624_v14, %v1883_v50 }
  0xa1   : > { %11000 = vmatmul.mubr.msk.f32.vlgmr.msra.gmra.mrb[2].mxu0 %vm313_vm2, %v10991_v17  ;;  %v1263_v41 = vmul.f32 %v11736_v28, %v1240_v30  ;;  %v1260_v42 = vmul.f32 %v11740_v29, %v1243_v32  ;;  %v1262_v44 = vmul.f32 %v11750_v33, %v1241_v36  ;;  %v11020_v30 = vld [vmem:[%s13060_s2 + $0x28] sm:$0xff] }
  0xa2   : > { %11001 = vmatmul.mubr.msk.f32.vlgmr.msra.gmra.mrb[2].mxu1 %vm313_vm2, %v10991_v17  ;;  %935 = vmatpush1.msra.mxu0 %v925_v16 }
  0xa3   : > { %1006 = vmatpush1.msra.mxu1 %v927_v22  ;;  %1085 = vmatprep.subr.mxu0 %v926_v60  ;;  %v1871_v34 = vpop.permute.xlu0 %1870  ;;  %v1873_v35 = vpop.permute.xlu1 %1872  ;;  %v11014_v60 = vld [vmem:[%s13060_s2 + $0x20] sm:$0xff] }
  0xa4   : > { %998 = vmatprep.mubr.f32.mxu0 %v11464_v0  ;;  %1069 = vmatprep.mubr.f32.mxu1 %v11464_v0  ;;  %v1878_v57 = vsel %vm1876_vm5, %v1871_v34, %v1873_v35 }
  0xa5   : > { %1156 = vmatprep.subr.mxu1 %v928_v61  ;;  %11003 = vmatmul.mubr.msk.f32.vlgmr.msra.gmra.mrb[0].mxu0 %vm313_vm2, %v11002_v31  ;;  %v1898_v11 = vmul.f32 %v11789_v54, %v1878_v57 }
  0xa6   : > { %11004 = vmatmul.mubr.msk.f32.vlgmr.msra.gmra.mrb[0].mxu1 %vm313_vm2, %v11002_v31  ;;  %1086 = vmatpush1.msra.mxu0 %v925_v16 }
  0xa7   : > { %1157 = vmatpush1.msra.mxu1 %v927_v22  ;;  %1149 = vmatprep.mubr.f32.mxu0 %v11464_v0  ;;  %v1869_v45 = vpop.permute.xlu0 %1868  ;;  %v1875_v46 = vpop.permute.xlu1 %1874 }
  0xa8   : > { %1220 = vmatprep.mubr.f32.mxu1 %v11464_v0  ;;  %1269 = vmatprep.subr.mxu0 %v1261_v39  ;;  %v1880_v61 = vsel %vm1876_vm5, %v1875_v46, %v1869_v45  ;;  %v1879_v63 = vsel %vm1876_vm5, %v1869_v45, %v1871_v34  ;;  %v1877_v7 = vsel %vm1876_vm5, %v1873_v35, %v1875_v46  ;;  %v11023_v45 = vld [vmem:[%s13060_s2 + $0x148] sm:$0xff] }
  0xa9   : > { %1340 = vmatprep.subr.mxu1 %v1263_v41  ;;  %11006 = vmatmul.mubr.msk.f32.vlgmr.msra.gmra.mrb[2].mxu0 %vm313_vm2, %v11005_v43  ;;  %v1900_v16 = vmul.f32 %v11796_v58, %v1880_v61  ;;  %v1897_v22 = vmul.f32 %v11801_v59, %v1879_v63  ;;  %v1899_v25 = vmul.f32 %v11813_v6, %v1877_v7  ;;  %v11029_v61 = vld [vmem:[%s13060_s2 + $0x150] sm:$0xff] }
  0xaa   : > { %11007 = vmatmul.mubr.msk.f32.vlgmr.msra.gmra.mrb[2].mxu1 %vm313_vm2, %v11005_v43  ;;  %1270 = vmatpush1.msra.mxu0 %v1260_v42  ;;  %v11861_v34 = vrot.slane %v11624_v14, %v2218_v15 }
  0xab   : > { %1341 = vmatpush1.msra.mxu1 %v1262_v44  ;;  %1420 = vmatprep.subr.mxu0 %v1261_v39  ;;  %v11772_v48 = vpop.permute.xlu0 %2205  ;;  %v11774_v49 = vpop.permute.xlu1 %2207 }
  0xac   : > { %1333 = vmatprep.mubr.f32.mxu0 %v11464_v0  ;;  %1404 = vmatprep.mubr.f32.mxu1 %v11464_v0 }
  0xad   : > { %1491 = vmatprep.subr.mxu1 %v1263_v41  ;;  %11009 = vmatmul.mubr.msk.f32.vlgmr.msra.gmra.mrb[0].mxu0 %vm313_vm2, %v11008_v47  ;;  %v2553_v41 = vsub.s32 7, %v11601_v8 }
  0xae   : > { %11010 = vmatmul.mubr.msk.f32.vlgmr.msra.gmra.mrb[0].mxu1 %vm313_vm2, %v11008_v47  ;;  %1421 = vmatpush1.msra.mxu0 %v1260_v42 }
  0xaf   : > { %1492 = vmatpush1.msra.mxu1 %v1262_v44  ;;  %1484 = vmatprep.mubr.f32.mxu0 %v11464_v0  ;;  %v2210_v52 = vpop.permute.xlu1 %2209  ;;  %v2204_v56 = vpop.permute.xlu0 %2203  ;;  %v11882_v46 = vrot.slane %v11614_v12, %v2553_v41  ;;  %v11893_v50 = vrot.slane %v11619_v13, %v2553_v41 }
  0xb0   : > { %1555 = vmatprep.mubr.f32.mxu1 %v11464_v0  ;;  %1571 = vmatprep.subr.mxu0 %v11536_v4  ;;  %v2215_v31 = vsel %vm2211_vm6, %v2210_v52, %v2204_v56  ;;  %v2214_v32 = vsel %vm2211_vm6, %v2204_v56, %v11772_v48  ;;  %v2212_v36 = vsel %vm2211_vm6, %v11774_v49, %v2210_v52 }
  0xb1   : > { %11012 = vmatmul.mubr.msk.f32.vlgmr.msra.gmra.mrb[2].mxu0 %vm313_vm2, %v11011_v51  ;;  %1642 = vmatprep.subr.mxu1 %v11533_v3  ;;  %v2235_v43 = vmul.f32 %v11846_v27, %v2215_v31  ;;  %v2234_v8 = vmul.f32 %v11861_v34, %v2212_v36  ;;  %v11903_v56 = vrot.slane %v11624_v14, %v2553_v41  ;;  %v11035_v36 = vld [vmem:[%s13060_s2 + $0x158] sm:$0xff] }
  0xb2   : > { %11013 = vmatmul.mubr.msk.f32.vlgmr.msra.gmra.mrb[2].mxu1 %vm313_vm2, %v11011_v51  ;;  %1572 = vmatpush1.msra.mxu0 %v11526_v2 }
  0xb3   : > { %1635 = vmatprep.mubr.f32.mxu0 %v11464_v0  ;;  %1643 = vmatpush1.msra.mxu1 %v11523_v1  ;;  %v11824_v17 = vpop.permute.xlu1 %2542  ;;  %v2541_v23 = vpop.permute.xlu0 %2540 }
  0xb4   : > { %1706 = vmatprep.mubr.f32.mxu1 %v11464_v0  ;;  %1722 = vmatprep.subr.mxu0 %v11536_v4  ;;  %v11017_v4 = vld [vmem:[%s13060_s2 + $0x140] sm:$0xff]  ;;  %v2548_v47 = vsel %vm2546_vm7, %v2541_v23, %v11824_v17 }
  0xb5   : > { %11015 = vmatmul.mubr.msk.f32.vlgmr.msra.gmra.mrb[0].mxu0 %vm313_vm2, %v11014_v60  ;;  %1793 = vmatprep.subr.mxu1 %v11533_v3  ;;  %v11838_v3 = vrot.slane %v11614_v12, %v2218_v15  ;;  %v11026_v12 = vld [vmem:[%s13060_s2 + $0x30] sm:$0xff]  ;;  %v2568_v57 = vmul.f32 %v11882_v46, %v2548_v47 }
  0xb6   : > { %11016 = vmatmul.mubr.msk.f32.vlgmr.msra.gmra.mrb[0].mxu1 %vm313_vm2, %v11014_v60  ;;  %1723 = vmatpush1.msra.mxu0 %v11526_v2  ;;  %v2213_v2 = vsel %vm2211_vm6, %v11772_v48, %v11774_v49  ;;  %v11889_v49 = vrot.slane %v11608_v10, %v2553_v41  ;;  %v11042_v41 = vld [vmem:[%s13060_s2 + $0x40] sm:$0xff] }
  0xb7   : > { %1786 = vmatprep.mubr.f32.mxu0 %v11464_v0  ;;  %1794 = vmatpush1.msra.mxu1 %v11523_v1  ;;  %v11850_v1 = vrot.slane %v11619_v13, %v2218_v15  ;;  %v2545_v35 = vpop.permute.xlu1 %2544  ;;  %v2233_v39 = vmul.f32 %v11838_v3, %v2213_v2  ;;  %v2539_v42 = vpop.permute.xlu0 %2538  ;;  %v11953_v2 = vld [vmem:[%s13059_s1 + $0x30] ss:$0 sm:$0xff] }
  0xb8   : > { %1857 = vmatprep.mubr.f32.mxu1 %v11464_v0  ;;  %1906 = vmatprep.subr.mxu0 %v1898_v11  ;;  %v2550_v51 = vsel %vm2546_vm7, %v2545_v35, %v2539_v42  ;;  %v2549_v10 = vsel %vm2546_vm7, %v2539_v42, %v2541_v23  ;;  %v2547_v13 = vsel %vm2546_vm7, %v11824_v17, %v2545_v35  ;;  %v11032_v17 = vld [vmem:[%s13060_s2 + $0x38] sm:$0xff]  ;;  %v11944_v23 = vld [vmem:[%s13059_s1 + $0x20] ss:$0 sm:$0xff] }
  0xb9   : > { %11018 = vmatmul.mubr.msk.f32.vlgmr.msra.gmra.mrb[2].mxu0 %vm313_vm2, %v11017_v4  ;;  %1977 = vmatprep.subr.mxu1 %v1900_v16  ;;  %v2232_v44 = vmul.f32 %v11850_v1, %v2214_v32  ;;  %v2570_v60 = vmul.f32 %v11889_v49, %v2550_v51  ;;  %v2567_v14 = vmul.f32 %v11893_v50, %v2549_v10 }
  0xba   : > { %11019 = vmatmul.mubr.msk.f32.vlgmr.msra.gmra.mrb[2].mxu1 %vm313_vm2, %v11017_v4  ;;  %1907 = vmatpush1.msra.mxu0 %v1897_v22  ;;  %v2569_v63 = vmul.f32 %v11903_v56, %v2547_v13  ;;  %v11939_v4 = vld [vmem:[%s13059_s1 + $0x38] ss:$0 sm:$0xff] }
  0xbb   : > { %2057 = vmatprep.subr.mxu0 %v1898_v11  ;;  %1978 = vmatpush1.msra.mxu1 %v1899_v25  ;;  %v2878_v48 = vpop.permute.xlu1 %2877  ;;  %v2876_v52 = vpop.permute.xlu0 %2875 }
  0xbc   : > { %1970 = vmatprep.mubr.f32.mxu0 %v11464_v0  ;;  %2041 = vmatprep.mubr.f32.mxu1 %v11464_v0  ;;  %v2883_v15 = vsel %vm2881_vm8, %v2876_v52, %v2878_v48 }
  0xbd   : > { %2128 = vmatprep.subr.mxu1 %v1900_v16  ;;  %11021 = vmatmul.mubr.msk.f32.vlgmr.msra.gmra.mrb[0].mxu0 %vm313_vm2, %v11020_v30  ;;  %v11928_v16 = vld [vmem:[%s13059_s1 + $0x28] ss:$0 sm:$0xff] }
  0xbe   : > { %11022 = vmatmul.mubr.msk.f32.vlgmr.msra.gmra.mrb[0].mxu1 %vm313_vm2, %v11020_v30  ;;  %2058 = vmatpush1.msra.mxu0 %v1897_v22  ;;  %v2903_v31 = vmul.f32 %v11928_v16, %v2883_v15  ;;  %v11078_v15 = vld [vmem:[%s13062_s4 + $0x10] sm:$0xff] }
  0xbf   : > { %2129 = vmatpush1.msra.mxu1 %v1899_v25  ;;  %2121 = vmatprep.mubr.f32.mxu0 %v11464_v0  ;;  %v2880_v7 = vpop.permute.xlu1 %2879  ;;  %v2874_v11 = vpop.permute.xlu0 %2873 }
  0xc0   : > { %2192 = vmatprep.mubr.f32.mxu1 %v11464_v0  ;;  %2241 = vmatprep.subr.mxu0 %v2233_v39  ;;  %v2885_v22 = vsel %vm2881_vm8, %v2880_v7, %v2874_v11  ;;  %v2884_v25 = vsel %vm2881_vm8, %v2874_v11, %v2876_v52  ;;  %v2882_v30 = vsel %vm2881_vm8, %v2878_v48, %v2880_v7  ;;  %v11045_v52 = vld [vmem:[%s13060_s2 + $0x160] sm:$0xff]  ;;  %v11075_v11 = vld [vmem:[%s13062_s4 + $0x8] sm:$0xff] }
  0xc1   : > { %11024 = vmatmul.mubr.msk.f32.vlgmr.msra.gmra.mrb[2].mxu0 %vm313_vm2, %v11023_v45  ;;  %2312 = vmatprep.subr.mxu1 %v2235_v43  ;;  %v2905_v32 = vmul.f32 %v11939_v4, %v2885_v22  ;;  %v2902_v35 = vmul.f32 %v11944_v23, %v2884_v25 }
  0xc2   : > { %11025 = vmatmul.mubr.msk.f32.vlgmr.msra.gmra.mrb[2].mxu1 %vm313_vm2, %v11023_v45  ;;  %2242 = vmatpush1.msra.mxu0 %v2232_v44 }
  0xc3   : > { %2392 = vmatprep.subr.mxu0 %v2233_v39  ;;  %2313 = vmatpush1.msra.mxu1 %v2234_v8  ;;  %v2904_v39 = vmul.f32 %v11953_v2, %v2882_v30 }
  0xc4   : > { %2305 = vmatprep.mubr.f32.mxu0 %v11464_v0  ;;  %2376 = vmatprep.mubr.f32.mxu1 %v11464_v0 }
  0xc5   : > { %2463 = vmatprep.subr.mxu1 %v2235_v43  ;;  %11027 = vmatmul.mubr.msk.f32.vlgmr.msra.gmra.mrb[0].mxu0 %vm313_vm2, %v11026_v12 }
  0xc6   : > { %11028 = vmatmul.mubr.msk.f32.vlgmr.msra.gmra.mrb[0].mxu1 %vm313_vm2, %v11026_v12  ;;  %2393 = vmatpush1.msra.mxu0 %v2232_v44 }
  0xc7   : > { %2464 = vmatpush1.msra.mxu1 %v2234_v8  ;;  %2456 = vmatprep.mubr.f32.mxu0 %v11464_v0 }
  0xc8   : > { %2527 = vmatprep.mubr.f32.mxu1 %v11464_v0  ;;  %2576 = vmatprep.subr.mxu0 %v2568_v57 }
  0xc9   : > { %11030 = vmatmul.mubr.msk.f32.vlgmr.msra.gmra.mrb[2].mxu0 %vm313_vm2, %v11029_v61  ;;  %2647 = vmatprep.subr.mxu1 %v2570_v60 }
  0xca   : > { %11031 = vmatmul.mubr.msk.f32.vlgmr.msra.gmra.mrb[2].mxu1 %vm313_vm2, %v11029_v61  ;;  %2577 = vmatpush1.msra.mxu0 %v2567_v14 }
  0xcb   : > { %2727 = vmatprep.subr.mxu0 %v2568_v57  ;;  %2648 = vmatpush1.msra.mxu1 %v2569_v63 }
  0xcc   : > { %2640 = vmatprep.mubr.f32.mxu0 %v11464_v0  ;;  %2711 = vmatprep.mubr.f32.mxu1 %v11464_v0 }
  0xcd   : > { %2798 = vmatprep.subr.mxu1 %v2570_v60  ;;  %11033 = vmatmul.mubr.msk.f32.vlgmr.msra.gmra.mrb[0].mxu0 %vm313_vm2, %v11032_v17 }
  0xce   : > { %11034 = vmatmul.mubr.msk.f32.vlgmr.msra.gmra.mrb[0].mxu1 %vm313_vm2, %v11032_v17  ;;  %2728 = vmatpush1.msra.mxu0 %v2567_v14 }
  0xcf   : > { %2799 = vmatpush1.msra.mxu1 %v2569_v63  ;;  %2791 = vmatprep.mubr.f32.mxu0 %v11464_v0 }
  0xd0   : > { %2862 = vmatprep.mubr.f32.mxu1 %v11464_v0  ;;  %2911 = vmatprep.subr.mxu0 %v2903_v31  ;;  %v3212_v42 = vpop.permute.xlu0 %3211 }
  0xd1   : > { %11036 = vmatmul.mubr.msk.f32.vlgmr.msra.gmra.mrb[2].mxu0 %vm313_vm2, %v11035_v36  ;;  %2982 = vmatprep.subr.mxu1 %v2905_v32 }
  0xd2   : > { %11037 = vmatmul.mubr.msk.f32.vlgmr.msra.gmra.mrb[2].mxu1 %vm313_vm2, %v11035_v36  ;;  %2912 = vmatpush1.msra.mxu0 %v2902_v35 }
  0xd3   : > { %3062 = vmatprep.subr.mxu0 %v2903_v31  ;;  %2983 = vmatpush1.msra.mxu1 %v2904_v39 }
  0xd4   : > { %2975 = vmatprep.mubr.f32.mxu0 %v11464_v0  ;;  %3046 = vmatprep.mubr.f32.mxu1 %v11464_v0 }
  0xd5   : > { %3133 = vmatprep.subr.mxu1 %v2905_v32  ;;  %11043 = vmatmul.mubr.msk.f32.vlgmr.msra.gmra.mrb[0].mxu0 %vm313_vm2, %v11042_v41 }
  0xd6   : > { %11044 = vmatmul.mubr.msk.f32.vlgmr.msra.gmra.mrb[0].mxu1 %vm313_vm2, %v11042_v41  ;;  %3063 = vmatpush1.msra.mxu0 %v2902_v35 }
  0xd7   : > { %3134 = vmatpush1.msra.mxu1 %v2904_v39  ;;  %3126 = vmatprep.mubr.f32.mxu0 %v11464_v0 }
  0xd8   : > { %3197 = vmatprep.mubr.f32.mxu1 %v11464_v0 }
  0xd9   : > { %11046 = vmatmul.mubr.msk.f32.vlgmr.msra.gmra.mrb[2].mxu0 %vm313_vm2, %v11045_v52 }
  0xda   : > { %11047 = vmatmul.mubr.msk.f32.vlgmr.msra.gmra.mrb[2].mxu1 %vm313_vm2, %v11045_v52  ;;  %3329 = vmatprep.mubr.f32.mxu0 %v11464_v0 }
  0xdb   : > { %3400 = vmatprep.mubr.f32.mxu1 %v11464_v0 }
 0x1a8   : > { %v2977_v43 = vpop.f32.mrb[0].mxu0 }
 0x1a9   : > { %v3048_v44 = vpop.f32.mrb[0].mxu1  ;;  %v3214_v45 = vadd.f32 %v3212_v42, %v2977_v43  ;;  %v2979_v8 = vpop.f32.mrb[1].mxu0 }
 0x1aa   : > { %v3216_v47 = vadd.f32 %v3212_v42, %v3048_v44  ;;  %v3215_v48 = vadd.f32 %v3212_v42, %v2979_v8  ;;  %v3050_v12 = vpop.f32.mrb[1].mxu1 }
 0x1ab   : > { %v3218_v51 = vmul.f32 0.1, %v3214_v45  ;;  %v3217_v60 = vadd.f32 %v3212_v42, %v3050_v12 }
 0x1ac   : > { %v3220_v10 = vmul.f32 0.1, %v3216_v47  ;;  %v3219_v57 = vmul.f32 0.1, %v3215_v48 }
 0x1ad   : > { %v11984_v13 = vmax.f32 %v3214_v45, %v3218_v51  ;;  %v3221_v63 = vmul.f32 0.1, %v3217_v60  ;;  %v11049_v45 = vld [vmem:[%s13060_s2 + $0x50] sm:$0xff] }
 0x1ae   : > { %v11988_v14 = vmax.f32 %v3216_v47, %v3220_v10  ;;  %v11994_v61 = vmax.f32 %v3215_v48, %v3219_v57 }
 0x1af   : > { %3244 = vrot.lane.b32.xlu1 %v11984_v13, %s11465_s25  ;;  %v12000_v7 = vmax.f32 %v3217_v60, %v3221_v63 }
 0x1b0   : > { %3248 = vrot.lane.b32.xlu0 %v11988_v14, %s11465_s25 }
 0x1b3   : > { %3246 = vrot.lane.b32.xlu1 %v11994_v61, %s11465_s25 }
 0x1b4   : > { %3226 = vrot.lane.b32.xlu0 %v11984_v13, %s11466_s26 }
 0x1b7   : > { %3250 = vrot.lane.b32.xlu1 %v12000_v7, %s11465_s25 }
 0x1b8   : > { %3230 = vrot.lane.b32.xlu0 %v11988_v14, %s11466_s26 }
 0x1bb   : > { %3228 = vrot.lane.b32.xlu1 %v11994_v61, %s11466_s26 }
 0x1bc   : > { %3552 = vrot.lane.b32.xlu0 %v11984_v13, %s11467_s27 }
 0x1bf   : > { %3232 = vrot.lane.b32.xlu1 %v12000_v7, %s11466_s26 }
 0x1c0   : > { %3556 = vrot.lane.b32.xlu0 %v11988_v14, %s11467_s27 }
 0x1c3   : > { %3554 = vrot.lane.b32.xlu1 %v11994_v61, %s11467_s27 }
 0x1c4   : > { %3719 = vrot.lane.b32.xlu0 %v11984_v13, %s11468_s28 }
 0x1c7   : > { %3558 = vrot.lane.b32.xlu1 %v12000_v7, %s11467_s27 }
 0x1c8   : > { %3723 = vrot.lane.b32.xlu0 %v11988_v14, %s11468_s28 }
 0x1cb   : > { %3721 = vrot.lane.b32.xlu1 %v11994_v61, %s11468_s28 }
 0x1cc   : > { %4039 = vrot.lane.b32.xlu0 %v11994_v61, %s11469_s29 }
 0x1cf   : > { %3725 = vrot.lane.b32.xlu1 %v12000_v7, %s11468_s28 }
 0x1d0   : > { %4037 = vrot.lane.b32.xlu0 %v11984_v13, %s11469_s29 }
 0x1d3   : > { %4041 = vrot.lane.b32.xlu1 %v11988_v14, %s11469_s29 }
 0x1d4   : > { %4206 = vrot.lane.b32.xlu0 %v11994_v61, %s11470_s30 }
 0x1d7   : > { %4043 = vrot.lane.b32.xlu1 %v12000_v7, %s11469_s29 }
 0x1d8   : > { %4204 = vrot.lane.b32.xlu0 %v11984_v13, %s11470_s30 }
 0x1db   : > { %4208 = vrot.lane.b32.xlu1 %v11988_v14, %s11470_s30 }
 0x1dc   : > { %4373 = vrot.lane.b32.xlu0 %v11994_v61, %s11471_s6 }
 0x1df   : > { %4210 = vrot.lane.b32.xlu1 %v12000_v7, %s11470_s30 }
 0x1e0   : > { %4371 = vrot.lane.b32.xlu0 %v11984_v13, %s11471_s6 }
 0x1e3   : > { %4375 = vrot.lane.b32.xlu1 %v11988_v14, %s11471_s6 }
 0x1e4   : > { %4540 = vrot.lane.b32.xlu0 %v11994_v61, %s11472_s7 }
 0x1e7   : > { %4377 = vrot.lane.b32.xlu1 %v12000_v7, %s11471_s6 }
 0x1e8   : > { %4538 = vrot.lane.b32.xlu0 %v11984_v13, %s11472_s7 }
 0x1eb   : > { %4542 = vrot.lane.b32.xlu1 %v11988_v14, %s11472_s7 }
 0x1ec   : > { %4709 = vperm.xlu0 %11446, %v11075_v11  }
 0x1ef   : > { %4544 = vrot.lane.b32.xlu1 %v12000_v7, %s11472_s7 }
 0x1f3   : > { %4878 = vperm.xlu1 %11447, %v11078_v15  }
 0x221   : > { %v3245_v17 = vpop.permute.xlu1 %3244 }
 0x222   : > { %v3249_v22 = vpop.permute.xlu0 %3248 }
 0x225   : > { %v3247_v25 = vpop.permute.xlu1 %3246 }
 0x226   : > { %v3227_v30 = vpop.permute.xlu0 %3226  ;;  %v3254_v31 = vsel %vm286_vm0, %v3245_v17, %v3247_v25  ;;  %v3253_v35 = vsel %vm286_vm0, %v3247_v25, %v3249_v22 }
 0x227   : > { %v3257_v32 = vmul.f32 %v3254_v31, %v11632_v19  ;;  %v3258_v8 = vmul.f32 %v3253_v35, %v11638_v21 }
 0x229   : > { %3265 = vmatprep.subr.mxu0 %v3257_v32  ;;  %v3251_v36 = vpop.permute.xlu1 %3250 }
 0x22a   : > { %v3231_v39 = vpop.permute.xlu0 %3230  ;;  %v3252_v41 = vsel %vm286_vm0, %v3249_v22, %v3251_v36  ;;  %v3255_v42 = vsel %vm286_vm0, %v3251_v36, %v3245_v17  ;;  %v11048_v17 = vld [vmem:[%s13060_s2 + $0x48] sm:$0xff] }
 0x22b   : > { %v3256_v43 = vmul.f32 %v3255_v42, %v11635_v20  ;;  %v3259_v44 = vmul.f32 %v3252_v41, %v11629_v18 }
 0x22d   : > { %3266 = vmatpush1.msra.mxu0 %v3256_v43  ;;  %3336 = vmatprep.subr.mxu1 %v3259_v44  ;;  %v3229_v47 = vpop.permute.xlu1 %3228 }
 0x22e   : > { %v3553_v48 = vpop.permute.xlu0 %3552  ;;  %v3236_v12 = vsel %vm250_vm1, %v3227_v30, %v3229_v47  ;;  %11050 = vmatmul.mubr.msk.f32.vlgmr.msra.gmra.mrb[4].mxu0 %vm313_vm2, %v11049_v45  ;;  %3337 = vmatpush1.msra.mxu1 %v3258_v8  ;;  %v3235_v52 = vsel %vm250_vm1, %v3229_v47, %v3231_v39 }
 0x22f   : > { %11051 = vmatmul.mubr.msk.f32.vlgmr.msra.gmra.mrb[4].mxu1 %vm313_vm2, %v11049_v45  ;;  %v3239_v51 = vmul.f32 %v3236_v12, %v11642_v24  ;;  %3474 = vmatprep.mubr.f32.mxu0 %v11464_v0  ;;  %v3240_v22 = vmul.f32 %v3235_v52, %v11667_v38  ;;  %v11054_v45 = vld [vmem:[%s13060_s2 + $0x58] sm:$0xff] }
 0x230   : > { %3545 = vmatprep.mubr.f32.mxu1 %v11464_v0 }
 0x231   : > { %3410 = vmatprep.subr.mxu0 %v3239_v51  ;;  %v3233_v10 = vpop.permute.xlu1 %3232 }
 0x232   : > { %v3557_v57 = vpop.permute.xlu0 %3556  ;;  %v3234_v60 = vsel %vm250_vm1, %v3231_v39, %v3233_v10  ;;  %v3237_v63 = vsel %vm250_vm1, %v3233_v10, %v3227_v30 }
 0x233   : > { %v3238_v11 = vmul.f32 %v3237_v63, %v11662_v37  ;;  %v3241_v15 = vmul.f32 %v3234_v60, %v11671_v40 }
 0x235   : > { %3411 = vmatpush1.msra.mxu0 %v3238_v11  ;;  %3481 = vmatprep.subr.mxu1 %v3241_v15  ;;  %v3555_v25 = vpop.permute.xlu1 %3554 }
 0x236   : > { %v3720_v31 = vpop.permute.xlu0 %3719  ;;  %v3562_v32 = vsel %vm904_vm3, %v3553_v48, %v3555_v25  ;;  %11052 = vmatmul.mubr.msk.f32.vlgmr.msra.gmra.mrb[4].mxu0 %vm313_vm2, %v11048_v17  ;;  %3482 = vmatpush1.msra.mxu1 %v3240_v22  ;;  %v3561_v35 = vsel %vm904_vm3, %v3555_v25, %v3557_v57 }
 0x237   : > { %11053 = vmatmul.mubr.msk.f32.vlgmr.msra.gmra.mrb[4].mxu1 %vm313_vm2, %v11048_v17  ;;  %v3565_v30 = vmul.f32 %v3562_v32, %v11690_v53  ;;  %3637 = vmatprep.mubr.f32.mxu0 %v11464_v0  ;;  %v3566_v8 = vmul.f32 %v3561_v35, %v11716_v5  ;;  %v11057_v17 = vld [vmem:[%s13060_s2 + $0x60] sm:$0xff] }
 0x238   : > { %3708 = vmatprep.mubr.f32.mxu1 %v11464_v0 }
 0x239   : > { %3573 = vmatprep.subr.mxu0 %v3565_v30  ;;  %v3559_v36 = vpop.permute.xlu1 %3558 }
 0x23a   : > { %v3724_v39 = vpop.permute.xlu0 %3723  ;;  %v3560_v41 = vsel %vm904_vm3, %v3557_v57, %v3559_v36  ;;  %v3563_v42 = vsel %vm904_vm3, %v3559_v36, %v3553_v48 }
 0x23b   : > { %v3564_v43 = vmul.f32 %v3563_v42, %v11711_v62  ;;  %v3567_v44 = vmul.f32 %v3560_v41, %v11697_v55 }
 0x23d   : > { %3574 = vmatpush1.msra.mxu0 %v3564_v43  ;;  %3644 = vmatprep.subr.mxu1 %v3567_v44  ;;  %v3722_v47 = vpop.permute.xlu1 %3721 }
 0x23e   : > { %v4040_v12 = vpop.permute.xlu0 %4039  ;;  %v3729_v51 = vsel %vm1239_vm4, %v3720_v31, %v3722_v47  ;;  %11055 = vmatmul.mubr.msk.f32.vlgmr.msra.gmra.mrb[4].mxu0 %vm313_vm2, %v11054_v45  ;;  %3645 = vmatpush1.msra.mxu1 %v3566_v8  ;;  %v3728_v52 = vsel %vm1239_vm4, %v3722_v47, %v3724_v39 }
 0x23f   : > { %11056 = vmatmul.mubr.msk.f32.vlgmr.msra.gmra.mrb[4].mxu1 %vm313_vm2, %v11054_v45  ;;  %v3732_v48 = vmul.f32 %v3729_v51, %v11730_v26  ;;  %3804 = vmatprep.mubr.f32.mxu0 %v11464_v0  ;;  %v3733_v22 = vmul.f32 %v3728_v52, %v11750_v33 }
 0x240   : > { %3875 = vmatprep.mubr.f32.mxu1 %v11464_v0 }
 0x241   : > { %3740 = vmatprep.subr.mxu0 %v3732_v48  ;;  %v3726_v10 = vpop.permute.xlu1 %3725 }
 0x242   : > { %v4038_v57 = vpop.permute.xlu0 %4037  ;;  %v3727_v60 = vsel %vm1239_vm4, %v3724_v39, %v3726_v10  ;;  %v3730_v63 = vsel %vm1239_vm4, %v3726_v10, %v3720_v31 }
 0x243   : > { %v3731_v11 = vmul.f32 %v3730_v63, %v11740_v29  ;;  %v3734_v15 = vmul.f32 %v3727_v60, %v11736_v28  ;;  %v4047_v36 = vsel %vm1876_vm5, %v4038_v57, %v4040_v12 }
 0x245   : > { %3741 = vmatpush1.msra.mxu0 %v3731_v11  ;;  %3811 = vmatprep.subr.mxu1 %v3734_v15  ;;  %v4042_v25 = vpop.permute.xlu1 %4041 }
 0x246   : > { %v4207_v32 = vpop.permute.xlu0 %4206  ;;  %v4046_v30 = vsel %vm1876_vm5, %v4040_v12, %v4042_v25  ;;  %11058 = vmatmul.mubr.msk.f32.vlgmr.msra.gmra.mrb[4].mxu0 %vm313_vm2, %v11057_v17  ;;  %3812 = vmatpush1.msra.mxu1 %v3733_v22 }
 0x247   : > { %3891 = vmatprep.subr.mxu0 %v11994_v61  ;;  %11059 = vmatmul.mubr.msk.f32.vlgmr.msra.gmra.mrb[4].mxu1 %vm313_vm2, %v11057_v17  ;;  %v4050_v31 = vmul.f32 %v4046_v30, %v11789_v54 }
 0x248   : > { %3892 = vmatpush1.msra.mxu0 %v11984_v13  ;;  %3962 = vmatprep.subr.mxu1 %v12000_v7  ;;  %v4049_v7 = vmul.f32 %v4047_v36, %v11801_v59  ;;  %v11066_v36 = vld [vmem:[%s13060_s2 + $0x78] sm:$0xff] }
 0x249   : > { %3963 = vmatpush1.msra.mxu1 %v11988_v14  ;;  %4058 = vmatprep.subr.mxu0 %v4050_v31  ;;  %v4044_v35 = vpop.permute.xlu1 %4043  ;;  %v11060_v14 = vld [vmem:[%s13060_s2 + $0x68] sm:$0xff] }
 0x24a   : > { %v4205_v39 = vpop.permute.xlu0 %4204  ;;  %v4048_v41 = vsel %vm1876_vm5, %v4044_v35, %v4038_v57  ;;  %3955 = vmatprep.mubr.f32.mxu0 %v11464_v0  ;;  %4026 = vmatprep.mubr.f32.mxu1 %v11464_v0  ;;  %v4045_v13 = vsel %vm1876_vm5, %v4042_v25, %v4044_v35  ;;  %v11063_v57 = vld [vmem:[%s13060_s2 + $0x70] sm:$0xff] }
 0x24b   : > { %v4052_v61 = vmul.f32 %v4048_v41, %v11796_v58  ;;  %v4051_v43 = vmul.f32 %v4045_v13, %v11813_v6  ;;  %v4214_v12 = vsel %vm2211_vm6, %v4205_v39, %v4207_v32 }
 0x24c   : > { %v4216_v60 = vmul.f32 %v4214_v12, %v11850_v1 }
 0x24d   : > { %4129 = vmatprep.subr.mxu1 %v4052_v61  ;;  %v4209_v42 = vpop.permute.xlu1 %4208 }
 0x24e   : > { %v4374_v44 = vpop.permute.xlu0 %4373  ;;  %v4213_v45 = vsel %vm2211_vm6, %v4207_v32, %v4209_v42  ;;  %11061 = vmatmul.mubr.msk.f32.vlgmr.msra.gmra.mrb[4].mxu0 %vm313_vm2, %v11060_v14 }
 0x24f   : > { %4059 = vmatpush1.msra.mxu0 %v4049_v7  ;;  %11062 = vmatmul.mubr.msk.f32.vlgmr.msra.gmra.mrb[4].mxu1 %vm313_vm2, %v11060_v14  ;;  %v4217_v8 = vmul.f32 %v4213_v45, %v11838_v3 }
 0x250   : > { %4130 = vmatpush1.msra.mxu1 %v4051_v43  ;;  %4122 = vmatprep.mubr.f32.mxu0 %v11464_v0 }
 0x251   : > { %4225 = vmatprep.subr.mxu0 %v4217_v8  ;;  %v4211_v47 = vpop.permute.xlu1 %4210  ;;  %4193 = vmatprep.mubr.f32.mxu1 %v11464_v0  ;;  %v11069_v8 = vld [vmem:[%s13060_s2 + $0x80] sm:$0xff] }
 0x252   : > { %v4215_v51 = vsel %vm2211_vm6, %v4211_v47, %v4205_v39  ;;  %v4372_v48 = vpop.permute.xlu0 %4371  ;;  %v4212_v52 = vsel %vm2211_vm6, %v4209_v42, %v4211_v47 }
 0x253   : > { %v4219_v10 = vmul.f32 %v4215_v51, %v11846_v27  ;;  %v4218_v11 = vmul.f32 %v4212_v52, %v11861_v34  ;;  %v4381_v32 = vsel %vm2546_vm7, %v4372_v48, %v4374_v44  ;;  %v11449_v51 = vld [vmem:[%s11520_s24 + $0x18] sm:$0xff]  ;;  %v11451_v52 = vld [vmem:[%s11520_s24 + $0x10] sm:$0xff] }
 0x254   : > { %v4383_v39 = vmul.f32 %v4381_v32, %v11893_v50 }
 0x255   : > { %4296 = vmatprep.subr.mxu1 %v4219_v10  ;;  %v4376_v63 = vpop.permute.xlu1 %4375 }
 0x256   : > { %v4380_v15 = vsel %vm2546_vm7, %v4374_v44, %v4376_v63  ;;  %11064 = vmatmul.mubr.msk.f32.vlgmr.msra.gmra.mrb[4].mxu0 %vm313_vm2, %v11063_v57  ;;  %v4541_v22 = vpop.permute.xlu0 %4540 }
 0x257   : > { %4226 = vmatpush1.msra.mxu0 %v4216_v60  ;;  %11065 = vmatmul.mubr.msk.f32.vlgmr.msra.gmra.mrb[4].mxu1 %vm313_vm2, %v11063_v57  ;;  %v4384_v17 = vmul.f32 %v4380_v15, %v11882_v46 }
 0x258   : > { %4297 = vmatpush1.msra.mxu1 %v4218_v11  ;;  %4289 = vmatprep.mubr.f32.mxu0 %v11464_v0 }
 0x259   : > { %4392 = vmatprep.subr.mxu0 %v4384_v17  ;;  %v4378_v25 = vpop.permute.xlu1 %4377  ;;  %4360 = vmatprep.mubr.f32.mxu1 %v11464_v0 }
 0x25a   : > { %v4382_v30 = vsel %vm2546_vm7, %v4378_v25, %v4372_v48  ;;  %v4379_v31 = vsel %vm2546_vm7, %v4376_v63, %v4378_v25  ;;  %v4539_v14 = vpop.permute.xlu0 %4538  ;;  %v4724_v48 = vld [vmem:[%s13061_s3] sm:$0xff] }
 0x25b   : > { %v4386_v35 = vmul.f32 %v4382_v30, %v11889_v49  ;;  %v4385_v13 = vmul.f32 %v4379_v31, %v11903_v56  ;;  %v4548_v43 = vsel %vm2881_vm8, %v4539_v14, %v4541_v22 }
 0x25c   : > { %v4550_v47 = vmul.f32 %v11944_v23, %v4548_v43  ;;  %v11072_v23 = vld [vmem:[%s13060_s2 + $0x88] sm:$0xff] }
 0x25d   : > { %4463 = vmatprep.subr.mxu1 %v4386_v35  ;;  %v4543_v41 = vpop.permute.xlu1 %4542 }
 0x25e   : > { %v4547_v61 = vsel %vm2881_vm8, %v4541_v22, %v4543_v41  ;;  %11067 = vmatmul.mubr.msk.f32.vlgmr.msra.gmra.mrb[4].mxu0 %vm313_vm2, %v11066_v36 }
 0x25f   : > { %4393 = vmatpush1.msra.mxu0 %v4383_v39  ;;  %11068 = vmatmul.mubr.msk.f32.vlgmr.msra.gmra.mrb[4].mxu1 %vm313_vm2, %v11066_v36  ;;  %v4551_v7 = vmul.f32 %v11928_v16, %v4547_v61 }
 0x260   : > { %4464 = vmatpush1.msra.mxu1 %v4385_v13  ;;  %4456 = vmatprep.mubr.f32.mxu0 %v11464_v0 }
 0x261   : > { %4559 = vmatprep.subr.mxu0 %v4551_v7  ;;  %v4545_v42 = vpop.permute.xlu1 %4544  ;;  %4527 = vmatprep.mubr.f32.mxu1 %v11464_v0 }
 0x262   : > { %v4549_v44 = vsel %vm2881_vm8, %v4545_v42, %v4539_v14  ;;  %v4546_v45 = vsel %vm2881_vm8, %v4543_v41, %v4545_v42 }
 0x263   : > { %v4553_v16 = vmul.f32 %v11939_v4, %v4549_v44  ;;  %v4552_v12 = vmul.f32 %v11953_v2, %v4546_v45  ;;  %v11448_v4 = vld [vmem:[%s11520_s24 + $0x8] sm:$0xff]  ;;  %v11450_v2 = vld [vmem:[%s11520_s24] sm:$0xff] }
 0x265   : > { %4630 = vmatprep.subr.mxu1 %v4553_v16 }
 0x266   : > { %11070 = vmatmul.mubr.msk.f32.vlgmr.msra.gmra.mrb[4].mxu0 %vm313_vm2, %v11069_v8 }
 0x267   : > { %4560 = vmatpush1.msra.mxu0 %v4550_v47  ;;  %11071 = vmatmul.mubr.msk.f32.vlgmr.msra.gmra.mrb[4].mxu1 %vm313_vm2, %v11069_v8 }
 0x268   : > { %4631 = vmatpush1.msra.mxu1 %v4552_v12  ;;  %4623 = vmatprep.mubr.f32.mxu0 %v11464_v0 }
 0x269   : > { %4694 = vmatprep.mubr.f32.mxu1 %v11464_v0  ;;  %4728 = vmatprep.subr.mxu0 %v11448_v4 }
 0x26a   : > { %4799 = vmatprep.subr.mxu1 %v11449_v51 }
 0x26b   : > { %v4710_v10 = vpop.permute.xlu0 %4709 }
 0x26e   : > { %11073 = vmatmul.mubr.msk.f32.vlgmr.msra.gmra.mrb[4].mxu0 %vm313_vm2, %v11072_v23 }
 0x26f   : > { %11074 = vmatmul.mubr.msk.f32.vlgmr.msra.gmra.mrb[4].mxu1 %vm313_vm2, %v11072_v23  ;;  %4729 = vmatpush1.msra.mxu0 %v11450_v2 }
 0x270   : > { %4792 = vmatprep.mubr.f32.mxu0 %v11464_v0  ;;  %4800 = vmatpush1.msra.mxu1 %v11451_v52 }
 0x271   : > { %4863 = vmatprep.mubr.f32.mxu1 %v11464_v0 }
 0x272   : > { %11076 = vmatmul.mubr.msk.f32.vlgmr.msra.gmra.mrb[6].mxu0 %vm313_vm2, %v4724_v48  ;;  %v4879_v42 = vpop.permute.xlu1 %4878 }
 0x273   : > { %11077 = vmatmul.mubr.msk.f32.vlgmr.msra.gmra.mrb[6].mxu1 %vm313_vm2, %v4724_v48  ;;  %4998 = vmatprep.mubr.f32.mxu0 %v11464_v0 }
 0x274   : > { %5069 = vmatprep.mubr.f32.mxu1 %v11464_v0 }
 0x341   : > { %v4625_v57 = vpop.f32.mrb[4].mxu0 }
 0x342   : > { %v4712_v60 = vadd.f32 %v4710_v10, %v4625_v57  ;;  %v4627_v63 = vpop.f32.mrb[5].mxu0  ;;  %v4696_v11 = vpop.f32.mrb[4].mxu1 }
 0x343   : > { %v4713_v15 = vadd.f32 %v4710_v10, %v4627_v63  ;;  %v4714_v17 = vadd.f32 %v4710_v10, %v4696_v11  ;;  %v4698_v22 = vpop.f32.mrb[5].mxu1  ;;  %v11133_v11 = vld [vmem:[%s13062_s4 + $0x18] sm:$0xff] }
 0x344   : > { %v4716_v25 = vmul.f32 0.1, %v4712_v60  ;;  %v4715_v32 = vadd.f32 %v4710_v10, %v4698_v22 }
 0x345   : > { %v4717_v30 = vmul.f32 0.1, %v4713_v15  ;;  %v4718_v31 = vmul.f32 0.1, %v4714_v17  ;;  %v4794_v35 = vpop.f32.mrb[6].mxu0 }
 0x346   : > { %v4719_v36 = vmul.f32 0.1, %v4715_v32  ;;  %v4720_v39 = vmax.f32 %v4712_v60, %v4716_v25  ;;  %v4796_v41 = vpop.f32.mrb[7].mxu0  ;;  %v4865_v13 = vpop.f32.mrb[6].mxu1 }
 0x347   : > { %v4721_v61 = vmax.f32 %v4713_v15, %v4717_v30  ;;  %v4722_v14 = vmax.f32 %v4714_v17, %v4718_v31  ;;  %v4867_v7 = vpop.f32.mrb[7].mxu1 }
 0x348   : > { %v4870_v43 = vadd.f32 %v4794_v35, %v4720_v39  ;;  %v4723_v44 = vmax.f32 %v4715_v32, %v4719_v36 }
 0x349   : > { %v4871_v45 = vadd.f32 %v4796_v41, %v4721_v61  ;;  %v4872_v16 = vadd.f32 %v4865_v13, %v4722_v14  ;;  %v11081_v13 = vld [vmem:[%s13060_s2 + $0x98] sm:$0xff] }
 0x34a   : > { %v4873_v8 = vadd.f32 %v4867_v7, %v4723_v44  ;;  %v4881_v47 = vadd.f32 %v4879_v42, %v4870_v43 }
 0x34b   : > { %v4882_v12 = vadd.f32 %v4879_v42, %v4871_v45  ;;  %v4883_v4 = vadd.f32 %v4879_v42, %v4872_v16 }
 0x34c   : > { %v4884_v51 = vadd.f32 %v4879_v42, %v4873_v8  ;;  %v4885_v23 = vmul.f32 0.2, %v4881_v47 }
 0x34d   : > { %v4886_v2 = vmul.f32 0.2, %v4882_v12  ;;  %v4887_v48 = vmul.f32 0.2, %v4883_v4 }
 0x34e   : > { %v12238_v52 = vmax.f32 %v4881_v47, %v4885_v23  ;;  %v4888_v10 = vmul.f32 0.2, %v4884_v51 }
 0x34f   : > { %v12240_v57 = vmax.f32 %v4882_v12, %v4886_v2  ;;  %v12246_v60 = vmax.f32 %v4883_v4, %v4887_v48 }
 0x350   : > { %4913 = vrot.lane.b32.xlu0 %v12238_v52, %s11465_s25  ;;  %v12248_v63 = vmax.f32 %v4884_v51, %v4888_v10  ;;  %v11079_v51 = vld [vmem:[%s13060_s2 + $0x90] sm:$0xff] }
 0x351   : > { %4915 = vrot.lane.b32.xlu1 %v12240_v57, %s11465_s25 }
 0x354   : > { %4917 = vrot.lane.b32.xlu0 %v12246_v60, %s11465_s25 }
 0x355   : > { %4919 = vrot.lane.b32.xlu1 %v12248_v63, %s11465_s25 }
 0x358   : > { %4893 = vrot.lane.b32.xlu0 %v12238_v52, %s11466_s26 }
 0x359   : > { %4895 = vrot.lane.b32.xlu1 %v12240_v57, %s11466_s26 }
 0x35c   : > { %4897 = vrot.lane.b32.xlu0 %v12246_v60, %s11466_s26 }
 0x35d   : > { %4899 = vrot.lane.b32.xlu1 %v12248_v63, %s11466_s26 }
 0x360   : > { %5513 = vrot.lane.b32.xlu0 %v12238_v52, %s11467_s27 }
 0x361   : > { %5515 = vrot.lane.b32.xlu1 %v12240_v57, %s11467_s27 }
 0x364   : > { %5517 = vrot.lane.b32.xlu0 %v12246_v60, %s11467_s27 }
 0x365   : > { %5519 = vrot.lane.b32.xlu1 %v12248_v63, %s11467_s27 }
 0x368   : > { %5831 = vrot.lane.b32.xlu0 %v12238_v52, %s11468_s28 }
 0x369   : > { %5833 = vrot.lane.b32.xlu1 %v12240_v57, %s11468_s28 }
 0x36c   : > { %5835 = vrot.lane.b32.xlu0 %v12246_v60, %s11468_s28 }
 0x36d   : > { %5837 = vrot.lane.b32.xlu1 %v12248_v63, %s11468_s28 }
 0x370   : > { %6453 = vrot.lane.b32.xlu0 %v12240_v57, %s11469_s29 }
 0x371   : > { %6455 = vrot.lane.b32.xlu1 %v12246_v60, %s11469_s29 }
 0x374   : > { %6451 = vrot.lane.b32.xlu0 %v12238_v52, %s11469_s29 }
 0x375   : > { %6457 = vrot.lane.b32.xlu1 %v12248_v63, %s11469_s29 }
 0x378   : > { %6771 = vrot.lane.b32.xlu0 %v12240_v57, %s11470_s30 }
 0x379   : > { %6773 = vrot.lane.b32.xlu1 %v12246_v60, %s11470_s30 }
 0x37c   : > { %6769 = vrot.lane.b32.xlu0 %v12238_v52, %s11470_s30 }
 0x37d   : > { %6775 = vrot.lane.b32.xlu1 %v12248_v63, %s11470_s30 }
 0x380   : > { %7089 = vrot.lane.b32.xlu0 %v12240_v57, %s11471_s6 }
 0x381   : > { %7091 = vrot.lane.b32.xlu1 %v12246_v60, %s11471_s6 }
 0x384   : > { %7087 = vrot.lane.b32.xlu0 %v12238_v52, %s11471_s6 }
 0x385   : > { %7093 = vrot.lane.b32.xlu1 %v12248_v63, %s11471_s6 }
 0x388   : > { %7407 = vrot.lane.b32.xlu0 %v12240_v57, %s11472_s7 }
 0x389   : > { %7409 = vrot.lane.b32.xlu1 %v12246_v60, %s11472_s7 }
 0x38c   : > { %7405 = vrot.lane.b32.xlu0 %v12238_v52, %s11472_s7 }
 0x38d   : > { %7411 = vrot.lane.b32.xlu1 %v12248_v63, %s11472_s7 }
 0x390   : > { %7727 = vperm.xlu0 %11446, %v11133_v11  }
 0x3c2   : > { %v4914_v15 = vpop.permute.xlu0 %4913 }
 0x3c3   : > { %v4916_v17 = vpop.permute.xlu1 %4915 }
 0x3c4   : > { %v4923_v22 = vsel %vm286_vm0, %v4914_v15, %v4916_v17 }
 0x3c5   : > { %v4926_v25 = vmul.f32 %v4923_v22, %v11632_v19 }
 0x3c6   : > { %v4918_v32 = vpop.permute.xlu0 %4917 }
 0x3c7   : > { %v4922_v30 = vsel %vm286_vm0, %v4916_v17, %v4918_v32  ;;  %v4920_v31 = vpop.permute.xlu1 %4919  ;;  %4934 = vmatprep.subr.mxu0 %v4926_v25 }
 0x3c8   : > { %v4921_v35 = vsel %vm286_vm0, %v4918_v32, %v4920_v31  ;;  %v4924_v36 = vsel %vm286_vm0, %v4920_v31, %v4914_v15  ;;  %v4927_v61 = vmul.f32 %v4922_v30, %v11638_v21  ;;  %v11086_v15 = vld [vmem:[%s13060_s2 + $0x170] sm:$0xff] }
 0x3c9   : > { %v4925_v39 = vmul.f32 %v4924_v36, %v11635_v20  ;;  %v4928_v41 = vmul.f32 %v4921_v35, %v11629_v18 }
 0x3ca   : > { %v4894_v14 = vpop.permute.xlu0 %4893 }
 0x3cb   : > { %v4896_v7 = vpop.permute.xlu1 %4895  ;;  %4935 = vmatpush1.msra.mxu0 %v4925_v39  ;;  %5005 = vmatprep.subr.mxu1 %v4928_v41 }
 0x3cc   : > { %v4903_v42 = vsel %vm250_vm1, %v4894_v14, %v4896_v7  ;;  %11082 = vmatmul.mubr.msk.f32.vlgmr.msra.gmra.mrb[8].mxu0 %vm313_vm2, %v11081_v13  ;;  %5006 = vmatpush1.msra.mxu1 %v4927_v61 }
 0x3cd   : > { %v4906_v43 = vmul.f32 %v4903_v42, %v11642_v24  ;;  %11083 = vmatmul.mubr.msk.f32.vlgmr.msra.gmra.mrb[8].mxu1 %vm313_vm2, %v11081_v13  ;;  %5143 = vmatprep.mubr.f32.mxu0 %v11464_v0 }
 0x3ce   : > { %v4898_v44 = vpop.permute.xlu0 %4897  ;;  %5214 = vmatprep.mubr.f32.mxu1 %v11464_v0 }
 0x3cf   : > { %v4902_v45 = vsel %vm250_vm1, %v4896_v7, %v4898_v44  ;;  %v4900_v16 = vpop.permute.xlu1 %4899  ;;  %5079 = vmatprep.subr.mxu0 %v4906_v43 }
 0x3d0   : > { %v4901_v8 = vsel %vm250_vm1, %v4898_v44, %v4900_v16  ;;  %v4904_v47 = vsel %vm250_vm1, %v4900_v16, %v4894_v14  ;;  %v4907_v23 = vmul.f32 %v4902_v45, %v11667_v38 }
 0x3d1   : > { %v4905_v12 = vmul.f32 %v4904_v47, %v11662_v37  ;;  %v4908_v4 = vmul.f32 %v4901_v8, %v11671_v40 }
 0x3d2   : > { %v5514_v2 = vpop.permute.xlu0 %5513 }
 0x3d3   : > { %v5516_v48 = vpop.permute.xlu1 %5515  ;;  %5080 = vmatpush1.msra.mxu0 %v4905_v12  ;;  %5150 = vmatprep.subr.mxu1 %v4908_v4 }
 0x3d4   : > { %11084 = vmatmul.mubr.msk.f32.vlgmr.msra.gmra.mrb[8].mxu0 %vm313_vm2, %v11079_v51  ;;  %5151 = vmatpush1.msra.mxu1 %v4907_v23  ;;  %v5523_v10 = vsel %vm904_vm3, %v5514_v2, %v5516_v48 }
 0x3d5   : > { %5226 = vmatprep.subr.mxu0 %v4926_v25  ;;  %11085 = vmatmul.mubr.msk.f32.vlgmr.msra.gmra.mrb[8].mxu1 %vm313_vm2, %v11079_v51  ;;  %v5526_v25 = vmul.f32 %v5523_v10, %v11690_v53  ;;  %v11094_v51 = vld [vmem:[%s13060_s2 + $0x178] sm:$0xff] }
 0x3d6   : > { %5227 = vmatpush1.msra.mxu0 %v4925_v39  ;;  %5297 = vmatprep.subr.mxu1 %v4928_v41  ;;  %v5518_v11 = vpop.permute.xlu0 %5517  ;;  %v11080_v41 = vld [vmem:[%s13060_s2 + $0x168] sm:$0xff] }
 0x3d7   : > { %5298 = vmatpush1.msra.mxu1 %v4927_v61  ;;  %5371 = vmatprep.subr.mxu0 %v4906_v43  ;;  %v5520_v17 = vpop.permute.xlu1 %5519  ;;  %v5522_v36 = vsel %vm904_vm3, %v5516_v48, %v5518_v11  ;;  %v11091_v43 = vld [vmem:[%s13060_s2 + $0xa0] sm:$0xff] }
 0x3d8   : > { %v5521_v22 = vsel %vm904_vm3, %v5518_v11, %v5520_v17  ;;  %5290 = vmatprep.mubr.f32.mxu0 %v11464_v0  ;;  %5442 = vmatprep.subr.mxu1 %v4908_v4  ;;  %v5524_v35 = vsel %vm904_vm3, %v5520_v17, %v5514_v2  ;;  %v5527_v14 = vmul.f32 %v5522_v36, %v11716_v5  ;;  %v11097_v11 = vld [vmem:[%s13060_s2 + $0xa8] sm:$0xff]  ;;  %v11100_v17 = vld [vmem:[%s13060_s2 + $0x180] sm:$0xff] }
 0x3d9   : > { %v5528_v32 = vmul.f32 %v5521_v22, %v11697_v55  ;;  %11087 = vmatmul.mubr.msk.f32.vlgmr.msra.gmra.mrb[2].mxu0 %vm313_vm2, %v11086_v15  ;;  %5361 = vmatprep.mubr.f32.mxu1 %v11464_v0  ;;  %v5525_v61 = vmul.f32 %v5524_v35, %v11711_v62 }
 0x3da   : > { %5372 = vmatpush1.msra.mxu0 %v4905_v12  ;;  %11088 = vmatmul.mubr.msk.f32.vlgmr.msra.gmra.mrb[2].mxu1 %vm313_vm2, %v11086_v15  ;;  %v5832_v30 = vpop.permute.xlu0 %5831 }
 0x3db   : > { %5443 = vmatpush1.msra.mxu1 %v4907_v23  ;;  %5534 = vmatprep.subr.mxu0 %v5526_v25  ;;  %v5834_v31 = vpop.permute.xlu1 %5833 }
 0x3dc   : > { %5605 = vmatprep.subr.mxu1 %v5528_v32  ;;  %5435 = vmatprep.mubr.f32.mxu0 %v11464_v0  ;;  %v5841_v7 = vsel %vm1239_vm4, %v5832_v30, %v5834_v31 }
 0x3dd   : > { %5506 = vmatprep.mubr.f32.mxu1 %v11464_v0  ;;  %v5844_v16 = vmul.f32 %v5841_v7, %v11730_v26 }
 0x3de   : > { %v5836_v39 = vpop.permute.xlu0 %5835 }
 0x3df   : > { %v5838_v13 = vpop.permute.xlu1 %5837  ;;  %v5840_v47 = vsel %vm1239_vm4, %v5834_v31, %v5836_v39 }
 0x3e0   : > { %v5839_v44 = vsel %vm1239_vm4, %v5836_v39, %v5838_v13  ;;  %v5842_v8 = vsel %vm1239_vm4, %v5838_v13, %v5832_v30  ;;  %v5845_v48 = vmul.f32 %v5840_v47, %v11750_v33  ;;  %v11103_v30 = vld [vmem:[%s13060_s2 + $0xb0] sm:$0xff] }
 0x3e1   : > { %11089 = vmatmul.mubr.msk.f32.vlgmr.msra.gmra.mrb[2].mxu0 %vm313_vm2, %v11080_v41  ;;  %v5846_v12 = vmul.f32 %v5839_v44, %v11736_v28  ;;  %v5843_v2 = vmul.f32 %v5842_v8, %v11740_v29  ;;  %v11109_v44 = vld [vmem:[%s13060_s2 + $0xb8] sm:$0xff] }
 0x3e2   : > { %5535 = vmatpush1.msra.mxu0 %v5525_v61  ;;  %11090 = vmatmul.mubr.msk.f32.vlgmr.msra.gmra.mrb[2].mxu1 %vm313_vm2, %v11080_v41  ;;  %v6454_v42 = vpop.permute.xlu0 %6453 }
 0x3e3   : > { %5606 = vmatpush1.msra.mxu1 %v5527_v14  ;;  %5685 = vmatprep.subr.mxu0 %v5526_v25  ;;  %v6456_v45 = vpop.permute.xlu1 %6455 }
 0x3e4   : > { %5756 = vmatprep.subr.mxu1 %v5528_v32  ;;  %5598 = vmatprep.mubr.f32.mxu0 %v11464_v0  ;;  %v6460_v32 = vsel %vm1876_vm5, %v6454_v42, %v6456_v45 }
 0x3e5   : > { %11092 = vmatmul.mubr.msk.f32.vlgmr.msra.gmra.mrb[8].mxu0 %vm313_vm2, %v11091_v43  ;;  %5669 = vmatprep.mubr.f32.mxu1 %v11464_v0  ;;  %v6464_v35 = vmul.f32 %v6460_v32, %v11789_v54 }
 0x3e6   : > { %5686 = vmatpush1.msra.mxu0 %v5525_v61  ;;  %11093 = vmatmul.mubr.msk.f32.vlgmr.msra.gmra.mrb[8].mxu1 %vm313_vm2, %v11091_v43  ;;  %v6452_v4 = vpop.permute.xlu0 %6451 }
 0x3e7   : > { %5757 = vmatpush1.msra.mxu1 %v5527_v14  ;;  %5852 = vmatprep.subr.mxu0 %v5844_v16  ;;  %v6458_v23 = vpop.permute.xlu1 %6457  ;;  %v6461_v36 = vsel %vm1876_vm5, %v6452_v4, %v6454_v42  ;;  %v11106_v14 = vld [vmem:[%s13060_s2 + $0x188] sm:$0xff] }
 0x3e8   : > { %5923 = vmatprep.subr.mxu1 %v5846_v12  ;;  %5749 = vmatprep.mubr.f32.mxu0 %v11464_v0  ;;  %v6462_v31 = vsel %vm1876_vm5, %v6458_v23, %v6452_v4  ;;  %v6459_v39 = vsel %vm1876_vm5, %v6456_v45, %v6458_v23  ;;  %v6463_v7 = vmul.f32 %v6461_v36, %v11801_v59  ;;  %v11112_v23 = vld [vmem:[%s13060_s2 + $0x190] sm:$0xff] }
 0x3e9   : > { %11095 = vmatmul.mubr.msk.f32.vlgmr.msra.gmra.mrb[2].mxu0 %vm313_vm2, %v11094_v51  ;;  %5820 = vmatprep.mubr.f32.mxu1 %v11464_v0  ;;  %v6466_v41 = vmul.f32 %v6462_v31, %v11796_v58  ;;  %v6465_v42 = vmul.f32 %v6459_v39, %v11813_v6 }
 0x3ea   : > { %5853 = vmatpush1.msra.mxu0 %v5843_v2  ;;  %11096 = vmatmul.mubr.msk.f32.vlgmr.msra.gmra.mrb[2].mxu1 %vm313_vm2, %v11094_v51  ;;  %v6772_v10 = vpop.permute.xlu0 %6771 }
 0x3eb   : > { %5924 = vmatpush1.msra.mxu1 %v5845_v48  ;;  %6003 = vmatprep.subr.mxu0 %v5844_v16  ;;  %v6774_v15 = vpop.permute.xlu1 %6773 }
 0x3ec   : > { %6074 = vmatprep.subr.mxu1 %v5846_v12  ;;  %5916 = vmatprep.mubr.f32.mxu0 %v11464_v0  ;;  %v6778_v43 = vsel %vm2211_vm6, %v6772_v10, %v6774_v15 }
 0x3ed   : > { %11098 = vmatmul.mubr.msk.f32.vlgmr.msra.gmra.mrb[8].mxu0 %vm313_vm2, %v11097_v11  ;;  %5987 = vmatprep.mubr.f32.mxu1 %v11464_v0  ;;  %v6782_v47 = vmul.f32 %v6778_v43, %v11838_v3 }
 0x3ee   : > { %6004 = vmatpush1.msra.mxu0 %v5843_v2  ;;  %11099 = vmatmul.mubr.msk.f32.vlgmr.msra.gmra.mrb[8].mxu1 %vm313_vm2, %v11097_v11  ;;  %v6770_v22 = vpop.permute.xlu0 %6769 }
 0x3ef   : > { %6075 = vmatpush1.msra.mxu1 %v5845_v48  ;;  %6154 = vmatprep.subr.mxu0 %v12240_v57  ;;  %v6776_v25 = vpop.permute.xlu1 %6775  ;;  %v6779_v12 = vsel %vm2211_vm6, %v6770_v22, %v6772_v10 }
 0x3f0   : > { %6225 = vmatprep.subr.mxu1 %v12248_v63  ;;  %6067 = vmatprep.mubr.f32.mxu0 %v11464_v0  ;;  %v6780_v45 = vsel %vm2211_vm6, %v6776_v25, %v6770_v22  ;;  %v6777_v4 = vsel %vm2211_vm6, %v6774_v15, %v6776_v25  ;;  %v6781_v2 = vmul.f32 %v6779_v12, %v11850_v1  ;;  %v12534_v12 = vld [vmem:[%s13059_s1 + $0x20] ss:$0 sm:$0xff] }
 0x3f1   : > { %11101 = vmatmul.mubr.msk.f32.vlgmr.msra.gmra.mrb[2].mxu0 %vm313_vm2, %v11100_v17  ;;  %6138 = vmatprep.mubr.f32.mxu1 %v11464_v0  ;;  %v6784_v51 = vmul.f32 %v6780_v45, %v11846_v27  ;;  %v6783_v48 = vmul.f32 %v6777_v4, %v11861_v34 }
 0x3f2   : > { %6155 = vmatpush1.msra.mxu0 %v12238_v52  ;;  %11102 = vmatmul.mubr.msk.f32.vlgmr.msra.gmra.mrb[2].mxu1 %vm313_vm2, %v11100_v17  ;;  %v7090_v13 = vpop.permute.xlu0 %7089  ;;  %v11115_v17 = vld [vmem:[%s13060_s2 + $0xc0] sm:$0xff] }
 0x3f3   : > { %6226 = vmatpush1.msra.mxu1 %v12246_v60  ;;  %6305 = vmatprep.subr.mxu0 %v12240_v57  ;;  %v7092_v61 = vpop.permute.xlu1 %7091 }
 0x3f4   : > { %6376 = vmatprep.subr.mxu1 %v12248_v63  ;;  %6218 = vmatprep.mubr.f32.mxu0 %v11464_v0  ;;  %v7096_v10 = vsel %vm2546_vm7, %v7090_v13, %v7092_v61 }
 0x3f5   : > { %11104 = vmatmul.mubr.msk.f32.vlgmr.msra.gmra.mrb[8].mxu0 %vm313_vm2, %v11103_v30  ;;  %6289 = vmatprep.mubr.f32.mxu1 %v11464_v0  ;;  %v7100_v25 = vmul.f32 %v7096_v10, %v11882_v46 }
 0x3f6   : > { %6306 = vmatpush1.msra.mxu0 %v12238_v52  ;;  %11105 = vmatmul.mubr.msk.f32.vlgmr.msra.gmra.mrb[8].mxu1 %vm313_vm2, %v11103_v30  ;;  %v7088_v16 = vpop.permute.xlu0 %7087 }
 0x3f7   : > { %6377 = vmatpush1.msra.mxu1 %v12246_v60  ;;  %6472 = vmatprep.subr.mxu0 %v6464_v35  ;;  %v7094_v8 = vpop.permute.xlu1 %7093  ;;  %v7097_v32 = vsel %vm2546_vm7, %v7088_v16, %v7090_v13 }
 0x3f8   : > { %6543 = vmatprep.subr.mxu1 %v6466_v41  ;;  %6369 = vmatprep.mubr.f32.mxu0 %v11464_v0  ;;  %v7098_v22 = vsel %vm2546_vm7, %v7094_v8, %v7088_v16  ;;  %v7095_v30 = vsel %vm2546_vm7, %v7092_v61, %v7094_v8  ;;  %v7099_v36 = vmul.f32 %v7097_v32, %v11893_v50  ;;  %v12524_v16 = vld [vmem:[%s13059_s1 + $0x38] ss:$0 sm:$0xff] }
 0x3f9   : > { %11107 = vmatmul.mubr.msk.f32.vlgmr.msra.gmra.mrb[2].mxu0 %vm313_vm2, %v11106_v14  ;;  %6440 = vmatprep.mubr.f32.mxu1 %v11464_v0  ;;  %v7102_v31 = vmul.f32 %v7098_v22, %v11889_v49  ;;  %v7101_v13 = vmul.f32 %v7095_v30, %v11903_v56 }
 0x3fa   : > { %6473 = vmatpush1.msra.mxu0 %v6463_v7  ;;  %11108 = vmatmul.mubr.msk.f32.vlgmr.msra.gmra.mrb[2].mxu1 %vm313_vm2, %v11106_v14  ;;  %v7408_v11 = vpop.permute.xlu0 %7407  ;;  %v11121_v14 = vld [vmem:[%s13060_s2 + $0xc8] sm:$0xff] }
 0x3fb   : > { %6544 = vmatpush1.msra.mxu1 %v6465_v42  ;;  %6623 = vmatprep.subr.mxu0 %v6464_v35  ;;  %v7410_v15 = vpop.permute.xlu1 %7409  ;;  %v11118_v35 = vld [vmem:[%s13060_s2 + $0x198] sm:$0xff] }
 0x3fc   : > { %6694 = vmatprep.subr.mxu1 %v6466_v41  ;;  %6536 = vmatprep.mubr.f32.mxu0 %v11464_v0  ;;  %v7414_v61 = vsel %vm2881_vm8, %v7408_v11, %v7410_v15 }
 0x3fd   : > { %11110 = vmatmul.mubr.msk.f32.vlgmr.msra.gmra.mrb[8].mxu0 %vm313_vm2, %v11109_v44  ;;  %6607 = vmatprep.mubr.f32.mxu1 %v11464_v0 }
 0x3fe   : > { %6624 = vmatpush1.msra.mxu0 %v6463_v7  ;;  %11111 = vmatmul.mubr.msk.f32.vlgmr.msra.gmra.mrb[8].mxu1 %vm313_vm2, %v11109_v44  ;;  %v7406_v39 = vpop.permute.xlu0 %7405 }
 0x3ff   : > { %6695 = vmatpush1.msra.mxu1 %v6465_v42  ;;  %6790 = vmatprep.subr.mxu0 %v6782_v47  ;;  %v7412_v41 = vpop.permute.xlu1 %7411  ;;  %v12512_v42 = vld [vmem:[%s13059_s1 + $0x28] ss:$0 sm:$0xff]  ;;  %v7415_v44 = vsel %vm2881_vm8, %v7406_v39, %v7408_v11 }
 0x400   : > { %6861 = vmatprep.subr.mxu1 %v6784_v51  ;;  %6687 = vmatprep.mubr.f32.mxu0 %v11464_v0  ;;  %v7416_v7 = vsel %vm2881_vm8, %v7412_v41, %v7406_v39  ;;  %v7418_v43 = vmul.f32 %v12512_v42, %v7414_v61  ;;  %v7413_v45 = vsel %vm2881_vm8, %v7410_v15, %v7412_v41 }
 0x401   : > { %11113 = vmatmul.mubr.msk.f32.vlgmr.msra.gmra.mrb[2].mxu0 %vm313_vm2, %v11112_v23  ;;  %6758 = vmatprep.mubr.f32.mxu1 %v11464_v0  ;;  %v7420_v8 = vmul.f32 %v12524_v16, %v7416_v7  ;;  %v7417_v4 = vmul.f32 %v12534_v12, %v7415_v44  ;;  %v11165_v44 = vld [vmem:[%s13062_s4 + $0x28] sm:$0xff] }
 0x402   : > { %6791 = vmatpush1.msra.mxu0 %v6781_v2  ;;  %11114 = vmatmul.mubr.msk.f32.vlgmr.msra.gmra.mrb[2].mxu1 %vm313_vm2, %v11112_v23 }
 0x403   : > { %6862 = vmatpush1.msra.mxu1 %v6783_v48  ;;  %6941 = vmatprep.subr.mxu0 %v6782_v47  ;;  %v11124_v47 = vld [vmem:[%s13060_s2 + $0x1a0] sm:$0xff] }
 0x404   : > { %7012 = vmatprep.subr.mxu1 %v6784_v51  ;;  %6854 = vmatprep.mubr.f32.mxu0 %v11464_v0  ;;  %v12541_v51 = vld [vmem:[%s13059_s1 + $0x30] ss:$0 sm:$0xff] }
 0x405   : > { %11116 = vmatmul.mubr.msk.f32.vlgmr.msra.gmra.mrb[8].mxu0 %vm313_vm2, %v11115_v17  ;;  %6925 = vmatprep.mubr.f32.mxu1 %v11464_v0  ;;  %v7419_v23 = vmul.f32 %v12541_v51, %v7413_v45 }
 0x406   : > { %6942 = vmatpush1.msra.mxu0 %v6781_v2  ;;  %11117 = vmatmul.mubr.msk.f32.vlgmr.msra.gmra.mrb[8].mxu1 %vm313_vm2, %v11115_v17  ;;  %v11127_v2 = vld [vmem:[%s13060_s2 + $0xd0] sm:$0xff] }
 0x407   : > { %7013 = vmatpush1.msra.mxu1 %v6783_v48  ;;  %7108 = vmatprep.subr.mxu0 %v7100_v25  ;;  %v11130_v48 = vld [vmem:[%s13060_s2 + $0x1a8] sm:$0xff] }
 0x408   : > { %7179 = vmatprep.subr.mxu1 %v7102_v31  ;;  %7005 = vmatprep.mubr.f32.mxu0 %v11464_v0 }
 0x409   : > { %11119 = vmatmul.mubr.msk.f32.vlgmr.msra.gmra.mrb[2].mxu0 %vm313_vm2, %v11118_v35  ;;  %7076 = vmatprep.mubr.f32.mxu1 %v11464_v0 }
 0x40a   : > { %7109 = vmatpush1.msra.mxu0 %v7099_v36  ;;  %11120 = vmatmul.mubr.msk.f32.vlgmr.msra.gmra.mrb[2].mxu1 %vm313_vm2, %v11118_v35 }
 0x40b   : > { %7180 = vmatpush1.msra.mxu1 %v7101_v13  ;;  %7259 = vmatprep.subr.mxu0 %v7100_v25 }
 0x40c   : > { %7330 = vmatprep.subr.mxu1 %v7102_v31  ;;  %7172 = vmatprep.mubr.f32.mxu0 %v11464_v0 }
 0x40d   : > { %11122 = vmatmul.mubr.msk.f32.vlgmr.msra.gmra.mrb[8].mxu0 %vm313_vm2, %v11121_v14  ;;  %7243 = vmatprep.mubr.f32.mxu1 %v11464_v0 }
 0x40e   : > { %7260 = vmatpush1.msra.mxu0 %v7099_v36  ;;  %11123 = vmatmul.mubr.msk.f32.vlgmr.msra.gmra.mrb[8].mxu1 %vm313_vm2, %v11121_v14 }
 0x40f   : > { %7331 = vmatpush1.msra.mxu1 %v7101_v13  ;;  %7426 = vmatprep.subr.mxu0 %v7418_v43  ;;  %v7728_v10 = vpop.permute.xlu0 %7727 }
 0x410   : > { %7497 = vmatprep.subr.mxu1 %v7420_v8  ;;  %7323 = vmatprep.mubr.f32.mxu0 %v11464_v0 }
 0x411   : > { %11125 = vmatmul.mubr.msk.f32.vlgmr.msra.gmra.mrb[2].mxu0 %vm313_vm2, %v11124_v47  ;;  %7394 = vmatprep.mubr.f32.mxu1 %v11464_v0 }
 0x412   : > { %7427 = vmatpush1.msra.mxu0 %v7417_v4  ;;  %11126 = vmatmul.mubr.msk.f32.vlgmr.msra.gmra.mrb[2].mxu1 %vm313_vm2, %v11124_v47 }
 0x413   : > { %7498 = vmatpush1.msra.mxu1 %v7419_v23  ;;  %7577 = vmatprep.subr.mxu0 %v7418_v43  ;;  %v11161_v43 = vld [vmem:[%s13062_s4 + $0x20] sm:$0xff] }
 0x414   : > { %7648 = vmatprep.subr.mxu1 %v7420_v8  ;;  %7490 = vmatprep.mubr.f32.mxu0 %v11464_v0 }
 0x415   : > { %11128 = vmatmul.mubr.msk.f32.vlgmr.msra.gmra.mrb[8].mxu0 %vm313_vm2, %v11127_v2  ;;  %7561 = vmatprep.mubr.f32.mxu1 %v11464_v0 }
 0x416   : > { %7578 = vmatpush1.msra.mxu0 %v7417_v4  ;;  %11129 = vmatmul.mubr.msk.f32.vlgmr.msra.gmra.mrb[8].mxu1 %vm313_vm2, %v11127_v2 }
 0x417   : > { %7649 = vmatpush1.msra.mxu1 %v7419_v23  ;;  %7641 = vmatprep.mubr.f32.mxu0 %v11464_v0 }
 0x418   : > { %7712 = vmatprep.mubr.f32.mxu1 %v11464_v0 }
 0x419   : > { %11131 = vmatmul.mubr.msk.f32.vlgmr.msra.gmra.mrb[2].mxu0 %vm313_vm2, %v11130_v48 }
 0x41a   : > { %11132 = vmatmul.mubr.msk.f32.vlgmr.msra.gmra.mrb[2].mxu1 %vm313_vm2, %v11130_v48  ;;  %7845 = vmatprep.mubr.f32.mxu0 %v11464_v0 }
 0x41b   : > { %7916 = vmatprep.mubr.f32.mxu1 %v11464_v0 }
 0x4e8   : > { %v7492_v11 = vpop.f32.mrb[8].mxu0 }
 0x4e9   : > { %v7730_v15 = vadd.f32 %v7728_v10, %v7492_v11  ;;  %v7494_v17 = vpop.f32.mrb[9].mxu0  ;;  %v7563_v22 = vpop.f32.mrb[8].mxu1 }
 0x4ea   : > { %v7731_v25 = vadd.f32 %v7728_v10, %v7494_v17  ;;  %v7732_v32 = vadd.f32 %v7728_v10, %v7563_v22  ;;  %v7565_v30 = vpop.f32.mrb[9].mxu1  ;;  %v11135_v22 = vld [vmem:[%s13060_s2 + $0xe0] sm:$0xff] }
 0x4eb   : > { %v7734_v31 = vmul.f32 0.1, %v7730_v15  ;;  %v7733_v35 = vadd.f32 %v7728_v10, %v7565_v30 }
 0x4ec   : > { %v7735_v36 = vmul.f32 0.1, %v7731_v25  ;;  %v7736_v41 = vmul.f32 0.1, %v7732_v32 }
 0x4ed   : > { %v12563_v39 = vmax.f32 %v7730_v15, %v7734_v31  ;;  %v7737_v61 = vmul.f32 0.1, %v7733_v35 }
 0x4ee   : > { %v12565_v13 = vmax.f32 %v7731_v25, %v7735_v36  ;;  %v12571_v14 = vmax.f32 %v7732_v32, %v7736_v41 }
 0x4ef   : > { %7760 = vrot.lane.b32.xlu1 %v12563_v39, %s11465_s25  ;;  %v12573_v7 = vmax.f32 %v7733_v35, %v7737_v61 }
 0x4f0   : > { %7762 = vrot.lane.b32.xlu0 %v12565_v13, %s11465_s25 }
 0x4f3   : > { %7764 = vrot.lane.b32.xlu1 %v12571_v14, %s11465_s25 }
 0x4f4   : > { %7766 = vrot.lane.b32.xlu0 %v12573_v7, %s11465_s25 }
 0x4f7   : > { %7742 = vrot.lane.b32.xlu1 %v12563_v39, %s11466_s26 }
 0x4f8   : > { %7744 = vrot.lane.b32.xlu0 %v12565_v13, %s11466_s26 }
 0x4fb   : > { %7746 = vrot.lane.b32.xlu1 %v12571_v14, %s11466_s26 }
 0x4fc   : > { %7748 = vrot.lane.b32.xlu0 %v12573_v7, %s11466_s26 }
 0x4ff   : > { %8068 = vrot.lane.b32.xlu1 %v12563_v39, %s11467_s27 }
 0x500   : > { %8070 = vrot.lane.b32.xlu0 %v12565_v13, %s11467_s27 }
 0x503   : > { %8072 = vrot.lane.b32.xlu1 %v12571_v14, %s11467_s27 }
 0x504   : > { %8074 = vrot.lane.b32.xlu0 %v12573_v7, %s11467_s27 }
 0x507   : > { %8235 = vrot.lane.b32.xlu1 %v12563_v39, %s11468_s28 }
 0x508   : > { %8237 = vrot.lane.b32.xlu0 %v12565_v13, %s11468_s28 }
 0x50b   : > { %8239 = vrot.lane.b32.xlu1 %v12571_v14, %s11468_s28 }
 0x50c   : > { %8241 = vrot.lane.b32.xlu0 %v12573_v7, %s11468_s28 }
 0x50f   : > { %8555 = vrot.lane.b32.xlu1 %v12565_v13, %s11469_s29 }
 0x510   : > { %8557 = vrot.lane.b32.xlu0 %v12571_v14, %s11469_s29 }
 0x513   : > { %8553 = vrot.lane.b32.xlu1 %v12563_v39, %s11469_s29 }
 0x514   : > { %8559 = vrot.lane.b32.xlu0 %v12573_v7, %s11469_s29 }
 0x517   : > { %8722 = vrot.lane.b32.xlu1 %v12565_v13, %s11470_s30 }
 0x518   : > { %8724 = vrot.lane.b32.xlu0 %v12571_v14, %s11470_s30 }
 0x51b   : > { %8720 = vrot.lane.b32.xlu1 %v12563_v39, %s11470_s30 }
 0x51c   : > { %8726 = vrot.lane.b32.xlu0 %v12573_v7, %s11470_s30 }
 0x51f   : > { %8889 = vrot.lane.b32.xlu1 %v12565_v13, %s11471_s6 }
 0x520   : > { %8891 = vrot.lane.b32.xlu0 %v12571_v14, %s11471_s6 }
 0x523   : > { %8887 = vrot.lane.b32.xlu1 %v12563_v39, %s11471_s6 }
 0x524   : > { %8893 = vrot.lane.b32.xlu0 %v12573_v7, %s11471_s6 }
 0x527   : > { %9056 = vrot.lane.b32.xlu1 %v12565_v13, %s11472_s7 }
 0x528   : > { %9058 = vrot.lane.b32.xlu0 %v12571_v14, %s11472_s7 }
 0x52b   : > { %9054 = vrot.lane.b32.xlu1 %v12563_v39, %s11472_s7 }
 0x52c   : > { %9060 = vrot.lane.b32.xlu0 %v12573_v7, %s11472_s7 }
 0x52f   : > { %9225 = vperm.xlu1 %11447, %v11161_v43  }
 0x530   : > { %9395 = vperm.xlu0 %11446, %v11165_v44  }
 0x561   : > { %v7761_v45 = vpop.permute.xlu1 %7760 }
 0x562   : > { %v7763_v8 = vpop.permute.xlu0 %7762 }
 0x563   : > { %v7770_v47 = vsel %vm286_vm0, %v7761_v45, %v7763_v8 }
 0x564   : > { %v7773_v4 = vmul.f32 %v7770_v47, %v11632_v19  ;;  %v11134_v47 = vld [vmem:[%s13060_s2 + $0xd8] sm:$0xff] }
 0x565   : > { %v7765_v23 = vpop.permute.xlu1 %7764 }
 0x566   : > { %v7769_v2 = vsel %vm286_vm0, %v7763_v8, %v7765_v23  ;;  %v7767_v48 = vpop.permute.xlu0 %7766  ;;  %7781 = vmatprep.subr.mxu0 %v7773_v4 }
 0x567   : > { %v7768_v10 = vsel %vm286_vm0, %v7765_v23, %v7767_v48  ;;  %v7771_v11 = vsel %vm286_vm0, %v7767_v48, %v7761_v45  ;;  %v7774_v25 = vmul.f32 %v7769_v2, %v11638_v21 }
 0x568   : > { %v7772_v15 = vmul.f32 %v7771_v11, %v11635_v20  ;;  %v7775_v17 = vmul.f32 %v7768_v10, %v11629_v18 }
 0x569   : > { %v7743_v32 = vpop.permute.xlu1 %7742 }
 0x56a   : > { %v7745_v30 = vpop.permute.xlu0 %7744  ;;  %7782 = vmatpush1.msra.mxu0 %v7772_v15  ;;  %7852 = vmatprep.subr.mxu1 %v7775_v17 }
 0x56b   : > { %v7752_v31 = vsel %vm250_vm1, %v7743_v32, %v7745_v30  ;;  %11136 = vmatmul.mubr.msk.f32.vlgmr.msra.gmra.mrb[10].mxu0 %vm313_vm2, %v11135_v22  ;;  %7853 = vmatpush1.msra.mxu1 %v7774_v25 }
 0x56c   : > { %v7755_v35 = vmul.f32 %v7752_v31, %v11642_v24  ;;  %11137 = vmatmul.mubr.msk.f32.vlgmr.msra.gmra.mrb[10].mxu1 %vm313_vm2, %v11135_v22  ;;  %7990 = vmatprep.mubr.f32.mxu0 %v11464_v0  ;;  %v11140_v31 = vld [vmem:[%s13060_s2 + $0xe8] sm:$0xff] }
 0x56d   : > { %v7747_v36 = vpop.permute.xlu1 %7746  ;;  %8061 = vmatprep.mubr.f32.mxu1 %v11464_v0 }
 0x56e   : > { %v7751_v41 = vsel %vm250_vm1, %v7745_v30, %v7747_v36  ;;  %v7749_v61 = vpop.permute.xlu0 %7748  ;;  %7926 = vmatprep.subr.mxu0 %v7755_v35 }
 0x56f   : > { %v7750_v43 = vsel %vm250_vm1, %v7747_v36, %v7749_v61  ;;  %v7753_v44 = vsel %vm250_vm1, %v7749_v61, %v7743_v32  ;;  %v7756_v4 = vmul.f32 %v7751_v41, %v11667_v38 }
 0x570   : > { %v7754_v45 = vmul.f32 %v7753_v44, %v11662_v37  ;;  %v7757_v8 = vmul.f32 %v7750_v43, %v11671_v40 }
 0x571   : > { %v8069_v23 = vpop.permute.xlu1 %8068 }
 0x572   : > { %v8071_v2 = vpop.permute.xlu0 %8070  ;;  %7927 = vmatpush1.msra.mxu0 %v7754_v45  ;;  %7997 = vmatprep.subr.mxu1 %v7757_v8 }
 0x573   : > { %v8078_v48 = vsel %vm904_vm3, %v8069_v23, %v8071_v2  ;;  %11138 = vmatmul.mubr.msk.f32.vlgmr.msra.gmra.mrb[10].mxu0 %vm313_vm2, %v11134_v47  ;;  %7998 = vmatpush1.msra.mxu1 %v7756_v4 }
 0x574   : > { %v8081_v10 = vmul.f32 %v8078_v48, %v11690_v53  ;;  %11139 = vmatmul.mubr.msk.f32.vlgmr.msra.gmra.mrb[10].mxu1 %vm313_vm2, %v11134_v47  ;;  %8153 = vmatprep.mubr.f32.mxu0 %v11464_v0  ;;  %v11143_v48 = vld [vmem:[%s13060_s2 + $0xf0] sm:$0xff] }
 0x575   : > { %v8073_v11 = vpop.permute.xlu1 %8072  ;;  %8224 = vmatprep.mubr.f32.mxu1 %v11464_v0 }
 0x576   : > { %v8077_v15 = vsel %vm904_vm3, %v8071_v2, %v8073_v11  ;;  %v8075_v17 = vpop.permute.xlu0 %8074  ;;  %8089 = vmatprep.subr.mxu0 %v8081_v10 }
 0x577   : > { %v8076_v22 = vsel %vm904_vm3, %v8073_v11, %v8075_v17  ;;  %v8079_v25 = vsel %vm904_vm3, %v8075_v17, %v8069_v23  ;;  %v8082_v35 = vmul.f32 %v8077_v15, %v11716_v5 }
 0x578   : > { %v8080_v32 = vmul.f32 %v8079_v25, %v11711_v62  ;;  %v8083_v30 = vmul.f32 %v8076_v22, %v11697_v55 }
 0x579   : > { %v8236_v36 = vpop.permute.xlu1 %8235 }
 0x57a   : > { %v8238_v41 = vpop.permute.xlu0 %8237  ;;  %8090 = vmatpush1.msra.mxu0 %v8080_v32  ;;  %8160 = vmatprep.subr.mxu1 %v8083_v30 }
 0x57b   : > { %v8245_v61 = vsel %vm1239_vm4, %v8236_v36, %v8238_v41  ;;  %11141 = vmatmul.mubr.msk.f32.vlgmr.msra.gmra.mrb[10].mxu0 %vm313_vm2, %v11140_v31  ;;  %8161 = vmatpush1.msra.mxu1 %v8082_v35 }
 0x57c   : > { %v8248_v43 = vmul.f32 %v8245_v61, %v11730_v26  ;;  %11142 = vmatmul.mubr.msk.f32.vlgmr.msra.gmra.mrb[10].mxu1 %vm313_vm2, %v11140_v31  ;;  %8320 = vmatprep.mubr.f32.mxu0 %v11464_v0 }
 0x57d   : > { %v8240_v44 = vpop.permute.xlu1 %8239  ;;  %8391 = vmatprep.mubr.f32.mxu1 %v11464_v0 }
 0x57e   : > { %v8244_v45 = vsel %vm1239_vm4, %v8238_v41, %v8240_v44  ;;  %v8242_v8 = vpop.permute.xlu0 %8241  ;;  %8256 = vmatprep.subr.mxu0 %v8248_v43 }
 0x57f   : > { %v8243_v47 = vsel %vm1239_vm4, %v8240_v44, %v8242_v8  ;;  %v8246_v4 = vsel %vm1239_vm4, %v8242_v8, %v8236_v36  ;;  %v8249_v10 = vmul.f32 %v8244_v45, %v11750_v33 }
 0x580   : > { %v8247_v23 = vmul.f32 %v8246_v4, %v11740_v29  ;;  %v8250_v2 = vmul.f32 %v8243_v47, %v11736_v28 }
 0x581   : > { %v8556_v11 = vpop.permute.xlu1 %8555 }
 0x582   : > { %v8558_v15 = vpop.permute.xlu0 %8557  ;;  %8257 = vmatpush1.msra.mxu0 %v8247_v23  ;;  %8327 = vmatprep.subr.mxu1 %v8250_v2  ;;  %v11149_v2 = vld [vmem:[%s13060_s2 + $0x100] sm:$0xff] }
 0x583   : > { %v8562_v17 = vsel %vm1876_vm5, %v8556_v11, %v8558_v15  ;;  %11144 = vmatmul.mubr.msk.f32.vlgmr.msra.gmra.mrb[10].mxu0 %vm313_vm2, %v11143_v48  ;;  %8328 = vmatpush1.msra.mxu1 %v8249_v10 }
 0x584   : > { %v8566_v22 = vmul.f32 %v8562_v17, %v11789_v54  ;;  %8407 = vmatprep.subr.mxu0 %v12565_v13  ;;  %11145 = vmatmul.mubr.msk.f32.vlgmr.msra.gmra.mrb[10].mxu1 %vm313_vm2, %v11143_v48 }
 0x585   : > { %8408 = vmatpush1.msra.mxu0 %v12563_v39  ;;  %8478 = vmatprep.subr.mxu1 %v12573_v7  ;;  %v8554_v25 = vpop.permute.xlu1 %8553 }
 0x586   : > { %8479 = vmatpush1.msra.mxu1 %v12571_v14  ;;  %v8560_v32 = vpop.permute.xlu0 %8559  ;;  %8574 = vmatprep.subr.mxu0 %v8566_v22  ;;  %v8563_v30 = vsel %vm1876_vm5, %v8554_v25, %v8556_v11  ;;  %v11146_v14 = vld [vmem:[%s13060_s2 + $0xf8] sm:$0xff] }
 0x587   : > { %v8564_v31 = vsel %vm1876_vm5, %v8560_v32, %v8554_v25  ;;  %8471 = vmatprep.mubr.f32.mxu0 %v11464_v0  ;;  %8542 = vmatprep.mubr.f32.mxu1 %v11464_v0  ;;  %v8561_v39 = vsel %vm1876_vm5, %v8558_v15, %v8560_v32  ;;  %v8565_v35 = vmul.f32 %v8563_v30, %v11801_v59 }
 0x588   : > { %v8568_v13 = vmul.f32 %v8564_v31, %v11796_v58  ;;  %v8567_v41 = vmul.f32 %v8561_v39, %v11813_v6 }
 0x589   : > { %v8723_v7 = vpop.permute.xlu1 %8722 }
 0x58a   : > { %v8725_v36 = vpop.permute.xlu0 %8724  ;;  %8645 = vmatprep.subr.mxu1 %v8568_v13 }
 0x58b   : > { %v8729_v61 = vsel %vm2211_vm6, %v8723_v7, %v8725_v36  ;;  %11147 = vmatmul.mubr.msk.f32.vlgmr.msra.gmra.mrb[10].mxu0 %vm313_vm2, %v11146_v14 }
 0x58c   : > { %v8733_v43 = vmul.f32 %v8729_v61, %v11838_v3  ;;  %8575 = vmatpush1.msra.mxu0 %v8565_v35  ;;  %11148 = vmatmul.mubr.msk.f32.vlgmr.msra.gmra.mrb[10].mxu1 %vm313_vm2, %v11146_v14  ;;  %v11152_v14 = vld [vmem:[%s13060_s2 + $0x108] sm:$0xff] }
 0x58d   : > { %8646 = vmatpush1.msra.mxu1 %v8567_v41  ;;  %v8721_v44 = vpop.permute.xlu1 %8720  ;;  %8638 = vmatprep.mubr.f32.mxu0 %v11464_v0 }
 0x58e   : > { %v8727_v45 = vpop.permute.xlu0 %8726  ;;  %8741 = vmatprep.subr.mxu0 %v8733_v43  ;;  %8709 = vmatprep.mubr.f32.mxu1 %v11464_v0  ;;  %v8730_v8 = vsel %vm2211_vm6, %v8721_v44, %v8723_v7 }
 0x58f   : > { %v8731_v47 = vsel %vm2211_vm6, %v8727_v45, %v8721_v44  ;;  %v8728_v4 = vsel %vm2211_vm6, %v8725_v36, %v8727_v45  ;;  %v8732_v10 = vmul.f32 %v8730_v8, %v11850_v1 }
 0x590   : > { %v8735_v23 = vmul.f32 %v8731_v47, %v11846_v27  ;;  %v8734_v15 = vmul.f32 %v8728_v4, %v11861_v34 }
 0x591   : > { %v8890_v48 = vpop.permute.xlu1 %8889 }
 0x592   : > { %v8892_v11 = vpop.permute.xlu0 %8891  ;;  %8812 = vmatprep.subr.mxu1 %v8735_v23 }
 0x593   : > { %v8896_v17 = vsel %vm2546_vm7, %v8890_v48, %v8892_v11  ;;  %11150 = vmatmul.mubr.msk.f32.vlgmr.msra.gmra.mrb[10].mxu0 %vm313_vm2, %v11149_v2 }
 0x594   : > { %v8900_v22 = vmul.f32 %v8896_v17, %v11882_v46  ;;  %8742 = vmatpush1.msra.mxu0 %v8732_v10  ;;  %11151 = vmatmul.mubr.msk.f32.vlgmr.msra.gmra.mrb[10].mxu1 %vm313_vm2, %v11149_v2  ;;  %v11155_v2 = vld [vmem:[%s13060_s2 + $0x110] sm:$0xff] }
 0x595   : > { %8813 = vmatpush1.msra.mxu1 %v8734_v15  ;;  %v8888_v25 = vpop.permute.xlu1 %8887  ;;  %8805 = vmatprep.mubr.f32.mxu0 %v11464_v0 }
 0x596   : > { %v8894_v32 = vpop.permute.xlu0 %8893  ;;  %8908 = vmatprep.subr.mxu0 %v8900_v22  ;;  %8876 = vmatprep.mubr.f32.mxu1 %v11464_v0  ;;  %v8897_v30 = vsel %vm2546_vm7, %v8888_v25, %v8890_v48 }
 0x597   : > { %v8898_v31 = vsel %vm2546_vm7, %v8894_v32, %v8888_v25  ;;  %v8895_v39 = vsel %vm2546_vm7, %v8892_v11, %v8894_v32  ;;  %v8899_v35 = vmul.f32 %v8897_v30, %v11893_v50  ;;  %v11158_v11 = vld [vmem:[%s13060_s2 + $0x118] sm:$0xff] }
 0x598   : > { %v8902_v13 = vmul.f32 %v8898_v31, %v11889_v49  ;;  %v8901_v41 = vmul.f32 %v8895_v39, %v11903_v56 }
 0x599   : > { %v9057_v7 = vpop.permute.xlu1 %9056 }
 0x59a   : > { %v9059_v36 = vpop.permute.xlu0 %9058  ;;  %8979 = vmatprep.subr.mxu1 %v8902_v13 }
 0x59b   : > { %v9063_v61 = vsel %vm2881_vm8, %v9057_v7, %v9059_v36  ;;  %11153 = vmatmul.mubr.msk.f32.vlgmr.msra.gmra.mrb[10].mxu0 %vm313_vm2, %v11152_v14 }
 0x59c   : > { %v9067_v43 = vmul.f32 %v12512_v42, %v9063_v61  ;;  %8909 = vmatpush1.msra.mxu0 %v8899_v35  ;;  %11154 = vmatmul.mubr.msk.f32.vlgmr.msra.gmra.mrb[10].mxu1 %vm313_vm2, %v11152_v14 }
 0x59d   : > { %8980 = vmatpush1.msra.mxu1 %v8901_v41  ;;  %v9055_v44 = vpop.permute.xlu1 %9054  ;;  %8972 = vmatprep.mubr.f32.mxu0 %v11464_v0 }
 0x59e   : > { %v9061_v45 = vpop.permute.xlu0 %9060  ;;  %9075 = vmatprep.subr.mxu0 %v9067_v43  ;;  %9043 = vmatprep.mubr.f32.mxu1 %v11464_v0  ;;  %v9064_v8 = vsel %vm2881_vm8, %v9055_v44, %v9057_v7 }
 0x59f   : > { %v9065_v47 = vsel %vm2881_vm8, %v9061_v45, %v9055_v44  ;;  %v9062_v4 = vsel %vm2881_vm8, %v9059_v36, %v9061_v45  ;;  %v9066_v48 = vmul.f32 %v12534_v12, %v9064_v8 }
 0x5a0   : > { %v9069_v23 = vmul.f32 %v12524_v16, %v9065_v47  ;;  %v9068_v10 = vmul.f32 %v12541_v51, %v9062_v4 }
 0x5a2   : > { %9146 = vmatprep.subr.mxu1 %v9069_v23 }
 0x5a3   : > { %11156 = vmatmul.mubr.msk.f32.vlgmr.msra.gmra.mrb[10].mxu0 %vm313_vm2, %v11155_v2 }
 0x5a4   : > { %9076 = vmatpush1.msra.mxu0 %v9066_v48  ;;  %11157 = vmatmul.mubr.msk.f32.vlgmr.msra.gmra.mrb[10].mxu1 %vm313_vm2, %v11155_v2 }
 0x5a5   : > { %9147 = vmatpush1.msra.mxu1 %v9068_v10  ;;  %9245 = vmatprep.subr.mxu0 %v12240_v57  ;;  %v11162_v57 = vld [vmem:[%s13061_s3 + $0x8] sm:$0xff] }
 0x5a6   : > { %9316 = vmatprep.subr.mxu1 %v12248_v63  ;;  %9139 = vmatprep.mubr.f32.mxu0 %v11464_v0 }
 0x5a7   : > { %9210 = vmatprep.mubr.f32.mxu1 %v11464_v0 }
 0x5ab   : > { %11159 = vmatmul.mubr.msk.f32.vlgmr.msra.gmra.mrb[10].mxu0 %vm313_vm2, %v11158_v11 }
 0x5ac   : > { %9246 = vmatpush1.msra.mxu0 %v12238_v52  ;;  %11160 = vmatmul.mubr.msk.f32.vlgmr.msra.gmra.mrb[10].mxu1 %vm313_vm2, %v11158_v11 }
 0x5ad   : > { %9317 = vmatpush1.msra.mxu1 %v12246_v60  ;;  %9309 = vmatprep.mubr.f32.mxu0 %v11464_v0 }
 0x5ae   : > { %9380 = vmatprep.mubr.f32.mxu1 %v11464_v0  ;;  %v9226_v52 = vpop.permute.xlu1 %9225 }
 0x5af   : > { %11163 = vmatmul.mubr.msk.f32.vlgmr.msra.gmra.mrb[12].mxu0 %vm313_vm2, %v11162_v57  ;;  %v9396_v47 = vpop.permute.xlu0 %9395 }
 0x5b0   : > { %11164 = vmatmul.mubr.msk.f32.vlgmr.msra.gmra.mrb[12].mxu1 %vm313_vm2, %v11162_v57  ;;  %9513 = vmatprep.mubr.f32.mxu0 %v11464_v0 }
 0x5b1   : > { %9584 = vmatprep.mubr.f32.mxu1 %v11464_v0 }
 0x67e   : > { %v9141_v63 = vpop.f32.mrb[10].mxu0 }
 0x67f   : > { %v9228_v15 = vadd.f32 %v9226_v52, %v9141_v63  ;;  %v9143_v17 = vpop.f32.mrb[11].mxu0  ;;  %v9212_v22 = vpop.f32.mrb[10].mxu1 }
 0x680   : > { %v9229_v25 = vadd.f32 %v9226_v52, %v9143_v17  ;;  %v9230_v32 = vadd.f32 %v9226_v52, %v9212_v22  ;;  %v9214_v60 = vpop.f32.mrb[11].mxu1 }
 0x681   : > { %v9232_v30 = vmul.f32 0.1, %v9228_v15  ;;  %v9231_v31 = vadd.f32 %v9226_v52, %v9214_v60 }
 0x682   : > { %v9233_v39 = vmul.f32 0.1, %v9229_v25  ;;  %v9234_v13 = vmul.f32 0.1, %v9230_v32  ;;  %v9311_v14 = vpop.f32.mrb[12].mxu0 }
 0x683   : > { %v9235_v7 = vmul.f32 0.1, %v9231_v31  ;;  %v9236_v35 = vmax.f32 %v9228_v15, %v9232_v30  ;;  %v9313_v36 = vpop.f32.mrb[13].mxu0  ;;  %v9382_v41 = vpop.f32.mrb[12].mxu1  ;;  %v11193_v30 = vld [vmem:[%s13062_s4 + $0x30] sm:$0xff] }
 0x684   : > { %v9237_v61 = vmax.f32 %v9229_v25, %v9233_v39  ;;  %v9238_v43 = vmax.f32 %v9230_v32, %v9234_v13  ;;  %v9384_v44 = vpop.f32.mrb[13].mxu1 }
 0x685   : > { %v9387_v45 = vadd.f32 %v9311_v14, %v9236_v35  ;;  %v9239_v8 = vmax.f32 %v9231_v31, %v9235_v7 }
 0x686   : > { %v9388_v4 = vadd.f32 %v9313_v36, %v9237_v61  ;;  %v9389_v23 = vadd.f32 %v9382_v41, %v9238_v43 }
 0x687   : > { %v9398_v2 = vadd.f32 %v9396_v47, %v9387_v45  ;;  %v9390_v48 = vadd.f32 %v9384_v44, %v9239_v8 }
 0x688   : > { %v9399_v10 = vadd.f32 %v9396_v47, %v9388_v4  ;;  %v9400_v11 = vadd.f32 %v9396_v47, %v9389_v23 }
 0x689   : > { %v9402_v57 = vmul.f32 0.2, %v9398_v2  ;;  %v9401_v52 = vadd.f32 %v9396_v47, %v9390_v48 }
 0x68a   : > { %v9403_v63 = vmul.f32 0.2, %v9399_v10  ;;  %v9404_v15 = vmul.f32 0.2, %v9400_v11 }
 0x68b   : > { %v12815_v17 = vmax.f32 %v9398_v2, %v9402_v57  ;;  %v9405_v25 = vmul.f32 0.2, %v9401_v52 }
 0x68c   : > { %v12817_v22 = vmax.f32 %v9399_v10, %v9403_v63  ;;  %v12823_v32 = vmax.f32 %v9400_v11, %v9404_v15  ;;  %v11166_v11 = vld [vmem:[%s13060_s2 + $0x1b0] sm:$0xff] }
 0x68d   : > { %9428 = vrot.lane.b32.xlu1 %v12815_v17, %s11465_s25  ;;  %v12825_v60 = vmax.f32 %v9401_v52, %v9405_v25 }
 0x68e   : > { %9430 = vrot.lane.b32.xlu0 %v12817_v22, %s11465_s25 }
 0x691   : > { %9432 = vrot.lane.b32.xlu1 %v12823_v32, %s11465_s25 }
 0x692   : > { %9434 = vrot.lane.b32.xlu0 %v12825_v60, %s11465_s25  ;;  %s226_s25 = scalar_lea.vmem %s13063_s5, %s10990_s8 }
 0x695   : > { %9410 = vrot.lane.b32.xlu1 %v12815_v17, %s11466_s26 }
 0x696   : > { %9412 = vrot.lane.b32.xlu0 %v12817_v22, %s11466_s26 }
 0x699   : > { %9414 = vrot.lane.b32.xlu1 %v12823_v32, %s11466_s26 }
 0x69a   : > { %9416 = vrot.lane.b32.xlu0 %v12825_v60, %s11466_s26 }
 0x69d   : > { %9736 = vrot.lane.b32.xlu1 %v12815_v17, %s11467_s27 }
 0x69e   : > { %9738 = vrot.lane.b32.xlu0 %v12817_v22, %s11467_s27 }
 0x6a1   : > { %9740 = vrot.lane.b32.xlu1 %v12823_v32, %s11467_s27 }
 0x6a2   : > { %9742 = vrot.lane.b32.xlu0 %v12825_v60, %s11467_s27 }
 0x6a5   : > { %9903 = vrot.lane.b32.xlu1 %v12815_v17, %s11468_s28 }
 0x6a6   : > { %9905 = vrot.lane.b32.xlu0 %v12817_v22, %s11468_s28 }
 0x6a9   : > { %9907 = vrot.lane.b32.xlu1 %v12823_v32, %s11468_s28 }
 0x6aa   : > { %9909 = vrot.lane.b32.xlu0 %v12825_v60, %s11468_s28 }
 0x6ad   : > { %10223 = vrot.lane.b32.xlu1 %v12817_v22, %s11469_s29 }
 0x6ae   : > { %10225 = vrot.lane.b32.xlu0 %v12823_v32, %s11469_s29 }
 0x6b1   : > { %10221 = vrot.lane.b32.xlu1 %v12815_v17, %s11469_s29 }
 0x6b2   : > { %10227 = vrot.lane.b32.xlu0 %v12825_v60, %s11469_s29 }
 0x6b5   : > { %10390 = vrot.lane.b32.xlu1 %v12817_v22, %s11470_s30 }
 0x6b6   : > { %10392 = vrot.lane.b32.xlu0 %v12823_v32, %s11470_s30 }
 0x6b9   : > { %10388 = vrot.lane.b32.xlu1 %v12815_v17, %s11470_s30 }
 0x6ba   : > { %10394 = vrot.lane.b32.xlu0 %v12825_v60, %s11470_s30 }
 0x6bd   : > { %10557 = vrot.lane.b32.xlu1 %v12817_v22, %s11471_s6 }
 0x6be   : > { %10559 = vrot.lane.b32.xlu0 %v12823_v32, %s11471_s6 }
 0x6c1   : > { %10555 = vrot.lane.b32.xlu1 %v12815_v17, %s11471_s6 }
 0x6c2   : > { %10561 = vrot.lane.b32.xlu0 %v12825_v60, %s11471_s6 }
 0x6c5   : > { %10724 = vrot.lane.b32.xlu1 %v12817_v22, %s11472_s7 }
 0x6c6   : > { %10726 = vrot.lane.b32.xlu0 %v12823_v32, %s11472_s7 }
 0x6c9   : > { %10722 = vrot.lane.b32.xlu1 %v12815_v17, %s11472_s7 }
 0x6ca   : > { %10728 = vrot.lane.b32.xlu0 %v12825_v60, %s11472_s7 }
 0x6cd   : > { %10901 = vperm.xlu1 %11447, %v11193_v30  }
 0x6ff   : > { %v9429_v31 = vpop.permute.xlu1 %9428 }
 0x700   : > { %v9431_v39 = vpop.permute.xlu0 %9430 }
 0x701   : > { %v9438_v13 = vsel %vm286_vm0, %v9429_v31, %v9431_v39 }
 0x702   : > { %v9441_v14 = vmul.f32 %v9438_v13, %v11632_v19  ;;  %v11167_v19 = vld [vmem:[%s13060_s2 + $0x1b8] sm:$0xff]  ;;  %v11172_v13 = vld [vmem:[%s13060_s2 + $0x1c0] sm:$0xff] }
 0x703   : > { %v9433_v7 = vpop.permute.xlu1 %9432 }
 0x704   : > { %v9437_v35 = vsel %vm286_vm0, %v9431_v39, %v9433_v7  ;;  %v9435_v36 = vpop.permute.xlu0 %9434  ;;  %9449 = vmatprep.subr.mxu0 %v9441_v14 }
 0x705   : > { %v9436_v41 = vsel %vm286_vm0, %v9433_v7, %v9435_v36  ;;  %v9439_v61 = vsel %vm286_vm0, %v9435_v36, %v9429_v31  ;;  %v9442_v45 = vmul.f32 %v9437_v35, %v11638_v21 }
 0x706   : > { %v9440_v43 = vmul.f32 %v9439_v61, %v11635_v20  ;;  %v9443_v44 = vmul.f32 %v9436_v41, %v11629_v18 }
 0x707   : > { %v9411_v8 = vpop.permute.xlu1 %9410 }
 0x708   : > { %v9413_v47 = vpop.permute.xlu0 %9412  ;;  %9450 = vmatpush1.msra.mxu0 %v9440_v43  ;;  %9520 = vmatprep.subr.mxu1 %v9443_v44 }
 0x709   : > { %v9420_v4 = vsel %vm250_vm1, %v9411_v8, %v9413_v47  ;;  %11168 = vmatmul.mubr.msk.f32.vlgmr.msra.gmra.mrb[2].mxu0 %vm313_vm2, %v11167_v19  ;;  %9521 = vmatpush1.msra.mxu1 %v9442_v45 }
 0x70a   : > { %v9423_v20 = vmul.f32 %v9420_v4, %v11642_v24  ;;  %11169 = vmatmul.mubr.msk.f32.vlgmr.msra.gmra.mrb[2].mxu1 %vm313_vm2, %v11167_v19  ;;  %9658 = vmatprep.mubr.f32.mxu0 %v11464_v0  ;;  %v11175_v19 = vld [vmem:[%s13060_s2 + $0x1c8] sm:$0xff] }
 0x70b   : > { %v9415_v18 = vpop.permute.xlu1 %9414  ;;  %9729 = vmatprep.mubr.f32.mxu1 %v11464_v0 }
 0x70c   : > { %v9419_v21 = vsel %vm250_vm1, %v9413_v47, %v9415_v18  ;;  %v9417_v23 = vpop.permute.xlu0 %9416  ;;  %9594 = vmatprep.subr.mxu0 %v9423_v20 }
 0x70d   : > { %v9418_v2 = vsel %vm250_vm1, %v9415_v18, %v9417_v23  ;;  %v9421_v48 = vsel %vm250_vm1, %v9417_v23, %v9411_v8  ;;  %v9424_v57 = vmul.f32 %v9419_v21, %v11667_v38 }
 0x70e   : > { %v9422_v24 = vmul.f32 %v9421_v48, %v11662_v37  ;;  %v9425_v10 = vmul.f32 %v9418_v2, %v11671_v40 }
 0x70f   : > { %v9737_v52 = vpop.permute.xlu1 %9736 }
 0x710   : > { %v9739_v63 = vpop.permute.xlu0 %9738  ;;  %9595 = vmatpush1.msra.mxu0 %v9422_v24  ;;  %9665 = vmatprep.subr.mxu1 %v9425_v10 }
 0x711   : > { %v9746_v15 = vsel %vm904_vm3, %v9737_v52, %v9739_v63  ;;  %11170 = vmatmul.mubr.msk.f32.vlgmr.msra.gmra.mrb[2].mxu0 %vm313_vm2, %v11166_v11  ;;  %9666 = vmatpush1.msra.mxu1 %v9424_v57 }
 0x712   : > { %v9749_v37 = vmul.f32 %v9746_v15, %v11690_v53  ;;  %11171 = vmatmul.mubr.msk.f32.vlgmr.msra.gmra.mrb[2].mxu1 %vm313_vm2, %v11166_v11  ;;  %9821 = vmatprep.mubr.f32.mxu0 %v11464_v0  ;;  %v11181_v11 = vld [vmem:[%s13060_s2 + $0x1d8] sm:$0xff] }
 0x713   : > { %v9741_v40 = vpop.permute.xlu1 %9740  ;;  %9892 = vmatprep.mubr.f32.mxu1 %v11464_v0 }
 0x714   : > { %v9745_v38 = vsel %vm904_vm3, %v9739_v63, %v9741_v40  ;;  %v9743_v25 = vpop.permute.xlu0 %9742  ;;  %9757 = vmatprep.subr.mxu0 %v9749_v37 }
 0x715   : > { %v9744_v30 = vsel %vm904_vm3, %v9741_v40, %v9743_v25  ;;  %v9747_v31 = vsel %vm904_vm3, %v9743_v25, %v9737_v52  ;;  %v9750_v14 = vmul.f32 %v9745_v38, %v11716_v5 }
 0x716   : > { %v9748_v53 = vmul.f32 %v9747_v31, %v11711_v62  ;;  %v9751_v39 = vmul.f32 %v9744_v30, %v11697_v55  ;;  %v11184_v30 = vld [vmem:[%s13060_s2 + $0x1e0] sm:$0xff] }
 0x717   : > { %v9904_v7 = vpop.permute.xlu1 %9903 }
 0x718   : > { %v9906_v35 = vpop.permute.xlu0 %9905  ;;  %9758 = vmatpush1.msra.mxu0 %v9748_v53  ;;  %9828 = vmatprep.subr.mxu1 %v9751_v39 }
 0x719   : > { %v9913_v36 = vsel %vm1239_vm4, %v9904_v7, %v9906_v35  ;;  %11173 = vmatmul.mubr.msk.f32.vlgmr.msra.gmra.mrb[2].mxu0 %vm313_vm2, %v11172_v13  ;;  %9829 = vmatpush1.msra.mxu1 %v9750_v14 }
 0x71a   : > { %v9916_v62 = vmul.f32 %v9913_v36, %v11730_v26  ;;  %11174 = vmatmul.mubr.msk.f32.vlgmr.msra.gmra.mrb[2].mxu1 %vm313_vm2, %v11172_v13  ;;  %9988 = vmatprep.mubr.f32.mxu0 %v11464_v0 }
 0x71b   : > { %v9908_v55 = vpop.permute.xlu1 %9907  ;;  %10059 = vmatprep.mubr.f32.mxu1 %v11464_v0 }
 0x71c   : > { %v9912_v5 = vsel %vm1239_vm4, %v9906_v35, %v9908_v55  ;;  %v9910_v41 = vpop.permute.xlu0 %9909  ;;  %9924 = vmatprep.subr.mxu0 %v9916_v62  ;;  %v11187_v62 = vld [vmem:[%s13060_s2 + $0x1e8] sm:$0xff] }
 0x71d   : > { %v9911_v61 = vsel %vm1239_vm4, %v9908_v55, %v9910_v41  ;;  %v9914_v43 = vsel %vm1239_vm4, %v9910_v41, %v9904_v7  ;;  %v9917_v45 = vmul.f32 %v9912_v5, %v11750_v33 }
 0x71e   : > { %v9915_v26 = vmul.f32 %v9914_v43, %v11740_v29  ;;  %v9918_v44 = vmul.f32 %v9911_v61, %v11736_v28 }
 0x71f   : > { %v10224_v8 = vpop.permute.xlu1 %10223 }
 0x720   : > { %v10226_v47 = vpop.permute.xlu0 %10225  ;;  %9925 = vmatpush1.msra.mxu0 %v9915_v26  ;;  %9995 = vmatprep.subr.mxu1 %v9918_v44 }
 0x721   : > { %v10230_v4 = vsel %vm1876_vm5, %v10224_v8, %v10226_v47  ;;  %11176 = vmatmul.mubr.msk.f32.vlgmr.msra.gmra.mrb[2].mxu0 %vm313_vm2, %v11175_v19  ;;  %9996 = vmatpush1.msra.mxu1 %v9917_v45 }
 0x722   : > { %v10234_v29 = vmul.f32 %v10230_v4, %v11789_v54  ;;  %10075 = vmatprep.subr.mxu0 %v12817_v22  ;;  %11177 = vmatmul.mubr.msk.f32.vlgmr.msra.gmra.mrb[2].mxu1 %vm313_vm2, %v11175_v19  ;;  %v11178_v22 = vld [vmem:[%s13060_s2 + $0x1d0] sm:$0xff] }
 0x723   : > { %10076 = vmatpush1.msra.mxu0 %v12815_v17  ;;  %10146 = vmatprep.subr.mxu1 %v12825_v60  ;;  %v10222_v28 = vpop.permute.xlu1 %10221 }
 0x724   : > { %10147 = vmatpush1.msra.mxu1 %v12823_v32  ;;  %v10228_v33 = vpop.permute.xlu0 %10227  ;;  %10242 = vmatprep.subr.mxu0 %v10234_v29  ;;  %v10231_v20 = vsel %vm1876_vm5, %v10222_v28, %v10224_v8 }
 0x725   : > { %v10232_v18 = vsel %vm1876_vm5, %v10228_v33, %v10222_v28  ;;  %10139 = vmatprep.mubr.f32.mxu0 %v11464_v0  ;;  %10210 = vmatprep.mubr.f32.mxu1 %v11464_v0  ;;  %v10229_v54 = vsel %vm1876_vm5, %v10226_v47, %v10228_v33  ;;  %v10233_v60 = vmul.f32 %v10231_v20, %v11801_v59 }
 0x726   : > { %v10236_v17 = vmul.f32 %v10232_v18, %v11796_v58  ;;  %v10235_v23 = vmul.f32 %v10229_v54, %v11813_v6 }
 0x727   : > { %v10391_v32 = vpop.permute.xlu1 %10390 }
 0x728   : > { %v10393_v21 = vpop.permute.xlu0 %10392  ;;  %10313 = vmatprep.subr.mxu1 %v10236_v17 }
 0x729   : > { %v10397_v2 = vsel %vm2211_vm6, %v10391_v32, %v10393_v21  ;;  %11179 = vmatmul.mubr.msk.f32.vlgmr.msra.gmra.mrb[2].mxu0 %vm313_vm2, %v11178_v22 }
 0x72a   : > { %v10401_v48 = vmul.f32 %v10397_v2, %v11838_v3  ;;  %10243 = vmatpush1.msra.mxu0 %v10233_v60  ;;  %11180 = vmatmul.mubr.msk.f32.vlgmr.msra.gmra.mrb[2].mxu1 %vm313_vm2, %v11178_v22 }
 0x72b   : > { %10314 = vmatpush1.msra.mxu1 %v10235_v23  ;;  %v10389_v58 = vpop.permute.xlu1 %10388  ;;  %10306 = vmatprep.mubr.f32.mxu0 %v11464_v0 }
 0x72c   : > { %v10395_v24 = vpop.permute.xlu0 %10394  ;;  %10409 = vmatprep.subr.mxu0 %v10401_v48  ;;  %10377 = vmatprep.mubr.f32.mxu1 %v11464_v0  ;;  %v10398_v59 = vsel %vm2211_vm6, %v10389_v58, %v10391_v32 }
 0x72d   : > { %v10399_v6 = vsel %vm2211_vm6, %v10395_v24, %v10389_v58  ;;  %v10396_v3 = vsel %vm2211_vm6, %v10393_v21, %v10395_v24  ;;  %v10400_v52 = vmul.f32 %v10398_v59, %v11850_v1 }
 0x72e   : > { %v10403_v10 = vmul.f32 %v10399_v6, %v11846_v27  ;;  %v10402_v15 = vmul.f32 %v10396_v3, %v11861_v34 }
 0x72f   : > { %v10558_v57 = vpop.permute.xlu1 %10557 }
 0x730   : > { %v10560_v63 = vpop.permute.xlu0 %10559  ;;  %10480 = vmatprep.subr.mxu1 %v10403_v10 }
 0x731   : > { %v10564_v37 = vsel %vm2546_vm7, %v10558_v57, %v10560_v63  ;;  %11182 = vmatmul.mubr.msk.f32.vlgmr.msra.gmra.mrb[2].mxu0 %vm313_vm2, %v11181_v11 }
 0x732   : > { %v10568_v40 = vmul.f32 %v10564_v37, %v11882_v46  ;;  %10410 = vmatpush1.msra.mxu0 %v10400_v52  ;;  %11183 = vmatmul.mubr.msk.f32.vlgmr.msra.gmra.mrb[2].mxu1 %vm313_vm2, %v11181_v11 }
 0x733   : > { %10481 = vmatpush1.msra.mxu1 %v10402_v15  ;;  %v10556_v27 = vpop.permute.xlu1 %10555  ;;  %10473 = vmatprep.mubr.f32.mxu0 %v11464_v0 }
 0x734   : > { %v10562_v38 = vpop.permute.xlu0 %10561  ;;  %10576 = vmatprep.subr.mxu0 %v10568_v40  ;;  %10544 = vmatprep.mubr.f32.mxu1 %v11464_v0  ;;  %v10565_v1 = vsel %vm2546_vm7, %v10556_v27, %v10558_v57 }
 0x735   : > { %v10566_v34 = vsel %vm2546_vm7, %v10562_v38, %v10556_v27  ;;  %v10563_v46 = vsel %vm2546_vm7, %v10560_v63, %v10562_v38  ;;  %v10567_v53 = vmul.f32 %v10565_v1, %v11893_v50 }
 0x736   : > { %v10570_v25 = vmul.f32 %v10566_v34, %v11889_v49  ;;  %v10569_v13 = vmul.f32 %v10563_v46, %v11903_v56 }
 0x737   : > { %v10725_v31 = vpop.permute.xlu1 %10724 }
 0x738   : > { %v10727_v39 = vpop.permute.xlu0 %10726  ;;  %10647 = vmatprep.subr.mxu1 %v10570_v25 }
 0x739   : > { %v10731_v14 = vsel %vm2881_vm8, %v10725_v31, %v10727_v39  ;;  %11185 = vmatmul.mubr.msk.f32.vlgmr.msra.gmra.mrb[2].mxu0 %vm313_vm2, %v11184_v30 }
 0x73a   : > { %v10735_v7 = vmul.f32 %v12512_v42, %v10731_v14  ;;  %10577 = vmatpush1.msra.mxu0 %v10567_v53  ;;  %11186 = vmatmul.mubr.msk.f32.vlgmr.msra.gmra.mrb[2].mxu1 %vm313_vm2, %v11184_v30 }
 0x73b   : > { %10648 = vmatpush1.msra.mxu1 %v10569_v13  ;;  %v10723_v49 = vpop.permute.xlu1 %10722  ;;  %10640 = vmatprep.mubr.f32.mxu0 %v11464_v0 }
 0x73c   : > { %v10729_v35 = vpop.permute.xlu0 %10728  ;;  %10743 = vmatprep.subr.mxu0 %v10735_v7  ;;  %10711 = vmatprep.mubr.f32.mxu1 %v11464_v0  ;;  %v10732_v50 = vsel %vm2881_vm8, %v10723_v49, %v10725_v31 }
 0x73d   : > { %v10733_v56 = vsel %vm2881_vm8, %v10729_v35, %v10723_v49  ;;  %v10730_v42 = vsel %vm2881_vm8, %v10727_v39, %v10729_v35  ;;  %v10734_v55 = vmul.f32 %v12534_v12, %v10732_v50 }
 0x73e   : > { %v10737_v36 = vmul.f32 %v12524_v16, %v10733_v56  ;;  %v10736_v5 = vmul.f32 %v12541_v51, %v10730_v42 }
 0x740   : > { %10814 = vmatprep.subr.mxu1 %v10737_v36 }
 0x741   : > { %11188 = vmatmul.mubr.msk.f32.vlgmr.msra.gmra.mrb[2].mxu0 %vm313_vm2, %v11187_v62 }
 0x742   : > { %10744 = vmatpush1.msra.mxu0 %v10734_v55  ;;  %11189 = vmatmul.mubr.msk.f32.vlgmr.msra.gmra.mrb[2].mxu1 %vm313_vm2, %v11187_v62 }
 0x743   : > { %10815 = vmatpush1.msra.mxu1 %v10736_v5  ;;  %10807 = vmatprep.mubr.f32.mxu0 %v11464_v0 }
 0x744   : > { %10878 = vmatprep.mubr.f32.mxu1 %v11464_v0 }
 0x749   : > { %11191 = vmatmul.mubr.msk.f32.vlgmr.msra.gmra.mrb[2].mxu0 %vm313_vm2, %v11190_v9 }
 0x74a   : > { %11192 = vmatmul.mubr.msk.f32.vlgmr.msra.gmra.mrb[2].mxu1 %vm313_vm2, %v11190_v9 }
 0x74c   : > { %v10902_v16 = vpop.permute.xlu1 %10901 }
 0x81c   : > { %v10809_v12 = vpop.f32.mrb[2].mxu0 }
 0x81d   : > { %v10904_v51 = vadd.f32 %v10902_v16, %v10809_v12  ;;  %v10811_v41 = vpop.f32.mrb[3].mxu0  ;;  %v10880_v61 = vpop.f32.mrb[2].mxu1 }
 0x81e   : > { %v10905_v43 = vadd.f32 %v10902_v16, %v10811_v41  ;;  %v10906_v26 = vadd.f32 %v10902_v16, %v10880_v61  ;;  %v10882_v44 = vpop.f32.mrb[3].mxu1 }
 0x81f   : > { %v10908_v19 = vmul.f32 0.2, %v10904_v51  ;;  %v10907_v45 = vadd.f32 %v10902_v16, %v10882_v44 }
 0x820   : > { %v10909_v0 = vmul.f32 0.2, %v10905_v43  ;;  %v10910_v8 = vmul.f32 0.2, %v10906_v26 }
 0x821   : > { %v10912_v47 = vmax.f32 %v10904_v51, %v10908_v19  ;;  %v10911_v4 = vmul.f32 0.2, %v10907_v45 }
 0x822   : > { %v10913_v29 = vmax.f32 %v10905_v43, %v10909_v0  ;;  %v10914_v28 = vmax.f32 %v10906_v26, %v10910_v8 }
 0x823   : > { %v10915_v33 = vmax.f32 %v10907_v45, %v10911_v4 }
 0x824   : > { %v10920_v20 = vcombine.low %v10912_v47, %v10913_v29 }
 0x825   : > { %v10921_v18 = vcombine.low %v10914_v28, %v10915_v33 }
 0x826   : > { %10924 = vst [vmem:[%s226_s25] sm:$0xff] %v10920_v20 }
 0x827   : > { %10925 = vst [vmem:[%s226_s25 + $0x8] sm:$0xff] %v10921_v18 }
 0x828 PF: > { %s15_s18 = sadd.s32 1, %s11462_s18  }
 0x829   : > { %p12_p4 = scmp.ge.s32.totalorder %s15_s18, 4  }
 0x82b   :  { %14 = sbr.rel (!%p12_p4) target bundleno = 1 (0x1), region = 139 }

</bundles_post_ra>
